<compile_context>
chip_gen: v6e
topology: v6e:2x2x1
jax: 0.10.0
libtpu: 0.0.40
codegen_flags: <defaults>
</compile_context>

<pallas_src>
import functools

import jax
import jax.numpy as jnp
from jax.experimental import pallas as pl
from jax.experimental.pallas import tpu as pltpu

MXU_DTYPE = jnp.bfloat16   # MXU input dtype; accumulation is always float32
_EPS = 1e-5                # PyTorch InstanceNorm2d default eps


def _round_up(x, m):
    return (x + m - 1) // m * m


# ----------------------------------------------------------------------------
# Fused conv-layer kernel:  (patches @ W + b) [-> IN] [-> ReLU] [+ skip] [-> tanh]
# ----------------------------------------------------------------------------
def _conv_layer_kernel(*refs, apply_in, relu, residual, tanh_out):
    if residual:
        p_ref, w_ref, b_ref, s_ref, o_ref = refs
    else:
        p_ref, w_ref, b_ref, o_ref = refs
        s_ref = None

    # p: (M, Kdp) bf16, w: (Kdp, Cout) bf16 -> f32 accumulate on the MXU
    y = jnp.dot(p_ref[0], w_ref[...], preferred_element_type=jnp.float32)
    y = y + b_ref[...]                                   # (M, Cout) + (1, Cout)

    if apply_in:                                         # InstanceNorm (biased var)
        mean = jnp.mean(y, axis=0, keepdims=True)
        yc = y - mean
        var = jnp.mean(yc * yc, axis=0, keepdims=True)
        y = yc * jax.lax.rsqrt(var + _EPS)
    if relu:
        y = jnp.maximum(y, 0.0)
    if residual:
        y = y + s_ref[0]
    if tanh_out:
        y = jnp.tanh(y)
    o_ref[0] = y


def _fused_conv_call(patches, w_flat, bias, skip, M, Cout, *,
                     apply_in, relu, tanh_out):
    N, _, Kdp = patches.shape
    residual = skip is not None
    kernel = functools.partial(_conv_layer_kernel, apply_in=apply_in, relu=relu,
                               residual=residual, tanh_out=tanh_out)
    in_specs = [
        pl.BlockSpec((1, M, Kdp), lambda n: (n, 0, 0)),
        pl.BlockSpec((Kdp, Cout), lambda n: (0, 0)),
        pl.BlockSpec((1, Cout), lambda n: (0, 0)),
    ]
    args = [patches, w_flat, bias.reshape(1, Cout)]
    if residual:
        in_specs.append(pl.BlockSpec((1, M, Cout), lambda n: (n, 0, 0)))
        args.append(skip)
    return pl.pallas_call(
        kernel,
        out_shape=jax.ShapeDtypeStruct((N, M, Cout), jnp.float32),
        grid=(N,),
        in_specs=in_specs,
        out_specs=pl.BlockSpec((1, M, Cout), lambda n: (n, 0, 0)),
        compiler_params=pltpu.CompilerParams(dimension_semantics=("parallel",)),
    )(*args)


def conv_layer(x, w_oikk, b, *, stride=1, padding=0, pad_mode="zero",
               apply_in=True, relu=True, skip=None, tanh_out=False):
    """x: NHWC f32, w_oikk: PyTorch Conv2d weight (Cout, Cin, K, K)."""
    Cout, Cin, K, _ = w_oikk.shape
    N = x.shape[0]
    xq = x.astype(MXU_DTYPE)
    if padding > 0:
        mode = "reflect" if pad_mode == "reflect" else "constant"
        xq = jnp.pad(xq, ((0, 0), (padding, padding), (padding, padding), (0, 0)),
                     mode=mode)
    Hp, Wp = xq.shape[1], xq.shape[2]
    Ho = (Hp - K) // stride + 1
    Wo = (Wp - K) // stride + 1

    # im2col glue in JAX; feature order = (kh, kw, cin)
    cols = []
    for kh in range(K):
        for kw in range(K):
            cols.append(xq[:, kh:kh + stride * Ho:stride,
                           kw:kw + stride * Wo:stride, :])
    Kd = K * K * Cin
    patches = jnp.concatenate(cols, axis=-1).reshape(N, Ho * Wo, Kd)
    Kdp = _round_up(Kd, 128)                 # lane-aligned contraction dim
    patches = jnp.pad(patches, ((0, 0), (0, 0), (0, Kdp - Kd)))

    w_flat = jnp.transpose(w_oikk, (2, 3, 1, 0)).reshape(Kd, Cout)
    w_flat = jnp.pad(w_flat, ((0, Kdp - Kd), (0, 0))).astype(MXU_DTYPE)

    skip2 = None if skip is None else skip.reshape(N, Ho * Wo, Cout)
    out = _fused_conv_call(patches, w_flat, b, skip2, Ho * Wo, Cout,
                           apply_in=apply_in, relu=relu, tanh_out=tanh_out)
    return out.reshape(N, Ho, Wo, Cout)


# ----------------------------------------------------------------------------
# Fused ConvTranspose2d(3x3, stride 2, pad 1, out_pad 1) + IN + ReLU
# Sub-pixel phase decomposition with a SINGLE wide matmul:
#   taps (M, 4*Cin)  @  W_all (4*Cin, 4*Cout)  ->  all 4 phases at once.
# ----------------------------------------------------------------------------
def _convT_layer_kernel(p_ref, w_ref, b_ref, o_ref, *, n_phases, cout):
    y = jnp.dot(p_ref[0], w_ref[...], preferred_element_type=jnp.float32)
    y = y + b_ref[...]                                    # (M, n_phases*Cout)
    M = y.shape[0]
    cnt = float(n_phases * M)

    # InstanceNorm stats per channel across all phases (biased variance)
    tot = jnp.zeros((1, cout), jnp.float32)
    for k in range(n_phases):
        tot = tot + jnp.sum(y[:, k * cout:(k + 1) * cout], axis=0, keepdims=True)
    mean = tot / cnt
    yc = y - jnp.tile(mean, (1, n_phases))
    sq = jnp.zeros((1, cout), jnp.float32)
    for k in range(n_phases):
        d = yc[:, k * cout:(k + 1) * cout]
        sq = sq + jnp.sum(d * d, axis=0, keepdims=True)
    inv = jax.lax.rsqrt(sq / cnt + _EPS)

    o_ref[0] = jnp.maximum(yc * jnp.tile(inv, (1, n_phases)), 0.0)


def conv_transpose_layer(x, w_iokk, b):
    """x: NHWC f32, w_iokk: PyTorch ConvTranspose2d weight (Cin, Cout, 3, 3)."""
    N, H, W, C = x.shape
    Cin, Cout, K, _ = w_iokk.shape
    assert K == 3 and Cin == C

    xq = x.astype(MXU_DTYPE)
    xe = jnp.pad(xq, ((0, 0), (0, 1), (0, 1), (0, 0)))   # high-side zero border
    # taps: t0 = x[u,v], t1 = x[u,v+1], t2 = x[u+1,v], t3 = x[u+1,v+1]
    taps = [xq,
            xe[:, :H, 1:W + 1, :],
            xe[:, 1:H + 1, :W, :],
            xe[:, 1:H + 1, 1:W + 1, :]]
    M = H * W
    Kd = 4 * C
    Kdp = _round_up(Kd, 128)
    P = jnp.concatenate([t.reshape(N, M, C) for t in taps], axis=-1)
    P = jnp.pad(P, ((0, 0), (0, 0), (0, Kdp - Kd)))       # (N, M, Kdp) bf16

    # Block-structured weight: rows grouped per tap (t0..t3), columns grouped
    # per output phase k = r*2 + s, where out[2u+r, 2v+s] (derived from
    # PyTorch ConvTranspose2d: oh = 2*ih - 1 + kh, ow = 2*iw - 1 + kw).
    def wt(kh, kw):                                       # (Cin, Cout)
        return w_iokk[:, :, kh, kw]
    zero = jnp.zeros((C, Cout), w_iokk.dtype)
    w_cols = [
        jnp.concatenate([wt(1, 1), zero,     zero,     zero],     axis=0),  # (0,0)
        jnp.concatenate([wt(1, 2), wt(1, 0), zero,     zero],     axis=0),  # (0,1)
        jnp.concatenate([wt(2, 1), zero,     wt(0, 1), zero],     axis=0),  # (1,0)
        jnp.concatenate([wt(2, 2), wt(2, 0), wt(0, 2), wt(0, 0)], axis=0),  # (1,1)
    ]
    Wall = jnp.concatenate(w_cols, axis=1)                # (4C, 4*Cout)
    Wall = jnp.pad(Wall, ((0, Kdp - Kd), (0, 0))).astype(MXU_DTYPE)
    ball = jnp.tile(b.reshape(1, Cout), (1, 4))           # (1, 4*Cout)

    out = pl.pallas_call(
        functools.partial(_convT_layer_kernel, n_phases=4, cout=Cout),
        out_shape=jax.ShapeDtypeStruct((N, M, 4 * Cout), jnp.float32),
        grid=(N,),
        in_specs=[
            pl.BlockSpec((1, M, Kdp), lambda n: (n, 0, 0)),
            pl.BlockSpec((Kdp, 4 * Cout), lambda n: (0, 0)),
            pl.BlockSpec((1, 4 * Cout), lambda n: (0, 0)),
        ],
        out_specs=pl.BlockSpec((1, M, 4 * Cout), lambda n: (n, 0, 0)),
        compiler_params=pltpu.CompilerParams(dimension_semantics=("parallel",)),
    )(P, Wall, ball)

    # interleave phases: column block k = r*2 + s -> out[n, 2u+r, 2v+s, c]
    out = out.reshape(N, H, W, 2, 2, Cout)
    out = jnp.transpose(out, (0, 1, 3, 2, 4, 5)).reshape(N, 2 * H, 2 * W, Cout)
    return out


# ----------------------------------------------------------------------------
# Parameters + forward (mirrors Spec.__init__ / forward)
# ----------------------------------------------------------------------------
def init_params(key, input_nc=3, output_nc=3, ngf=8, n_blocks=2):
    keys = iter(jax.random.split(key, 8 * (6 + 2 * n_blocks)))
    params = {}

    def conv_p(cout, cin, k):
        w = jax.random.normal(next(keys), (cout, cin, k, k), jnp.float32) * 0.05
        b = jax.random.normal(next(keys), (cout,), jnp.float32) * 0.05
        return (w, b)

    params["c0"] = conv_p(ngf, input_nc, 7)
    mult = 1
    for i in range(2):                           # downsampling
        params[f"down{i}"] = conv_p(ngf * mult * 2, ngf * mult, 3)
        mult *= 2
    for i in range(n_blocks):                    # resnet blocks
        params[f"rb{i}_c1"] = conv_p(ngf * mult, ngf * mult, 3)
        params[f"rb{i}_c2"] = conv_p(ngf * mult, ngf * mult, 3)
    for i in range(2):                           # upsampling (conv transpose)
        cin, cout = ngf * mult, ngf * mult // 2
        w = jax.random.normal(next(keys), (cin, cout, 3, 3), jnp.float32) * 0.05
        b = jax.random.normal(next(keys), (cout,), jnp.float32) * 0.05
        params[f"up{i}"] = (w, b)
        mult //= 2
    params["cout"] = conv_p(output_nc, ngf, 7)
    return params


def spec_forward(params, x_nchw, n_blocks=2):
    x = jnp.transpose(x_nchw, (0, 2, 3, 1)).astype(jnp.float32)   # NCHW -> NHWC

    # ReflectionPad2d(3) + Conv 7x7 + InstanceNorm + ReLU   (one fused kernel)
    w, b = params["c0"]
    x = conv_layer(x, w, b, stride=1, padding=3, pad_mode="reflect",
                   apply_in=True, relu=True)

    # two stride-2 downsampling convs (+IN+ReLU fused)
    for i in range(2):
        w, b = params[f"down{i}"]
        x = conv_layer(x, w, b, stride=2, padding=1, pad_mode="zero",
                       apply_in=True, relu=True)

    # resnet blocks: 2 fused kernels each (second one fuses IN + residual add)
    for i in range(n_blocks):
        skip = x
        w, b = params[f"rb{i}_c1"]
        h = conv_layer(x, w, b, stride=1, padding=1, pad_mode="reflect",
                       apply_in=True, relu=True)
        w, b = params[f"rb{i}_c2"]
        x = conv_layer(h, w, b, stride=1, padding=1, pad_mode="reflect",
                       apply_in=True, relu=False, skip=skip)

    # two stride-2 transposed convs (+IN+ReLU fused, sub-pixel decomposition)
    for i in range(2):
        w, b = params[f"up{i}"]
        x = conv_transpose_layer(x, w, b)

    # ReflectionPad2d(3) + Conv 7x7 + Tanh  (tanh fused in the matmul epilogue)
    w, b = params["cout"]
    x = conv_layer(x, w, b, stride=1, padding=3, pad_mode="reflect",
                   apply_in=False, relu=False, tanh_out=True)

    return jnp.transpose(x, (0, 3, 1, 2))                          # NHWC -> NCHW


# ----------------------------------------------------------------------------
if __name__ == "__main__":
    key = jax.random.PRNGKey(0)
    kx, kp = jax.random.split(key)

    # small config consistent with the module: input_nc=3, output_nc=3,
    # ngf=8, n_blocks=2, input (2, 3, 16, 16) NCHW
    x = jax.random.normal(kx, (2, 3, 16, 16), jnp.float32)
    params = init_params(kp, input_nc=3, output_nc=3, ngf=8, n_blocks=2)

    fwd = jax.jit(functools.partial(spec_forward, n_blocks=2))
    y = fwd(params, x)
    jax.block_until_ready(y)

    assert y.shape == (2, 3, 16, 16) and y.dtype == jnp.float32
    print("KERNEL_OK")
</pallas_src>

<mosaic_0001>
module attributes {stable_mosaic.version = 11 : i64} {
  func.func @_conv_layer_kernel(%arg0: i32, %arg1: memref<1x256x256xbf16, #tpu.memory_space<vmem>>, %arg2: memref<256x8xbf16, #tpu.memory_space<vmem>>, %arg3: memref<1x8xf32, #tpu.memory_space<vmem>>, %arg4: memref<1x256x8xf32, #tpu.memory_space<vmem>>) attributes {dimension_semantics = [#tpu.dimension_semantics<parallel>], iteration_bounds = array<i64: 2>, scalar_prefetch = 0 : i64, scratch_operands = 0 : i64, tpu.core_type = #tpu.core_type<tc>, window_params = [{transform_indices = @transform_0, window_bounds = array<i64: 1, 256, 256>}, {pipeline_mode = #tpu.pipeline_mode<synchronous>, transform_indices = @transform_1, window_bounds = array<i64: 256, 8>}, {pipeline_mode = #tpu.pipeline_mode<synchronous>, transform_indices = @transform_2, window_bounds = array<i64: 1, 8>}, {transform_indices = @transform_3, window_bounds = array<i64: 1, 256, 8>}]} {
    %c0 = arith.constant 0 : index
    %c0_0 = arith.constant 0 : index
    %c0_1 = arith.constant 0 : index
    %0 = vector.load %arg1[%c0, %c0_0, %c0_1] : memref<1x256x256xbf16, #tpu.memory_space<vmem>>, vector<1x256x256xbf16>
    %1 = vector.shape_cast %0 : vector<1x256x256xbf16> to vector<256x256xbf16>
    %c0_2 = arith.constant 0 : index
    %c0_3 = arith.constant 0 : index
    %2 = vector.load %arg2[%c0_2, %c0_3] : memref<256x8xbf16, #tpu.memory_space<vmem>>, vector<256x8xbf16>
    %cst = arith.constant dense<0.000000e+00> : vector<256x8xf32>
    %3 = tpu.matmul %1, %2, %cst {dimension_numbers = #tpu.dot_dimension_numbers<[1], [0], [0], [1], [0, 0, 1, 1], [], []>} : vector<256x256xbf16>, vector<256x8xbf16>, vector<256x8xf32> -> vector<256x8xf32>
    %c0_4 = arith.constant 0 : index
    %c0_5 = arith.constant 0 : index
    %4 = vector.load %arg3[%c0_4, %c0_5] : memref<1x8xf32, #tpu.memory_space<vmem>>, vector<1x8xf32>
    %5 = vector.broadcast %4 : vector<1x8xf32> to vector<256x8xf32>
    %6 = arith.addf %3, %5 : vector<256x8xf32>
    %cst_6 = arith.constant dense<0.000000e+00> : vector<8xf32>
    %7 = vector.multi_reduction <add>, %6, %cst_6 [0] : vector<256x8xf32> to vector<8xf32>
    %8 = vector.shape_cast %7 : vector<8xf32> to vector<1x8xf32>
    %cst_7 = arith.constant 2.560000e+02 : f32
    %9 = vector.broadcast %cst_7 : f32 to vector<1x8xf32>
    %10 = arith.divf %8, %9 : vector<1x8xf32>
    %11 = vector.broadcast %10 : vector<1x8xf32> to vector<256x8xf32>
    %12 = arith.subf %6, %11 : vector<256x8xf32>
    %13 = arith.mulf %12, %12 : vector<256x8xf32>
    %cst_8 = arith.constant dense<0.000000e+00> : vector<8xf32>
    %14 = vector.multi_reduction <add>, %13, %cst_8 [0] : vector<256x8xf32> to vector<8xf32>
    %15 = vector.shape_cast %14 : vector<8xf32> to vector<1x8xf32>
    %cst_9 = arith.constant 2.560000e+02 : f32
    %16 = vector.broadcast %cst_9 : f32 to vector<1x8xf32>
    %17 = arith.divf %15, %16 : vector<1x8xf32>
    %cst_10 = arith.constant 9.99999974E-6 : f32
    %18 = vector.broadcast %cst_10 : f32 to vector<1x8xf32>
    %19 = arith.addf %17, %18 : vector<1x8xf32>
    %20 = math.rsqrt %19 : vector<1x8xf32>
    %21 = vector.broadcast %20 : vector<1x8xf32> to vector<256x8xf32>
    %22 = arith.mulf %12, %21 : vector<256x8xf32>
    %cst_11 = arith.constant 0.000000e+00 : f32
    %23 = vector.broadcast %cst_11 : f32 to vector<256x8xf32>
    %24 = arith.maximumf %22, %23 : vector<256x8xf32>
    %c0_12 = arith.constant 0 : index
    %c0_13 = arith.constant 0 : index
    %c0_14 = arith.constant 0 : index
    %25 = vector.load %arg4[%c0_12, %c0_13, %c0_14] : memref<1x256x8xf32, #tpu.memory_space<vmem>>, vector<1x256x8xf32>
    %26 = vector.shape_cast %25 : vector<1x256x8xf32> to vector<256x8xf32>
    %27 = vector.shape_cast %24 : vector<256x8xf32> to vector<1x256x8xf32>
    tpu.vector_store %arg4[%c0_12, %c0_13, %c0_14], %27 {strides = array<i32>} : memref<1x256x8xf32, #tpu.memory_space<vmem>>, vector<1x256x8xf32>,
    return
  }
  func.func @transform_0(%arg0: i32) -> (i32, i32, i32) {
    %c0_i32 = arith.constant 0 : i32
    %c0_i32_0 = arith.constant 0 : i32
    %c0_i32_1 = arith.constant 0 : i32
    return %arg0, %c0_i32, %c0_i32_0 : i32, i32, i32
  }
  func.func @transform_1(%arg0: i32) -> (i32, i32) {
    %c0_i32 = arith.constant 0 : i32
    %c0_i32_0 = arith.constant 0 : i32
    %c0_i32_1 = arith.constant 0 : i32
    return %c0_i32, %c0_i32_0 : i32, i32
  }
  func.func @transform_2(%arg0: i32) -> (i32, i32) {
    %c0_i32 = arith.constant 0 : i32
    %c0_i32_0 = arith.constant 0 : i32
    %c0_i32_1 = arith.constant 0 : i32
    return %c0_i32, %c0_i32_0 : i32, i32
  }
  func.func @transform_3(%arg0: i32) -> (i32, i32, i32) {
    %c0_i32 = arith.constant 0 : i32
    %c0_i32_0 = arith.constant 0 : i32
    %c0_i32_1 = arith.constant 0 : i32
    return %arg0, %c0_i32, %c0_i32_0 : i32, i32, i32
  }
}

module attributes {stable_mosaic.version = 11 : i64} {
  func.func @_conv_layer_kernel(%arg0: i32, %arg1: memref<1x64x128xbf16, #tpu.memory_space<vmem>>, %arg2: memref<128x16xbf16, #tpu.memory_space<vmem>>, %arg3: memref<1x16xf32, #tpu.memory_space<vmem>>, %arg4: memref<1x64x16xf32, #tpu.memory_space<vmem>>) attributes {dimension_semantics = [#tpu.dimension_semantics<parallel>], iteration_bounds = array<i64: 2>, scalar_prefetch = 0 : i64, scratch_operands = 0 : i64, tpu.core_type = #tpu.core_type<tc>, window_params = [{transform_indices = @transform_0, window_bounds = array<i64: 1, 64, 128>}, {pipeline_mode = #tpu.pipeline_mode<synchronous>, transform_indices = @transform_1, window_bounds = array<i64: 128, 16>}, {pipeline_mode = #tpu.pipeline_mode<synchronous>, transform_indices = @transform_2, window_bounds = array<i64: 1, 16>}, {transform_indices = @transform_3, window_bounds = array<i64: 1, 64, 16>}]} {
    %c0 = arith.constant 0 : index
    %c0_0 = arith.constant 0 : index
    %c0_1 = arith.constant 0 : index
    %0 = vector.load %arg1[%c0, %c0_0, %c0_1] : memref<1x64x128xbf16, #tpu.memory_space<vmem>>, vector<1x64x128xbf16>
    %1 = vector.shape_cast %0 : vector<1x64x128xbf16> to vector<64x128xbf16>
    %c0_2 = arith.constant 0 : index
    %c0_3 = arith.constant 0 : index
    %2 = vector.load %arg2[%c0_2, %c0_3] : memref<128x16xbf16, #tpu.memory_space<vmem>>, vector<128x16xbf16>
    %cst = arith.constant dense<0.000000e+00> : vector<64x16xf32>
    %3 = tpu.matmul %1, %2, %cst {dimension_numbers = #tpu.dot_dimension_numbers<[1], [0], [0], [1], [0, 0, 1, 1], [], []>} : vector<64x128xbf16>, vector<128x16xbf16>, vector<64x16xf32> -> vector<64x16xf32>
    %c0_4 = arith.constant 0 : index
    %c0_5 = arith.constant 0 : index
    %4 = vector.load %arg3[%c0_4, %c0_5] : memref<1x16xf32, #tpu.memory_space<vmem>>, vector<1x16xf32>
    %5 = vector.broadcast %4 : vector<1x16xf32> to vector<64x16xf32>
    %6 = arith.addf %3, %5 : vector<64x16xf32>
    %cst_6 = arith.constant dense<0.000000e+00> : vector<16xf32>
    %7 = vector.multi_reduction <add>, %6, %cst_6 [0] : vector<64x16xf32> to vector<16xf32>
    %8 = vector.shape_cast %7 : vector<16xf32> to vector<1x16xf32>
    %cst_7 = arith.constant 6.400000e+01 : f32
    %9 = vector.broadcast %cst_7 : f32 to vector<1x16xf32>
    %10 = arith.divf %8, %9 : vector<1x16xf32>
    %11 = vector.broadcast %10 : vector<1x16xf32> to vector<64x16xf32>
    %12 = arith.subf %6, %11 : vector<64x16xf32>
    %13 = arith.mulf %12, %12 : vector<64x16xf32>
    %cst_8 = arith.constant dense<0.000000e+00> : vector<16xf32>
    %14 = vector.multi_reduction <add>, %13, %cst_8 [0] : vector<64x16xf32> to vector<16xf32>
    %15 = vector.shape_cast %14 : vector<16xf32> to vector<1x16xf32>
    %cst_9 = arith.constant 6.400000e+01 : f32
    %16 = vector.broadcast %cst_9 : f32 to vector<1x16xf32>
    %17 = arith.divf %15, %16 : vector<1x16xf32>
    %cst_10 = arith.constant 9.99999974E-6 : f32
    %18 = vector.broadcast %cst_10 : f32 to vector<1x16xf32>
    %19 = arith.addf %17, %18 : vector<1x16xf32>
    %20 = math.rsqrt %19 : vector<1x16xf32>
    %21 = vector.broadcast %20 : vector<1x16xf32> to vector<64x16xf32>
    %22 = arith.mulf %12, %21 : vector<64x16xf32>
    %cst_11 = arith.constant 0.000000e+00 : f32
    %23 = vector.broadcast %cst_11 : f32 to vector<64x16xf32>
    %24 = arith.maximumf %22, %23 : vector<64x16xf32>
    %c0_12 = arith.constant 0 : index
    %c0_13 = arith.constant 0 : index
    %c0_14 = arith.constant 0 : index
    %25 = vector.load %arg4[%c0_12, %c0_13, %c0_14] : memref<1x64x16xf32, #tpu.memory_space<vmem>>, vector<1x64x16xf32>
    %26 = vector.shape_cast %25 : vector<1x64x16xf32> to vector<64x16xf32>
    %27 = vector.shape_cast %24 : vector<64x16xf32> to vector<1x64x16xf32>
    tpu.vector_store %arg4[%c0_12, %c0_13, %c0_14], %27 {strides = array<i32>} : memref<1x64x16xf32, #tpu.memory_space<vmem>>, vector<1x64x16xf32>,
    return
  }
  func.func @transform_0(%arg0: i32) -> (i32, i32, i32) {
    %c0_i32 = arith.constant 0 : i32
    %c0_i32_0 = arith.constant 0 : i32
    %c0_i32_1 = arith.constant 0 : i32
    return %arg0, %c0_i32, %c0_i32_0 : i32, i32, i32
  }
  func.func @transform_1(%arg0: i32) -> (i32, i32) {
    %c0_i32 = arith.constant 0 : i32
    %c0_i32_0 = arith.constant 0 : i32
    %c0_i32_1 = arith.constant 0 : i32
    return %c0_i32, %c0_i32_0 : i32, i32
  }
  func.func @transform_2(%arg0: i32) -> (i32, i32) {
    %c0_i32 = arith.constant 0 : i32
    %c0_i32_0 = arith.constant 0 : i32
    %c0_i32_1 = arith.constant 0 : i32
    return %c0_i32, %c0_i32_0 : i32, i32
  }
  func.func @transform_3(%arg0: i32) -> (i32, i32, i32) {
    %c0_i32 = arith.constant 0 : i32
    %c0_i32_0 = arith.constant 0 : i32
    %c0_i32_1 = arith.constant 0 : i32
    return %arg0, %c0_i32, %c0_i32_0 : i32, i32, i32
  }
}

module attributes {stable_mosaic.version = 11 : i64} {
  func.func @_conv_layer_kernel(%arg0: i32, %arg1: memref<1x16x256xbf16, #tpu.memory_space<vmem>>, %arg2: memref<256x32xbf16, #tpu.memory_space<vmem>>, %arg3: memref<1x32xf32, #tpu.memory_space<vmem>>, %arg4: memref<1x16x32xf32, #tpu.memory_space<vmem>>) attributes {dimension_semantics = [#tpu.dimension_semantics<parallel>], iteration_bounds = array<i64: 2>, scalar_prefetch = 0 : i64, scratch_operands = 0 : i64, tpu.core_type = #tpu.core_type<tc>, window_params = [{transform_indices = @transform_0, window_bounds = array<i64: 1, 16, 256>}, {pipeline_mode = #tpu.pipeline_mode<synchronous>, transform_indices = @transform_1, window_bounds = array<i64: 256, 32>}, {pipeline_mode = #tpu.pipeline_mode<synchronous>, transform_indices = @transform_2, window_bounds = array<i64: 1, 32>}, {transform_indices = @transform_3, window_bounds = array<i64: 1, 16, 32>}]} {
    %c0 = arith.constant 0 : index
    %c0_0 = arith.constant 0 : index
    %c0_1 = arith.constant 0 : index
    %0 = vector.load %arg1[%c0, %c0_0, %c0_1] : memref<1x16x256xbf16, #tpu.memory_space<vmem>>, vector<1x16x256xbf16>
    %1 = vector.shape_cast %0 : vector<1x16x256xbf16> to vector<16x256xbf16>
    %c0_2 = arith.constant 0 : index
    %c0_3 = arith.constant 0 : index
    %2 = vector.load %arg2[%c0_2, %c0_3] : memref<256x32xbf16, #tpu.memory_space<vmem>>, vector<256x32xbf16>
    %cst = arith.constant dense<0.000000e+00> : vector<16x32xf32>
    %3 = tpu.matmul %1, %2, %cst {dimension_numbers = #tpu.dot_dimension_numbers<[1], [0], [0], [1], [0, 0, 1, 1], [], []>} : vector<16x256xbf16>, vector<256x32xbf16>, vector<16x32xf32> -> vector<16x32xf32>
    %c0_4 = arith.constant 0 : index
    %c0_5 = arith.constant 0 : index
    %4 = vector.load %arg3[%c0_4, %c0_5] : memref<1x32xf32, #tpu.memory_space<vmem>>, vector<1x32xf32>
    %5 = vector.broadcast %4 : vector<1x32xf32> to vector<16x32xf32>
    %6 = arith.addf %3, %5 : vector<16x32xf32>
    %cst_6 = arith.constant dense<0.000000e+00> : vector<32xf32>
    %7 = vector.multi_reduction <add>, %6, %cst_6 [0] : vector<16x32xf32> to vector<32xf32>
    %8 = vector.shape_cast %7 : vector<32xf32> to vector<1x32xf32>
    %cst_7 = arith.constant 1.600000e+01 : f32
    %9 = vector.broadcast %cst_7 : f32 to vector<1x32xf32>
    %10 = arith.divf %8, %9 : vector<1x32xf32>
    %11 = vector.broadcast %10 : vector<1x32xf32> to vector<16x32xf32>
    %12 = arith.subf %6, %11 : vector<16x32xf32>
    %13 = arith.mulf %12, %12 : vector<16x32xf32>
    %cst_8 = arith.constant dense<0.000000e+00> : vector<32xf32>
    %14 = vector.multi_reduction <add>, %13, %cst_8 [0] : vector<16x32xf32> to vector<32xf32>
    %15 = vector.shape_cast %14 : vector<32xf32> to vector<1x32xf32>
    %cst_9 = arith.constant 1.600000e+01 : f32
    %16 = vector.broadcast %cst_9 : f32 to vector<1x32xf32>
    %17 = arith.divf %15, %16 : vector<1x32xf32>
    %cst_10 = arith.constant 9.99999974E-6 : f32
    %18 = vector.broadcast %cst_10 : f32 to vector<1x32xf32>
    %19 = arith.addf %17, %18 : vector<1x32xf32>
    %20 = math.rsqrt %19 : vector<1x32xf32>
    %21 = vector.broadcast %20 : vector<1x32xf32> to vector<16x32xf32>
    %22 = arith.mulf %12, %21 : vector<16x32xf32>
    %cst_11 = arith.constant 0.000000e+00 : f32
    %23 = vector.broadcast %cst_11 : f32 to vector<16x32xf32>
    %24 = arith.maximumf %22, %23 : vector<16x32xf32>
    %c0_12 = arith.constant 0 : index
    %c0_13 = arith.constant 0 : index
    %c0_14 = arith.constant 0 : index
    %25 = vector.load %arg4[%c0_12, %c0_13, %c0_14] : memref<1x16x32xf32, #tpu.memory_space<vmem>>, vector<1x16x32xf32>
    %26 = vector.shape_cast %25 : vector<1x16x32xf32> to vector<16x32xf32>
    %27 = vector.shape_cast %24 : vector<16x32xf32> to vector<1x16x32xf32>
    tpu.vector_store %arg4[%c0_12, %c0_13, %c0_14], %27 {strides = array<i32>} : memref<1x16x32xf32, #tpu.memory_space<vmem>>, vector<1x16x32xf32>,
    return
  }
  func.func @transform_0(%arg0: i32) -> (i32, i32, i32) {
    %c0_i32 = arith.constant 0 : i32
    %c0_i32_0 = arith.constant 0 : i32
    %c0_i32_1 = arith.constant 0 : i32
    return %arg0, %c0_i32, %c0_i32_0 : i32, i32, i32
  }
  func.func @transform_1(%arg0: i32) -> (i32, i32) {
    %c0_i32 = arith.constant 0 : i32
    %c0_i32_0 = arith.constant 0 : i32
    %c0_i32_1 = arith.constant 0 : i32
    return %c0_i32, %c0_i32_0 : i32, i32
  }
  func.func @transform_2(%arg0: i32) -> (i32, i32) {
    %c0_i32 = arith.constant 0 : i32
    %c0_i32_0 = arith.constant 0 : i32
    %c0_i32_1 = arith.constant 0 : i32
    return %c0_i32, %c0_i32_0 : i32, i32
  }
  func.func @transform_3(%arg0: i32) -> (i32, i32, i32) {
    %c0_i32 = arith.constant 0 : i32
    %c0_i32_0 = arith.constant 0 : i32
    %c0_i32_1 = arith.constant 0 : i32
    return %arg0, %c0_i32, %c0_i32_0 : i32, i32, i32
  }
}

module attributes {stable_mosaic.version = 11 : i64} {
  func.func @_conv_layer_kernel(%arg0: i32, %arg1: memref<1x16x384xbf16, #tpu.memory_space<vmem>>, %arg2: memref<384x32xbf16, #tpu.memory_space<vmem>>, %arg3: memref<1x32xf32, #tpu.memory_space<vmem>>, %arg4: memref<1x16x32xf32, #tpu.memory_space<vmem>>, %arg5: memref<1x16x32xf32, #tpu.memory_space<vmem>>) attributes {dimension_semantics = [#tpu.dimension_semantics<parallel>], iteration_bounds = array<i64: 2>, scalar_prefetch = 0 : i64, scratch_operands = 0 : i64, tpu.core_type = #tpu.core_type<tc>, window_params = [{transform_indices = @transform_0, window_bounds = array<i64: 1, 16, 384>}, {pipeline_mode = #tpu.pipeline_mode<synchronous>, transform_indices = @transform_1, window_bounds = array<i64: 384, 32>}, {pipeline_mode = #tpu.pipeline_mode<synchronous>, transform_indices = @transform_2, window_bounds = array<i64: 1, 32>}, {transform_indices = @transform_3, window_bounds = array<i64: 1, 16, 32>}, {transform_indices = @transform_4, window_bounds = array<i64: 1, 16, 32>}]} {
    %c0 = arith.constant 0 : index
    %c0_0 = arith.constant 0 : index
    %c0_1 = arith.constant 0 : index
    %0 = vector.load %arg1[%c0, %c0_0, %c0_1] : memref<1x16x384xbf16, #tpu.memory_space<vmem>>, vector<1x16x384xbf16>
    %1 = vector.shape_cast %0 : vector<1x16x384xbf16> to vector<16x384xbf16>
    %c0_2 = arith.constant 0 : index
    %c0_3 = arith.constant 0 : index
    %2 = vector.load %arg2[%c0_2, %c0_3] : memref<384x32xbf16, #tpu.memory_space<vmem>>, vector<384x32xbf16>
    %cst = arith.constant dense<0.000000e+00> : vector<16x32xf32>
    %3 = tpu.matmul %1, %2, %cst {dimension_numbers = #tpu.dot_dimension_numbers<[1], [0], [0], [1], [0, 0, 1, 1], [], []>} : vector<16x384xbf16>, vector<384x32xbf16>, vector<16x32xf32> -> vector<16x32xf32>
    %c0_4 = arith.constant 0 : index
    %c0_5 = arith.constant 0 : index
    %4 = vector.load %arg3[%c0_4, %c0_5] : memref<1x32xf32, #tpu.memory_space<vmem>>, vector<1x32xf32>
    %5 = vector.broadcast %4 : vector<1x32xf32> to vector<16x32xf32>
    %6 = arith.addf %3, %5 : vector<16x32xf32>
    %cst_6 = arith.constant dense<0.000000e+00> : vector<32xf32>
    %7 = vector.multi_reduction <add>, %6, %cst_6 [0] : vector<16x32xf32> to vector<32xf32>
    %8 = vector.shape_cast %7 : vector<32xf32> to vector<1x32xf32>
    %cst_7 = arith.constant 1.600000e+01 : f32
    %9 = vector.broadcast %cst_7 : f32 to vector<1x32xf32>
    %10 = arith.divf %8, %9 : vector<1x32xf32>
    %11 = vector.broadcast %10 : vector<1x32xf32> to vector<16x32xf32>
    %12 = arith.subf %6, %11 : vector<16x32xf32>
    %13 = arith.mulf %12, %12 : vector<16x32xf32>
    %cst_8 = arith.constant dense<0.000000e+00> : vector<32xf32>
    %14 = vector.multi_reduction <add>, %13, %cst_8 [0] : vector<16x32xf32> to vector<32xf32>
    %15 = vector.shape_cast %14 : vector<32xf32> to vector<1x32xf32>
    %cst_9 = arith.constant 1.600000e+01 : f32
    %16 = vector.broadcast %cst_9 : f32 to vector<1x32xf32>
    %17 = arith.divf %15, %16 : vector<1x32xf32>
    %cst_10 = arith.constant 9.99999974E-6 : f32
    %18 = vector.broadcast %cst_10 : f32 to vector<1x32xf32>
    %19 = arith.addf %17, %18 : vector<1x32xf32>
    %20 = math.rsqrt %19 : vector<1x32xf32>
    %21 = vector.broadcast %20 : vector<1x32xf32> to vector<16x32xf32>
    %22 = arith.mulf %12, %21 : vector<16x32xf32>
    %c0_11 = arith.constant 0 : index
    %c0_12 = arith.constant 0 : index
    %c0_13 = arith.constant 0 : index
    %23 = vector.load %arg4[%c0_11, %c0_12, %c0_13] : memref<1x16x32xf32, #tpu.memory_space<vmem>>, vector<1x16x32xf32>
    %24 = vector.shape_cast %23 : vector<1x16x32xf32> to vector<16x32xf32>
    %25 = arith.addf %22, %24 : vector<16x32xf32>
    %c0_14 = arith.constant 0 : index
    %c0_15 = arith.constant 0 : index
    %c0_16 = arith.constant 0 : index
    %26 = vector.load %arg5[%c0_14, %c0_15, %c0_16] : memref<1x16x32xf32, #tpu.memory_space<vmem>>, vector<1x16x32xf32>
    %27 = vector.shape_cast %26 : vector<1x16x32xf32> to vector<16x32xf32>
    %28 = vector.shape_cast %25 : vector<16x32xf32> to vector<1x16x32xf32>
    tpu.vector_store %arg5[%c0_14, %c0_15, %c0_16], %28 {strides = array<i32>} : memref<1x16x32xf32, #tpu.memory_space<vmem>>, vector<1x16x32xf32>,
    return
  }
  func.func @transform_0(%arg0: i32) -> (i32, i32, i32) {
    %c0_i32 = arith.constant 0 : i32
    %c0_i32_0 = arith.constant 0 : i32
    %c0_i32_1 = arith.constant 0 : i32
    return %arg0, %c0_i32, %c0_i32_0 : i32, i32, i32
  }
  func.func @transform_1(%arg0: i32) -> (i32, i32) {
    %c0_i32 = arith.constant 0 : i32
    %c0_i32_0 = arith.constant 0 : i32
    %c0_i32_1 = arith.constant 0 : i32
    return %c0_i32, %c0_i32_0 : i32, i32
  }
  func.func @transform_2(%arg0: i32) -> (i32, i32) {
    %c0_i32 = arith.constant 0 : i32
    %c0_i32_0 = arith.constant 0 : i32
    %c0_i32_1 = arith.constant 0 : i32
    return %c0_i32, %c0_i32_0 : i32, i32
  }
  func.func @transform_3(%arg0: i32) -> (i32, i32, i32) {
    %c0_i32 = arith.constant 0 : i32
    %c0_i32_0 = arith.constant 0 : i32
    %c0_i32_1 = arith.constant 0 : i32
    return %arg0, %c0_i32, %c0_i32_0 : i32, i32, i32
  }
  func.func @transform_4(%arg0: i32) -> (i32, i32, i32) {
    %c0_i32 = arith.constant 0 : i32
    %c0_i32_0 = arith.constant 0 : i32
    %c0_i32_1 = arith.constant 0 : i32
    return %arg0, %c0_i32, %c0_i32_0 : i32, i32, i32
  }
}

module attributes {stable_mosaic.version = 11 : i64} {
  func.func @_conv_layer_kernel(%arg0: i32, %arg1: memref<1x16x384xbf16, #tpu.memory_space<vmem>>, %arg2: memref<384x32xbf16, #tpu.memory_space<vmem>>, %arg3: memref<1x32xf32, #tpu.memory_space<vmem>>, %arg4: memref<1x16x32xf32, #tpu.memory_space<vmem>>) attributes {dimension_semantics = [#tpu.dimension_semantics<parallel>], iteration_bounds = array<i64: 2>, scalar_prefetch = 0 : i64, scratch_operands = 0 : i64, tpu.core_type = #tpu.core_type<tc>, window_params = [{transform_indices = @transform_0, window_bounds = array<i64: 1, 16, 384>}, {pipeline_mode = #tpu.pipeline_mode<synchronous>, transform_indices = @transform_1, window_bounds = array<i64: 384, 32>}, {pipeline_mode = #tpu.pipeline_mode<synchronous>, transform_indices = @transform_2, window_bounds = array<i64: 1, 32>}, {transform_indices = @transform_3, window_bounds = array<i64: 1, 16, 32>}]} {
    %c0 = arith.constant 0 : index
    %c0_0 = arith.constant 0 : index
    %c0_1 = arith.constant 0 : index
    %0 = vector.load %arg1[%c0, %c0_0, %c0_1] : memref<1x16x384xbf16, #tpu.memory_space<vmem>>, vector<1x16x384xbf16>
    %1 = vector.shape_cast %0 : vector<1x16x384xbf16> to vector<16x384xbf16>
    %c0_2 = arith.constant 0 : index
    %c0_3 = arith.constant 0 : index
    %2 = vector.load %arg2[%c0_2, %c0_3] : memref<384x32xbf16, #tpu.memory_space<vmem>>, vector<384x32xbf16>
    %cst = arith.constant dense<0.000000e+00> : vector<16x32xf32>
    %3 = tpu.matmul %1, %2, %cst {dimension_numbers = #tpu.dot_dimension_numbers<[1], [0], [0], [1], [0, 0, 1, 1], [], []>} : vector<16x384xbf16>, vector<384x32xbf16>, vector<16x32xf32> -> vector<16x32xf32>
    %c0_4 = arith.constant 0 : index
    %c0_5 = arith.constant 0 : index
    %4 = vector.load %arg3[%c0_4, %c0_5] : memref<1x32xf32, #tpu.memory_space<vmem>>, vector<1x32xf32>
    %5 = vector.broadcast %4 : vector<1x32xf32> to vector<16x32xf32>
    %6 = arith.addf %3, %5 : vector<16x32xf32>
    %cst_6 = arith.constant dense<0.000000e+00> : vector<32xf32>
    %7 = vector.multi_reduction <add>, %6, %cst_6 [0] : vector<16x32xf32> to vector<32xf32>
    %8 = vector.shape_cast %7 : vector<32xf32> to vector<1x32xf32>
    %cst_7 = arith.constant 1.600000e+01 : f32
    %9 = vector.broadcast %cst_7 : f32 to vector<1x32xf32>
    %10 = arith.divf %8, %9 : vector<1x32xf32>
    %11 = vector.broadcast %10 : vector<1x32xf32> to vector<16x32xf32>
    %12 = arith.subf %6, %11 : vector<16x32xf32>
    %13 = arith.mulf %12, %12 : vector<16x32xf32>
    %cst_8 = arith.constant dense<0.000000e+00> : vector<32xf32>
    %14 = vector.multi_reduction <add>, %13, %cst_8 [0] : vector<16x32xf32> to vector<32xf32>
    %15 = vector.shape_cast %14 : vector<32xf32> to vector<1x32xf32>
    %cst_9 = arith.constant 1.600000e+01 : f32
    %16 = vector.broadcast %cst_9 : f32 to vector<1x32xf32>
    %17 = arith.divf %15, %16 : vector<1x32xf32>
    %cst_10 = arith.constant 9.99999974E-6 : f32
    %18 = vector.broadcast %cst_10 : f32 to vector<1x32xf32>
    %19 = arith.addf %17, %18 : vector<1x32xf32>
    %20 = math.rsqrt %19 : vector<1x32xf32>
    %21 = vector.broadcast %20 : vector<1x32xf32> to vector<16x32xf32>
    %22 = arith.mulf %12, %21 : vector<16x32xf32>
    %cst_11 = arith.constant 0.000000e+00 : f32
    %23 = vector.broadcast %cst_11 : f32 to vector<16x32xf32>
    %24 = arith.maximumf %22, %23 : vector<16x32xf32>
    %c0_12 = arith.constant 0 : index
    %c0_13 = arith.constant 0 : index
    %c0_14 = arith.constant 0 : index
    %25 = vector.load %arg4[%c0_12, %c0_13, %c0_14] : memref<1x16x32xf32, #tpu.memory_space<vmem>>, vector<1x16x32xf32>
    %26 = vector.shape_cast %25 : vector<1x16x32xf32> to vector<16x32xf32>
    %27 = vector.shape_cast %24 : vector<16x32xf32> to vector<1x16x32xf32>
    tpu.vector_store %arg4[%c0_12, %c0_13, %c0_14], %27 {strides = array<i32>} : memref<1x16x32xf32, #tpu.memory_space<vmem>>, vector<1x16x32xf32>,
    return
  }
  func.func @transform_0(%arg0: i32) -> (i32, i32, i32) {
    %c0_i32 = arith.constant 0 : i32
    %c0_i32_0 = arith.constant 0 : i32
    %c0_i32_1 = arith.constant 0 : i32
    return %arg0, %c0_i32, %c0_i32_0 : i32, i32, i32
  }
  func.func @transform_1(%arg0: i32) -> (i32, i32) {
    %c0_i32 = arith.constant 0 : i32
    %c0_i32_0 = arith.constant 0 : i32
    %c0_i32_1 = arith.constant 0 : i32
    return %c0_i32, %c0_i32_0 : i32, i32
  }
  func.func @transform_2(%arg0: i32) -> (i32, i32) {
    %c0_i32 = arith.constant 0 : i32
    %c0_i32_0 = arith.constant 0 : i32
    %c0_i32_1 = arith.constant 0 : i32
    return %c0_i32, %c0_i32_0 : i32, i32
  }
  func.func @transform_3(%arg0: i32) -> (i32, i32, i32) {
    %c0_i32 = arith.constant 0 : i32
    %c0_i32_0 = arith.constant 0 : i32
    %c0_i32_1 = arith.constant 0 : i32
    return %arg0, %c0_i32, %c0_i32_0 : i32, i32, i32
  }
}

module attributes {stable_mosaic.version = 11 : i64} {
  func.func @_convT_layer_kernel(%arg0: i32, %arg1: memref<1x16x128xbf16, #tpu.memory_space<vmem>>, %arg2: memref<128x64xbf16, #tpu.memory_space<vmem>>, %arg3: memref<1x64xf32, #tpu.memory_space<vmem>>, %arg4: memref<1x16x64xf32, #tpu.memory_space<vmem>>) attributes {dimension_semantics = [#tpu.dimension_semantics<parallel>], iteration_bounds = array<i64: 2>, scalar_prefetch = 0 : i64, scratch_operands = 0 : i64, tpu.core_type = #tpu.core_type<tc>, window_params = [{transform_indices = @transform_0, window_bounds = array<i64: 1, 16, 128>}, {pipeline_mode = #tpu.pipeline_mode<synchronous>, transform_indices = @transform_1, window_bounds = array<i64: 128, 64>}, {pipeline_mode = #tpu.pipeline_mode<synchronous>, transform_indices = @transform_2, window_bounds = array<i64: 1, 64>}, {transform_indices = @transform_3, window_bounds = array<i64: 1, 16, 64>}]} {
    %c0 = arith.constant 0 : index
    %c0_0 = arith.constant 0 : index
    %c0_1 = arith.constant 0 : index
    %0 = vector.load %arg1[%c0, %c0_0, %c0_1] : memref<1x16x128xbf16, #tpu.memory_space<vmem>>, vector<1x16x128xbf16>
    %1 = vector.shape_cast %0 : vector<1x16x128xbf16> to vector<16x128xbf16>
    %c0_2 = arith.constant 0 : index
    %c0_3 = arith.constant 0 : index
    %2 = vector.load %arg2[%c0_2, %c0_3] : memref<128x64xbf16, #tpu.memory_space<vmem>>, vector<128x64xbf16>
    %cst = arith.constant dense<0.000000e+00> : vector<16x64xf32>
    %3 = tpu.matmul %1, %2, %cst {dimension_numbers = #tpu.dot_dimension_numbers<[1], [0], [0], [1], [0, 0, 1, 1], [], []>} : vector<16x128xbf16>, vector<128x64xbf16>, vector<16x64xf32> -> vector<16x64xf32>
    %c0_4 = arith.constant 0 : index
    %c0_5 = arith.constant 0 : index
    %4 = vector.load %arg3[%c0_4, %c0_5] : memref<1x64xf32, #tpu.memory_space<vmem>>, vector<1x64xf32>
    %5 = vector.broadcast %4 : vector<1x64xf32> to vector<16x64xf32>
    %6 = arith.addf %3, %5 : vector<16x64xf32>
    %cst_6 = arith.constant 0.000000e+00 : f32
    %7 = vector.broadcast %cst_6 : f32 to vector<1x16xf32>
    %8 = vector.extract_strided_slice %6 {offsets = [0, 0], sizes = [16, 16], strides = [1, 1]} : vector<16x64xf32> to vector<16x16xf32>
    %cst_7 = arith.constant dense<0.000000e+00> : vector<16xf32>
    %9 = vector.multi_reduction <add>, %8, %cst_7 [0] : vector<16x16xf32> to vector<16xf32>
    %10 = vector.shape_cast %9 : vector<16xf32> to vector<1x16xf32>
    %11 = arith.addf %7, %10 : vector<1x16xf32>
    %12 = vector.extract_strided_slice %6 {offsets = [0, 16], sizes = [16, 16], strides = [1, 1]} : vector<16x64xf32> to vector<16x16xf32>
    %cst_8 = arith.constant dense<0.000000e+00> : vector<16xf32>
    %13 = vector.multi_reduction <add>, %12, %cst_8 [0] : vector<16x16xf32> to vector<16xf32>
    %14 = vector.shape_cast %13 : vector<16xf32> to vector<1x16xf32>
    %15 = arith.addf %11, %14 : vector<1x16xf32>
    %16 = vector.extract_strided_slice %6 {offsets = [0, 32], sizes = [16, 16], strides = [1, 1]} : vector<16x64xf32> to vector<16x16xf32>
    %cst_9 = arith.constant dense<0.000000e+00> : vector<16xf32>
    %17 = vector.multi_reduction <add>, %16, %cst_9 [0] : vector<16x16xf32> to vector<16xf32>
    %18 = vector.shape_cast %17 : vector<16xf32> to vector<1x16xf32>
    %19 = arith.addf %15, %18 : vector<1x16xf32>
    %20 = vector.extract_strided_slice %6 {offsets = [0, 48], sizes = [16, 16], strides = [1, 1]} : vector<16x64xf32> to vector<16x16xf32>
    %cst_10 = arith.constant dense<0.000000e+00> : vector<16xf32>
    %21 = vector.multi_reduction <add>, %20, %cst_10 [0] : vector<16x16xf32> to vector<16xf32>
    %22 = vector.shape_cast %21 : vector<16xf32> to vector<1x16xf32>
    %23 = arith.addf %19, %22 : vector<1x16xf32>
    %cst_11 = arith.constant 6.400000e+01 : f32
    %24 = vector.broadcast %cst_11 : f32 to vector<1x16xf32>
    %25 = arith.divf %23, %24 : vector<1x16xf32>
    %26 = tpu.concatenate %25, %25, %25, %25 in 1 : vector<1x16xf32>, vector<1x16xf32>, vector<1x16xf32>, vector<1x16xf32> -> vector<1x64xf32>
    %27 = vector.broadcast %26 : vector<1x64xf32> to vector<16x64xf32>
    %28 = arith.subf %6, %27 : vector<16x64xf32>
    %cst_12 = arith.constant 0.000000e+00 : f32
    %29 = vector.broadcast %cst_12 : f32 to vector<1x16xf32>
    %30 = vector.extract_strided_slice %28 {offsets = [0, 0], sizes = [16, 16], strides = [1, 1]} : vector<16x64xf32> to vector<16x16xf32>
    %31 = arith.mulf %30, %30 : vector<16x16xf32>
    %cst_13 = arith.constant dense<0.000000e+00> : vector<16xf32>
    %32 = vector.multi_reduction <add>, %31, %cst_13 [0] : vector<16x16xf32> to vector<16xf32>
    %33 = vector.shape_cast %32 : vector<16xf32> to vector<1x16xf32>
    %34 = arith.addf %29, %33 : vector<1x16xf32>
    %35 = vector.extract_strided_slice %28 {offsets = [0, 16], sizes = [16, 16], strides = [1, 1]} : vector<16x64xf32> to vector<16x16xf32>
    %36 = arith.mulf %35, %35 : vector<16x16xf32>
    %cst_14 = arith.constant dense<0.000000e+00> : vector<16xf32>
    %37 = vector.multi_reduction <add>, %36, %cst_14 [0] : vector<16x16xf32> to vector<16xf32>
    %38 = vector.shape_cast %37 : vector<16xf32> to vector<1x16xf32>
    %39 = arith.addf %34, %38 : vector<1x16xf32>
    %40 = vector.extract_strided_slice %28 {offsets = [0, 32], sizes = [16, 16], strides = [1, 1]} : vector<16x64xf32> to vector<16x16xf32>
    %41 = arith.mulf %40, %40 : vector<16x16xf32>
    %cst_15 = arith.constant dense<0.000000e+00> : vector<16xf32>
    %42 = vector.multi_reduction <add>, %41, %cst_15 [0] : vector<16x16xf32> to vector<16xf32>
    %43 = vector.shape_cast %42 : vector<16xf32> to vector<1x16xf32>
    %44 = arith.addf %39, %43 : vector<1x16xf32>
    %45 = vector.extract_strided_slice %28 {offsets = [0, 48], sizes = [16, 16], strides = [1, 1]} : vector<16x64xf32> to vector<16x16xf32>
    %46 = arith.mulf %45, %45 : vector<16x16xf32>
    %cst_16 = arith.constant dense<0.000000e+00> : vector<16xf32>
    %47 = vector.multi_reduction <add>, %46, %cst_16 [0] : vector<16x16xf32> to vector<16xf32>
    %48 = vector.shape_cast %47 : vector<16xf32> to vector<1x16xf32>
    %49 = arith.addf %44, %48 : vector<1x16xf32>
    %cst_17 = arith.constant 6.400000e+01 : f32
    %50 = vector.broadcast %cst_17 : f32 to vector<1x16xf32>
    %51 = arith.divf %49, %50 : vector<1x16xf32>
    %cst_18 = arith.constant 9.99999974E-6 : f32
    %52 = vector.broadcast %cst_18 : f32 to vector<1x16xf32>
    %53 = arith.addf %51, %52 : vector<1x16xf32>
    %54 = math.rsqrt %53 : vector<1x16xf32>
    %55 = tpu.concatenate %54, %54, %54, %54 in 1 : vector<1x16xf32>, vector<1x16xf32>, vector<1x16xf32>, vector<1x16xf32> -> vector<1x64xf32>
    %56 = vector.broadcast %55 : vector<1x64xf32> to vector<16x64xf32>
    %57 = arith.mulf %28, %56 : vector<16x64xf32>
    %cst_19 = arith.constant 0.000000e+00 : f32
    %58 = vector.broadcast %cst_19 : f32 to vector<16x64xf32>
    %59 = arith.maximumf %57, %58 : vector<16x64xf32>
    %c0_20 = arith.constant 0 : index
    %c0_21 = arith.constant 0 : index
    %c0_22 = arith.constant 0 : index
    %60 = vector.load %arg4[%c0_20, %c0_21, %c0_22] : memref<1x16x64xf32, #tpu.memory_space<vmem>>, vector<1x16x64xf32>
    %61 = vector.shape_cast %60 : vector<1x16x64xf32> to vector<16x64xf32>
    %62 = vector.shape_cast %59 : vector<16x64xf32> to vector<1x16x64xf32>
    tpu.vector_store %arg4[%c0_20, %c0_21, %c0_22], %62 {strides = array<i32>} : memref<1x16x64xf32, #tpu.memory_space<vmem>>, vector<1x16x64xf32>,
    return
  }
  func.func @transform_0(%arg0: i32) -> (i32, i32, i32) {
    %c0_i32 = arith.constant 0 : i32
    %c0_i32_0 = arith.constant 0 : i32
    %c0_i32_1 = arith.constant 0 : i32
    return %arg0, %c0_i32, %c0_i32_0 : i32, i32, i32
  }
  func.func @transform_1(%arg0: i32) -> (i32, i32) {
    %c0_i32 = arith.constant 0 : i32
    %c0_i32_0 = arith.constant 0 : i32
    %c0_i32_1 = arith.constant 0 : i32
    return %c0_i32, %c0_i32_0 : i32, i32
  }
  func.func @transform_2(%arg0: i32) -> (i32, i32) {
    %c0_i32 = arith.constant 0 : i32
    %c0_i32_0 = arith.constant 0 : i32
    %c0_i32_1 = arith.constant 0 : i32
    return %c0_i32, %c0_i32_0 : i32, i32
  }
  func.func @transform_3(%arg0: i32) -> (i32, i32, i32) {
    %c0_i32 = arith.constant 0 : i32
    %c0_i32_0 = arith.constant 0 : i32
    %c0_i32_1 = arith.constant 0 : i32
    return %arg0, %c0_i32, %c0_i32_0 : i32, i32, i32
  }
}

module attributes {stable_mosaic.version = 11 : i64} {
  func.func @_convT_layer_kernel(%arg0: i32, %arg1: memref<1x64x128xbf16, #tpu.memory_space<vmem>>, %arg2: memref<128x32xbf16, #tpu.memory_space<vmem>>, %arg3: memref<1x32xf32, #tpu.memory_space<vmem>>, %arg4: memref<1x64x32xf32, #tpu.memory_space<vmem>>) attributes {dimension_semantics = [#tpu.dimension_semantics<parallel>], iteration_bounds = array<i64: 2>, scalar_prefetch = 0 : i64, scratch_operands = 0 : i64, tpu.core_type = #tpu.core_type<tc>, window_params = [{transform_indices = @transform_0, window_bounds = array<i64: 1, 64, 128>}, {pipeline_mode = #tpu.pipeline_mode<synchronous>, transform_indices = @transform_1, window_bounds = array<i64: 128, 32>}, {pipeline_mode = #tpu.pipeline_mode<synchronous>, transform_indices = @transform_2, window_bounds = array<i64: 1, 32>}, {transform_indices = @transform_3, window_bounds = array<i64: 1, 64, 32>}]} {
    %c0 = arith.constant 0 : index
    %c0_0 = arith.constant 0 : index
    %c0_1 = arith.constant 0 : index
    %0 = vector.load %arg1[%c0, %c0_0, %c0_1] : memref<1x64x128xbf16, #tpu.memory_space<vmem>>, vector<1x64x128xbf16>
    %1 = vector.shape_cast %0 : vector<1x64x128xbf16> to vector<64x128xbf16>
    %c0_2 = arith.constant 0 : index
    %c0_3 = arith.constant 0 : index
    %2 = vector.load %arg2[%c0_2, %c0_3] : memref<128x32xbf16, #tpu.memory_space<vmem>>, vector<128x32xbf16>
    %cst = arith.constant dense<0.000000e+00> : vector<64x32xf32>
    %3 = tpu.matmul %1, %2, %cst {dimension_numbers = #tpu.dot_dimension_numbers<[1], [0], [0], [1], [0, 0, 1, 1], [], []>} : vector<64x128xbf16>, vector<128x32xbf16>, vector<64x32xf32> -> vector<64x32xf32>
    %c0_4 = arith.constant 0 : index
    %c0_5 = arith.constant 0 : index
    %4 = vector.load %arg3[%c0_4, %c0_5] : memref<1x32xf32, #tpu.memory_space<vmem>>, vector<1x32xf32>
    %5 = vector.broadcast %4 : vector<1x32xf32> to vector<64x32xf32>
    %6 = arith.addf %3, %5 : vector<64x32xf32>
    %cst_6 = arith.constant 0.000000e+00 : f32
    %7 = vector.broadcast %cst_6 : f32 to vector<1x8xf32>
    %8 = vector.extract_strided_slice %6 {offsets = [0, 0], sizes = [64, 8], strides = [1, 1]} : vector<64x32xf32> to vector<64x8xf32>
    %cst_7 = arith.constant dense<0.000000e+00> : vector<8xf32>
    %9 = vector.multi_reduction <add>, %8, %cst_7 [0] : vector<64x8xf32> to vector<8xf32>
    %10 = vector.shape_cast %9 : vector<8xf32> to vector<1x8xf32>
    %11 = arith.addf %7, %10 : vector<1x8xf32>
    %12 = vector.extract_strided_slice %6 {offsets = [0, 8], sizes = [64, 8], strides = [1, 1]} : vector<64x32xf32> to vector<64x8xf32>
    %cst_8 = arith.constant dense<0.000000e+00> : vector<8xf32>
    %13 = vector.multi_reduction <add>, %12, %cst_8 [0] : vector<64x8xf32> to vector<8xf32>
    %14 = vector.shape_cast %13 : vector<8xf32> to vector<1x8xf32>
    %15 = arith.addf %11, %14 : vector<1x8xf32>
    %16 = vector.extract_strided_slice %6 {offsets = [0, 16], sizes = [64, 8], strides = [1, 1]} : vector<64x32xf32> to vector<64x8xf32>
    %cst_9 = arith.constant dense<0.000000e+00> : vector<8xf32>
    %17 = vector.multi_reduction <add>, %16, %cst_9 [0] : vector<64x8xf32> to vector<8xf32>
    %18 = vector.shape_cast %17 : vector<8xf32> to vector<1x8xf32>
    %19 = arith.addf %15, %18 : vector<1x8xf32>
    %20 = vector.extract_strided_slice %6 {offsets = [0, 24], sizes = [64, 8], strides = [1, 1]} : vector<64x32xf32> to vector<64x8xf32>
    %cst_10 = arith.constant dense<0.000000e+00> : vector<8xf32>
    %21 = vector.multi_reduction <add>, %20, %cst_10 [0] : vector<64x8xf32> to vector<8xf32>
    %22 = vector.shape_cast %21 : vector<8xf32> to vector<1x8xf32>
    %23 = arith.addf %19, %22 : vector<1x8xf32>
    %cst_11 = arith.constant 2.560000e+02 : f32
    %24 = vector.broadcast %cst_11 : f32 to vector<1x8xf32>
    %25 = arith.divf %23, %24 : vector<1x8xf32>
    %26 = tpu.concatenate %25, %25, %25, %25 in 1 : vector<1x8xf32>, vector<1x8xf32>, vector<1x8xf32>, vector<1x8xf32> -> vector<1x32xf32>
    %27 = vector.broadcast %26 : vector<1x32xf32> to vector<64x32xf32>
    %28 = arith.subf %6, %27 : vector<64x32xf32>
    %cst_12 = arith.constant 0.000000e+00 : f32
    %29 = vector.broadcast %cst_12 : f32 to vector<1x8xf32>
    %30 = vector.extract_strided_slice %28 {offsets = [0, 0], sizes = [64, 8], strides = [1, 1]} : vector<64x32xf32> to vector<64x8xf32>
    %31 = arith.mulf %30, %30 : vector<64x8xf32>
    %cst_13 = arith.constant dense<0.000000e+00> : vector<8xf32>
    %32 = vector.multi_reduction <add>, %31, %cst_13 [0] : vector<64x8xf32> to vector<8xf32>
    %33 = vector.shape_cast %32 : vector<8xf32> to vector<1x8xf32>
    %34 = arith.addf %29, %33 : vector<1x8xf32>
    %35 = vector.extract_strided_slice %28 {offsets = [0, 8], sizes = [64, 8], strides = [1, 1]} : vector<64x32xf32> to vector<64x8xf32>
    %36 = arith.mulf %35, %35 : vector<64x8xf32>
    %cst_14 = arith.constant dense<0.000000e+00> : vector<8xf32>
    %37 = vector.multi_reduction <add>, %36, %cst_14 [0] : vector<64x8xf32> to vector<8xf32>
    %38 = vector.shape_cast %37 : vector<8xf32> to vector<1x8xf32>
    %39 = arith.addf %34, %38 : vector<1x8xf32>
    %40 = vector.extract_strided_slice %28 {offsets = [0, 16], sizes = [64, 8], strides = [1, 1]} : vector<64x32xf32> to vector<64x8xf32>
    %41 = arith.mulf %40, %40 : vector<64x8xf32>
    %cst_15 = arith.constant dense<0.000000e+00> : vector<8xf32>
    %42 = vector.multi_reduction <add>, %41, %cst_15 [0] : vector<64x8xf32> to vector<8xf32>
    %43 = vector.shape_cast %42 : vector<8xf32> to vector<1x8xf32>
    %44 = arith.addf %39, %43 : vector<1x8xf32>
    %45 = vector.extract_strided_slice %28 {offsets = [0, 24], sizes = [64, 8], strides = [1, 1]} : vector<64x32xf32> to vector<64x8xf32>
    %46 = arith.mulf %45, %45 : vector<64x8xf32>
    %cst_16 = arith.constant dense<0.000000e+00> : vector<8xf32>
    %47 = vector.multi_reduction <add>, %46, %cst_16 [0] : vector<64x8xf32> to vector<8xf32>
    %48 = vector.shape_cast %47 : vector<8xf32> to vector<1x8xf32>
    %49 = arith.addf %44, %48 : vector<1x8xf32>
    %cst_17 = arith.constant 2.560000e+02 : f32
    %50 = vector.broadcast %cst_17 : f32 to vector<1x8xf32>
    %51 = arith.divf %49, %50 : vector<1x8xf32>
    %cst_18 = arith.constant 9.99999974E-6 : f32
    %52 = vector.broadcast %cst_18 : f32 to vector<1x8xf32>
    %53 = arith.addf %51, %52 : vector<1x8xf32>
    %54 = math.rsqrt %53 : vector<1x8xf32>
    %55 = tpu.concatenate %54, %54, %54, %54 in 1 : vector<1x8xf32>, vector<1x8xf32>, vector<1x8xf32>, vector<1x8xf32> -> vector<1x32xf32>
    %56 = vector.broadcast %55 : vector<1x32xf32> to vector<64x32xf32>
    %57 = arith.mulf %28, %56 : vector<64x32xf32>
    %cst_19 = arith.constant 0.000000e+00 : f32
    %58 = vector.broadcast %cst_19 : f32 to vector<64x32xf32>
    %59 = arith.maximumf %57, %58 : vector<64x32xf32>
    %c0_20 = arith.constant 0 : index
    %c0_21 = arith.constant 0 : index
    %c0_22 = arith.constant 0 : index
    %60 = vector.load %arg4[%c0_20, %c0_21, %c0_22] : memref<1x64x32xf32, #tpu.memory_space<vmem>>, vector<1x64x32xf32>
    %61 = vector.shape_cast %60 : vector<1x64x32xf32> to vector<64x32xf32>
    %62 = vector.shape_cast %59 : vector<64x32xf32> to vector<1x64x32xf32>
    tpu.vector_store %arg4[%c0_20, %c0_21, %c0_22], %62 {strides = array<i32>} : memref<1x64x32xf32, #tpu.memory_space<vmem>>, vector<1x64x32xf32>,
    return
  }
  func.func @transform_0(%arg0: i32) -> (i32, i32, i32) {
    %c0_i32 = arith.constant 0 : i32
    %c0_i32_0 = arith.constant 0 : i32
    %c0_i32_1 = arith.constant 0 : i32
    return %arg0, %c0_i32, %c0_i32_0 : i32, i32, i32
  }
  func.func @transform_1(%arg0: i32) -> (i32, i32) {
    %c0_i32 = arith.constant 0 : i32
    %c0_i32_0 = arith.constant 0 : i32
    %c0_i32_1 = arith.constant 0 : i32
    return %c0_i32, %c0_i32_0 : i32, i32
  }
  func.func @transform_2(%arg0: i32) -> (i32, i32) {
    %c0_i32 = arith.constant 0 : i32
    %c0_i32_0 = arith.constant 0 : i32
    %c0_i32_1 = arith.constant 0 : i32
    return %c0_i32, %c0_i32_0 : i32, i32
  }
  func.func @transform_3(%arg0: i32) -> (i32, i32, i32) {
    %c0_i32 = arith.constant 0 : i32
    %c0_i32_0 = arith.constant 0 : i32
    %c0_i32_1 = arith.constant 0 : i32
    return %arg0, %c0_i32, %c0_i32_0 : i32, i32, i32
  }
}

module attributes {stable_mosaic.version = 11 : i64} {
  func.func @_conv_layer_kernel(%arg0: i32, %arg1: memref<1x256x512xbf16, #tpu.memory_space<vmem>>, %arg2: memref<512x3xbf16, #tpu.memory_space<vmem>>, %arg3: memref<1x3xf32, #tpu.memory_space<vmem>>, %arg4: memref<1x256x3xf32, #tpu.memory_space<vmem>>) attributes {dimension_semantics = [#tpu.dimension_semantics<parallel>], iteration_bounds = array<i64: 2>, scalar_prefetch = 0 : i64, scratch_operands = 0 : i64, tpu.core_type = #tpu.core_type<tc>, window_params = [{transform_indices = @transform_0, window_bounds = array<i64: 1, 256, 512>}, {pipeline_mode = #tpu.pipeline_mode<synchronous>, transform_indices = @transform_1, window_bounds = array<i64: 512, 3>}, {pipeline_mode = #tpu.pipeline_mode<synchronous>, transform_indices = @transform_2, window_bounds = array<i64: 1, 3>}, {transform_indices = @transform_3, window_bounds = array<i64: 1, 256, 3>}]} {
    %c0 = arith.constant 0 : index
    %c0_0 = arith.constant 0 : index
    %c0_1 = arith.constant 0 : index
    %0 = vector.load %arg1[%c0, %c0_0, %c0_1] : memref<1x256x512xbf16, #tpu.memory_space<vmem>>, vector<1x256x512xbf16>
    %1 = vector.shape_cast %0 : vector<1x256x512xbf16> to vector<256x512xbf16>
    %c0_2 = arith.constant 0 : index
    %c0_3 = arith.constant 0 : index
    %2 = vector.load %arg2[%c0_2, %c0_3] : memref<512x3xbf16, #tpu.memory_space<vmem>>, vector<512x3xbf16>
    %cst = arith.constant dense<0.000000e+00> : vector<256x3xf32>
    %3 = tpu.matmul %1, %2, %cst {dimension_numbers = #tpu.dot_dimension_numbers<[1], [0], [0], [1], [0, 0, 1, 1], [], []>} : vector<256x512xbf16>, vector<512x3xbf16>, vector<256x3xf32> -> vector<256x3xf32>
    %c0_4 = arith.constant 0 : index
    %c0_5 = arith.constant 0 : index
    %4 = vector.load %arg3[%c0_4, %c0_5] : memref<1x3xf32, #tpu.memory_space<vmem>>, vector<1x3xf32>
    %5 = vector.broadcast %4 : vector<1x3xf32> to vector<256x3xf32>
    %6 = arith.addf %3, %5 : vector<256x3xf32>
    %7 = math.tanh %6 : vector<256x3xf32>
    %c0_6 = arith.constant 0 : index
    %c0_7 = arith.constant 0 : index
    %c0_8 = arith.constant 0 : index
    %8 = vector.load %arg4[%c0_6, %c0_7, %c0_8] : memref<1x256x3xf32, #tpu.memory_space<vmem>>, vector<1x256x3xf32>
    %9 = vector.shape_cast %8 : vector<1x256x3xf32> to vector<256x3xf32>
    %10 = vector.shape_cast %7 : vector<256x3xf32> to vector<1x256x3xf32>
    tpu.vector_store %arg4[%c0_6, %c0_7, %c0_8], %10 {strides = array<i32>} : memref<1x256x3xf32, #tpu.memory_space<vmem>>, vector<1x256x3xf32>,
    return
  }
  func.func @transform_0(%arg0: i32) -> (i32, i32, i32) {
    %c0_i32 = arith.constant 0 : i32
    %c0_i32_0 = arith.constant 0 : i32
    %c0_i32_1 = arith.constant 0 : i32
    return %arg0, %c0_i32, %c0_i32_0 : i32, i32, i32
  }
  func.func @transform_1(%arg0: i32) -> (i32, i32) {
    %c0_i32 = arith.constant 0 : i32
    %c0_i32_0 = arith.constant 0 : i32
    %c0_i32_1 = arith.constant 0 : i32
    return %c0_i32, %c0_i32_0 : i32, i32
  }
  func.func @transform_2(%arg0: i32) -> (i32, i32) {
    %c0_i32 = arith.constant 0 : i32
    %c0_i32_0 = arith.constant 0 : i32
    %c0_i32_1 = arith.constant 0 : i32
    return %c0_i32, %c0_i32_0 : i32, i32
  }
  func.func @transform_3(%arg0: i32) -> (i32, i32, i32) {
    %c0_i32 = arith.constant 0 : i32
    %c0_i32_0 = arith.constant 0 : i32
    %c0_i32_1 = arith.constant 0 : i32
    return %arg0, %c0_i32, %c0_i32_0 : i32, i32, i32
  }
}

</mosaic_0001>

<bundles_post_ra>
// kernel: spec_forward.10
= control target key start
LH: loop header
LB: loop body
LE: loop exit
PB: predicated region body
PF: predicated region fallthrough
CT: control target
= control target key end

     0   :  { %s1311_s12 = smov 0   ;;  %s1996_s0 = inlined_call_operand.vmem [shape: bf16[2,256,256], index: 0, kind: input, shape index: {}]   ;;  %s1997_s1 = inlined_call_operand.vmem [shape: bf16[256,8], index: 1, kind: input, shape index: {}]   ;;  %s1998_s2 = inlined_call_operand.vmem [shape: f32[1,8], index: 2, kind: input, shape index: {}]   ;;  %s1999_s3 = inlined_call_operand.vmem [shape: f32[2,256,8], index: 3, kind: output, shape index: {}]  }
   0x1 LB: > { %s1019_s13 = sadd.s32 4294967295, %s1289_s12   ;;  %p1023_p0 = scmp.ge.s32.totalorder %s1289_s12, 1  ;;  %s1289_s12 = sphi %s1311_s12, %s13_s12  }
   0x2   : > { %p137_p1 = scmp.lt.s32.totalorder %s1289_s12, 3 }
   0x4   : > { %p138_p2 = pnand %p1023_p0, %p137_p1 }
   0x5   : > { %p161_p3 = scmp.lt.s32.totalorder (!%p138_p2), %s1019_s13, 1 }
   0x6   : > { %141 = sbr.rel (%p138_p2) target bundleno = 475 (0x1db), region = 32 }
   0xb   : > { %v1217_v0 = vld [vmem:[%s1997_s1 + $0x78] sm:$0xff]   ;;  %v1219_v2 = vld [vmem:[%s1997_s1 + $0x70] sm:$0xff]   ;;  %v1221_v4 = vld [vmem:[%s1997_s1 + $0x68] sm:$0xff]   ;;  %s2001_s13 = smov (!%p161_p3, %s1019_s13), 1  ;;  %vm660_vm0 = vcmask 64512  }
   0xc   : > { %v1218_v1 = vld [vmem:[%s1997_s1 + $0x38] sm:$0xff]   ;;  %1081 = vmatprep.subr.bf16.mxu0 %v1217_v0  ;;  %1193 = vmatprep.subr.bf16.mxu1 %v1217_v0  ;;  %v1220_v3 = vld [vmem:[%s1997_s1 + $0x30] sm:$0xff]   ;;  %v1222_v5 = vld [vmem:[%s1997_s1 + $0x28] sm:$0xff]   ;;  %s1079_s30 = sshll.u32 %s2001_s13, 8 }
   0xd   : > { %1082 = vmatpush3.bf16.msra.mxu0 %v1218_v1  ;;  %1201 = vmatpush3.bf16.msra.mxu1 %v1218_v1  ;;  %v1223_v6 = vld [vmem:[%s1997_s1 + $0x60] sm:$0xff]   ;;  %v1225_v8 = vld [vmem:[%s1997_s1 + $0x58] sm:$0xff]   ;;  %s1354_s8 = scalar_lea.vmem %s1996_s0, %s1079_s30  ;;  %v1227_v10 = vld [vmem:[%s1997_s1 + $0x50] sm:$0xff]   ;;  %s1906_s29 = scalar_lea.vmem %s1999_s3, %s1079_s30 }
   0xe   : > { %1083 = vmatprep.subr.bf16.mxu0 %v1219_v2  ;;  %1194 = vmatprep.subr.bf16.mxu1 %v1219_v2  ;;  %v1224_v7 = vld [vmem:[%s1997_s1 + $0x20] sm:$0xff]   ;;  %v1226_v9 = vld [vmem:[%s1997_s1 + $0x18] sm:$0xff]   ;;  %v1228_v12 = vld [vmem:[%s1997_s1 + $0x10] sm:$0xff]  }
   0xf   : > { %v1235_v11 = vld [vmem:[%s1354_s8 + $0x4] ss:$8 sps:$4 sm:$0xff]   ;;  %v1233_v18 = vld [vmem:[%s1354_s8] ss:$8 sps:$4 sm:$0xff]   ;;  %v1236_v19 = vld [vmem:[%s1354_s8 + $0x14] ss:$8 sps:$4 sm:$0xff]  }
  0x10   : > { %531 = vmatprep.mubr.bf16.mxu0 %v1235_v11  ;;  %v1229_v13 = vld [vmem:[%s1997_s1 + $0x48] sm:$0xff]   ;;  %v1231_v16 = vld [vmem:[%s1997_s1 + $0x40] sm:$0xff]   ;;  %v1251_v21 = vld [vmem:[%s1354_s8 + $0x94] ss:$8 sps:$4 sm:$0xff]  }
  0x11   : > { %1084 = vmatpush3.bf16.msra.mxu0 %v1220_v3  ;;  %1202 = vmatpush3.bf16.msra.mxu1 %v1220_v3  ;;  %v1247_v14 = vld [vmem:[%s1354_s8 + $0x84] ss:$8 sps:$4 sm:$0xff]   ;;  %v1245_v20 = vld [vmem:[%s1354_s8 + $0x80] ss:$8 sps:$4 sm:$0xff]   ;;  %v1238_v22 = vld [vmem:[%s1354_s8 + $0x10] ss:$8 sps:$4 sm:$0xff]  }
  0x12   : > { %1085 = vmatprep.subr.bf16.mxu0 %v1221_v4  ;;  %1195 = vmatprep.subr.bf16.mxu1 %v1221_v4  ;;  %v1230_v15 = vld [vmem:[%s1997_s1 + $0x8] sm:$0xff]   ;;  %v1232_v17 = vld [vmem:[%s1997_s1] sm:$0xff]   ;;  %v1253_v24 = vld [vmem:[%s1354_s8 + $0x90] ss:$8 sps:$4 sm:$0xff]  }
  0x13   : > { %595 = vmatprep.mubr.bf16.mxu1 %v1247_v14  ;;  %v1239_v23 = vld [vmem:[%s1354_s8 + $0x24] ss:$8 sps:$4 sm:$0xff]   ;;  %v1241_v26 = vld [vmem:[%s1354_s8 + $0x20] ss:$8 sps:$4 sm:$0xff]   ;;  %v1242_v27 = vld [vmem:[%s1354_s8 + $0x34] ss:$8 sps:$4 sm:$0xff]  }
  0x14   : > { %v1257_v25 = vld [vmem:[%s1354_s8 + $0xa4] ss:$8 sps:$4 sm:$0xff]   ;;  %v1259_v28 = vld [vmem:[%s1354_s8 + $0xa0] ss:$8 sps:$4 sm:$0xff]   ;;  %v1263_v29 = vld [vmem:[%s1354_s8 + $0xb4] ss:$8 sps:$4 sm:$0xff]  }
  0x15   : > { %1086 = vmatpush3.bf16.msra.mxu0 %v1222_v5  ;;  %1203 = vmatpush3.bf16.msra.mxu1 %v1222_v5  ;;  %v1244_v30 = vld [vmem:[%s1354_s8 + $0x30] ss:$8 sps:$4 sm:$0xff]   ;;  %v1248_v31 = vld [vmem:[%s1354_s8 + $0x44] ss:$8 sps:$4 sm:$0xff]   ;;  %v1250_v34 = vld [vmem:[%s1354_s8 + $0x40] ss:$8 sps:$4 sm:$0xff]  }
  0x16   : > { %1087 = vmatprep.subr.bf16.mxu0 %v1223_v6  ;;  %1196 = vmatprep.subr.bf16.mxu1 %v1223_v6  ;;  %v1265_v32 = vld [vmem:[%s1354_s8 + $0xb0] ss:$8 sps:$4 sm:$0xff]   ;;  %v1269_v33 = vld [vmem:[%s1354_s8 + $0xc4] ss:$8 sps:$4 sm:$0xff]   ;;  %v1254_v35 = vld [vmem:[%s1354_s8 + $0x54] ss:$8 sps:$4 sm:$0xff]  }
  0x17   : > { %v1271_v36 = vld [vmem:[%s1354_s8 + $0xc0] ss:$8 sps:$4 sm:$0xff]   ;;  %v1272_v37 = vld [vmem:[%s1354_s8 + $0xd4] ss:$8 sps:$4 sm:$0xff]   ;;  %v1256_v38 = vld [vmem:[%s1354_s8 + $0x50] ss:$8 sps:$4 sm:$0xff]  }
  0x18   : > { %v1260_v39 = vld [vmem:[%s1354_s8 + $0x64] ss:$8 sps:$4 sm:$0xff]   ;;  %v1274_v40 = vld [vmem:[%s1354_s8 + $0xd0] ss:$8 sps:$4 sm:$0xff]   ;;  %v1262_v42 = vld [vmem:[%s1354_s8 + $0x60] ss:$8 sps:$4 sm:$0xff]  }
  0x19   : > { %1088 = vmatpush3.bf16.msra.mxu0 %v1224_v7  ;;  %1204 = vmatpush3.bf16.msra.mxu1 %v1224_v7  ;;  %v1275_v41 = vld [vmem:[%s1354_s8 + $0xe4] ss:$8 sps:$4 sm:$0xff]   ;;  %v1266_v43 = vld [vmem:[%s1354_s8 + $0x74] ss:$8 sps:$4 sm:$0xff]   ;;  %v1277_v44 = vld [vmem:[%s1354_s8 + $0xe0] ss:$8 sps:$4 sm:$0xff]  }
  0x1a   : > { %1089 = vmatprep.subr.bf16.mxu0 %v1225_v8  ;;  %1197 = vmatprep.subr.bf16.mxu1 %v1225_v8  ;;  %v1278_v45 = vld [vmem:[%s1354_s8 + $0xf4] ss:$8 sps:$4 sm:$0xff]   ;;  %v1268_v46 = vld [vmem:[%s1354_s8 + $0x70] ss:$8 sps:$4 sm:$0xff]  }
  0x1b   : > { %v1280_v47 = vld [vmem:[%s1354_s8 + $0xf0] ss:$8 sps:$4 sm:$0xff]  }
  0x1d   : > { %1090 = vmatpush3.bf16.msra.mxu0 %v1226_v9  ;;  %1205 = vmatpush3.bf16.msra.mxu1 %v1226_v9 }
  0x1e   : > { %1091 = vmatprep.subr.bf16.mxu0 %v1227_v10  ;;  %1198 = vmatprep.subr.bf16.mxu1 %v1227_v10 }
  0x21   : > { %1092 = vmatpush3.bf16.msra.mxu0 %v1228_v12  ;;  %1206 = vmatpush3.bf16.msra.mxu1 %v1228_v12 }
  0x22   : > { %1093 = vmatprep.subr.bf16.mxu0 %v1229_v13  ;;  %1199 = vmatprep.subr.bf16.mxu1 %v1229_v13 }
  0x25   : > { %1094 = vmatpush3.bf16.msra.mxu0 %v1230_v15  ;;  %1207 = vmatpush3.bf16.msra.mxu1 %v1230_v15 }
  0x26   : > { %1095 = vmatprep.subr.bf16.mxu0 %v1231_v16  ;;  %1200 = vmatprep.subr.bf16.mxu1 %v1231_v16 }
  0x29   : > { %1096 = vmatpush3.bf16.msra.mxu0 %v1232_v17  ;;  %1208 = vmatpush3.bf16.msra.mxu1 %v1232_v17 }
  0x2c   : > { %532 = vmatmul.mubr.bf16.vlgmr.msra.gmra.mxu0 %v1233_v18  ;;  %596 = vmatmul.mubr.bf16.vlgmr.msra.gmra.mxu1 %v1245_v20 }
  0x2d   : > { %539 = vmatprep.mubr.bf16.mxu0 %v1236_v19  ;;  %603 = vmatprep.mubr.bf16.mxu1 %v1251_v21  ;;  %v1444_v19 = vld [vmem:[%s1998_s2] ss:$0 sm:$0xff] }
  0x34   : > { %540 = vmatmul.mubr.bf16.gmra.mxu0 %v1238_v22  ;;  %604 = vmatmul.mubr.bf16.gmra.mxu1 %v1253_v24 }
  0x35   : > { %547 = vmatprep.mubr.bf16.mxu0 %v1239_v23  ;;  %611 = vmatprep.mubr.bf16.mxu1 %v1257_v25 }
  0x3c   : > { %548 = vmatmul.mubr.bf16.gmra.mxu0 %v1241_v26  ;;  %612 = vmatmul.mubr.bf16.gmra.mxu1 %v1259_v28 }
  0x3d   : > { %555 = vmatprep.mubr.bf16.mxu0 %v1242_v27  ;;  %619 = vmatprep.mubr.bf16.mxu1 %v1263_v29 }
  0x44   : > { %556 = vmatmul.mubr.bf16.gmra.mxu0 %v1244_v30  ;;  %620 = vmatmul.mubr.bf16.gmra.mxu1 %v1265_v32 }
  0x45   : > { %563 = vmatprep.mubr.bf16.mxu0 %v1248_v31  ;;  %627 = vmatprep.mubr.bf16.mxu1 %v1269_v33 }
  0x4c   : > { %564 = vmatmul.mubr.bf16.gmra.mxu0 %v1250_v34  ;;  %628 = vmatmul.mubr.bf16.gmra.mxu1 %v1271_v36 }
  0x4d   : > { %571 = vmatprep.mubr.bf16.mxu0 %v1254_v35  ;;  %635 = vmatprep.mubr.bf16.mxu1 %v1272_v37 }
  0x54   : > { %572 = vmatmul.mubr.bf16.gmra.mxu0 %v1256_v38  ;;  %636 = vmatmul.mubr.bf16.gmra.mxu1 %v1274_v40 }
  0x55   : > { %579 = vmatprep.mubr.bf16.mxu0 %v1260_v39  ;;  %643 = vmatprep.mubr.bf16.mxu1 %v1275_v41 }
  0x5c   : > { %580 = vmatmul.mubr.bf16.gmra.mxu0 %v1262_v42  ;;  %644 = vmatmul.mubr.bf16.gmra.mxu1 %v1277_v44 }
  0x5d   : > { %587 = vmatprep.mubr.bf16.mxu0 %v1266_v43  ;;  %651 = vmatprep.mubr.bf16.mxu1 %v1278_v45 }
  0x64   : > { %588 = vmatmul.mubr.bf16.gmra.mxu0 %v1268_v46  ;;  %652 = vmatmul.mubr.bf16.gmra.mxu1 %v1280_v47 }
  0xec   : > { %v1097_v48 = vpop.f32.mrf.mxu0  ;;  %v1409_v49 = vpop.f32.mrf.mxu1 }
  0xee   : > { %v1098_v50 = vpop.f32.mrf.mxu0  ;;  %v1411_v51 = vpop.f32.mrf.mxu1 }
  0xef   : > { %v1099_v16 = vadd.f32 %v1098_v50, %v1097_v48 }
  0xf0   : > { %v1100_v52 = vpop.f32.mrf.mxu0  ;;  %v1413_v53 = vpop.f32.mrf.mxu1 }
  0xf1   : > { %v1452_v25 = vadd.f32 %v1099_v16, %v1444_v19 }
  0xf2   : > { %v1101_v54 = vpop.f32.mrf.mxu0  ;;  %v1415_v55 = vpop.f32.mrf.mxu1 }
  0xf3   : > { %v1102_v13 = vadd.f32 %v1101_v54, %v1100_v52  ;;  %v661_v35 = vsel %vm660_vm0, %v1452_v25, 0.0 }
  0xf4   : > { %v1103_v56 = vpop.f32.mrf.mxu0  ;;  %v1417_v57 = vpop.f32.mrf.mxu1 }
  0xf5   : > { %v1447_v21 = vadd.f32 %v1102_v13, %v1444_v19 }
  0xf6   : > { %v1104_v58 = vpop.f32.mrf.mxu0  ;;  %v1419_v59 = vpop.f32.mrf.mxu1 }
  0xf7   : > { %v1105_v17 = vadd.f32 %v1104_v58, %v1103_v56  ;;  %v662_v30 = vsel %vm660_vm0, %v1447_v21, 0.0 }
  0xf8   : > { %v1106_v60 = vpop.f32.mrf.mxu0  ;;  %v1421_v61 = vpop.f32.mrf.mxu1  ;;  %v663_v39 = vadd.f32 %v662_v30, %v661_v35 }
  0xf9   : > { %v1455_v26 = vadd.f32 %v1105_v17, %v1444_v19 }
  0xfa   : > { %v1107_v62 = vpop.f32.mrf.mxu0  ;;  %v1423_v63 = vpop.f32.mrf.mxu1 }
  0xfb   : > { %v1108_v22 = vadd.f32 %v1107_v62, %v1106_v60  ;;  %v664_v36 = vsel %vm660_vm0, %v1455_v26, 0.0 }
  0xfc   : > { %v1109_v0 = vpop.f32.mrf.mxu0  ;;  %v1425_v1 = vpop.f32.mrf.mxu1  ;;  %v665_v45 = vadd.f32 %v664_v36, %v663_v39 }
  0xfd   : > { %v1462_v31 = vadd.f32 %v1108_v22, %v1444_v19 }
  0xfe   : > { %v1110_v2 = vpop.f32.mrf.mxu0  ;;  %v1427_v3 = vpop.f32.mrf.mxu1 }
  0xff   : > { %v1111_v27 = vadd.f32 %v1110_v2, %v1109_v0  ;;  %v666_v42 = vsel %vm660_vm0, %v1462_v31, 0.0 }
 0x100   : > { %v1112_v4 = vpop.f32.mrf.mxu0  ;;  %v1429_v5 = vpop.f32.mrf.mxu1  ;;  %v667_v52 = vadd.f32 %v666_v42, %v665_v45 }
 0x101   : > { %v1471_v37 = vadd.f32 %v1111_v27, %v1444_v19 }
 0x102   : > { %v1113_v6 = vpop.f32.mrf.mxu0  ;;  %v1431_v7 = vpop.f32.mrf.mxu1 }
 0x103   : > { %v1114_v32 = vadd.f32 %v1113_v6, %v1112_v4  ;;  %v668_v47 = vsel %vm660_vm0, %v1471_v37, 0.0 }
 0x104   : > { %v1115_v8 = vpop.f32.mrf.mxu0  ;;  %v1433_v9 = vpop.f32.mrf.mxu1  ;;  %v669_v0 = vadd.f32 %v668_v47, %v667_v52 }
 0x105   : > { %v1478_v43 = vadd.f32 %v1114_v32, %v1444_v19 }
 0x106   : > { %v1116_v10 = vpop.f32.mrf.mxu0  ;;  %v1435_v11 = vpop.f32.mrf.mxu1 }
 0x107   : > { %v1117_v38 = vadd.f32 %v1116_v10, %v1115_v8  ;;  %v670_v58 = vsel %vm660_vm0, %v1478_v43, 0.0 }
 0x108   : > { %v1118_v12 = vpop.f32.mrf.mxu0  ;;  %v1437_v14 = vpop.f32.mrf.mxu1  ;;  %v671_v10 = vadd.f32 %v670_v58, %v669_v0 }
 0x109   : > { %v1483_v48 = vadd.f32 %v1117_v38, %v1444_v19 }
 0x10a   : > { %v1119_v15 = vpop.f32.mrf.mxu0  ;;  %v1439_v18 = vpop.f32.mrf.mxu1 }
 0x10b   : > { %v1120_v44 = vadd.f32 %v1119_v15, %v1118_v12  ;;  %v672_v4 = vsel %vm660_vm0, %v1483_v48, 0.0 }
 0x10c   : > { %v1121_v20 = vpop.f32.mrf.mxu0  ;;  %v1449_v23 = vpop.f32.mrf.mxu1 }
 0x10d   : > { %v1490_v60 = vadd.f32 %v1120_v44, %v1444_v19 }
 0x10e   : > { %v1122_v24 = vpop.f32.mrf.mxu0  ;;  %v1457_v28 = vpop.f32.mrf.mxu1 }
 0x10f   : > { %v1123_v50 = vadd.f32 %v1122_v24, %v1121_v20  ;;  %v674_v15 = vsel %vm660_vm0, %v1490_v60, 0.0  ;;  %v673_v20 = vadd.f32 %v672_v4, %v671_v10  ;;  %v1147_v10 = vadd.f32 %v1411_v51, %v1409_v49 }
 0x110   : > { %v1124_v29 = vpop.f32.mrf.mxu0  ;;  %v1464_v33 = vpop.f32.mrf.mxu1  ;;  %v1153_v49 = vadd.f32 %v1419_v59, %v1417_v57  ;;  %v1159_v59 = vadd.f32 %v1427_v3, %v1425_v1  ;;  %v1165_v1 = vadd.f32 %v1435_v11, %v1433_v9  ;;  %v1171_v9 = vadd.f32 %v1457_v28, %v1449_v23 }
 0x111   : > { %v1495_v6 = vadd.f32 %v1123_v50, %v1444_v19  ;;  %v675_v30 = vadd.f32 %v674_v15, %v673_v20 }
 0x112   : > { %v1125_v34 = vpop.f32.mrf.mxu0  ;;  %v1473_v41 = vpop.f32.mrf.mxu1  ;;  %v1557_v57 = vadd.f32 %v1153_v49, %v1444_v19 }
 0x113   : > { %v1126_v62 = vadd.f32 %v1125_v34, %v1124_v29  ;;  %v676_v24 = vsel %vm660_vm0, %v1495_v6, 0.0 }
 0x114   : > { %v1127_v40 = vpop.f32.mrf.mxu0  ;;  %v1485_v56 = vpop.f32.mrf.mxu1  ;;  %v677_v38 = vadd.f32 %v676_v24, %v675_v30 }
 0x115   : > { %v1502_v16 = vadd.f32 %v1126_v62, %v1444_v19 }
 0x116   : > { %v1128_v46 = vpop.f32.mrf.mxu0  ;;  %v1497_v13 = vpop.f32.mrf.mxu1 }
 0x117   : > { %v1129_v8 = vadd.f32 %v1128_v46, %v1127_v40  ;;  %v678_v35 = vsel %vm660_vm0, %v1502_v16, 0.0  ;;  %v1177_v23 = vadd.f32 %v1497_v13, %v1485_v56 }
 0x118   : > { %v1130_v54 = vpop.f32.mrf.mxu0  ;;  %v1509_v34 = vpop.f32.mrf.mxu1  ;;  %v679_v45 = vadd.f32 %v678_v35, %v677_v38  ;;  %v1540_v35 = vadd.f32 %v1147_v10, %v1444_v19 }
 0x119   : > { %v1507_v27 = vadd.f32 %v1129_v8, %v1444_v19 }
 0x11a   : > { %v1131_v2 = vpop.f32.mrf.mxu0  ;;  %v1179_v47 = vpop.f32.mrf.mxu1 }
 0x11b   : > { %v1132_v17 = vadd.f32 %v1131_v2, %v1130_v54  ;;  %v680_v40 = vsel %vm660_vm0, %v1507_v27, 0.0 }
 0x11c   : > { %v1133_v12 = vpop.f32.mrf.mxu0  ;;  %v681_v54 = vadd.f32 %v680_v40, %v679_v45  ;;  %v1181_v8 = vpop.f32.mrf.mxu1  ;;  %v692_v45 = vsel %vm660_vm0, %v1540_v35, 0.0 }
 0x11d   : > { %v1514_v36 = vadd.f32 %v1132_v17, %v1444_v19 }
 0x11e   : > { %v1134_v22 = vpop.f32.mrf.mxu0 }
 0x11f   : > { %v1135_v29 = vadd.f32 %v1134_v22, %v1133_v12  ;;  %v682_v50 = vsel %vm660_vm0, %v1514_v36, 0.0  ;;  %v1150_v22 = vadd.f32 %v1415_v55, %v1413_v53  ;;  %v1156_v53 = vadd.f32 %v1423_v63, %v1421_v61 }
 0x120   : > { %v1136_v32 = vpop.f32.mrf.mxu0  ;;  %v683_v2 = vadd.f32 %v682_v50, %v681_v54  ;;  %v1162_v63 = vadd.f32 %v1431_v7, %v1429_v5  ;;  %v1168_v5 = vadd.f32 %v1439_v18, %v1437_v14  ;;  %v1174_v14 = vadd.f32 %v1473_v41, %v1464_v33 }
 0x121   : > { %v1519_v42 = vadd.f32 %v1135_v29, %v1444_v19  ;;  %v1564_v61 = vadd.f32 %v1156_v53, %v1444_v19  ;;  %v1180_v33 = vadd.f32 %v1179_v47, %v1509_v34 }
 0x122   : > { %v1137_v39 = vpop.f32.mrf.mxu0 }
 0x123   : > { %v1138_v44 = vadd.f32 %v1137_v39, %v1136_v32  ;;  %v684_v62 = vsel %vm660_vm0, %v1519_v42, 0.0  ;;  %v1182_v32 = vpop.f32.mrf.mxu1  ;;  %v1548_v39 = vadd.f32 %v1150_v22, %v1444_v19  ;;  %v1592_v22 = vadd.f32 %v1168_v5, %v1444_v19 }
 0x124   : > { %v1139_v46 = vpop.f32.mrf.mxu0  ;;  %v685_v17 = vadd.f32 %v684_v62, %v683_v2  ;;  %v696_v62 = vsel %vm660_vm0, %v1557_v57, 0.0  ;;  %v698_v2 = vsel %vm660_vm0, %v1564_v61, 0.0  ;;  %v1617_v13 = vadd.f32 %v1180_v33, %v1444_v19 }
 0x125   : > { %v1524_v52 = vadd.f32 %v1138_v44, %v1444_v19  ;;  %v1184_v44 = vpop.f32.mrf.mxu1  ;;  %v694_v50 = vsel %vm660_vm0, %v1548_v39, 0.0  ;;  %v706_v49 = vsel %vm660_vm0, %v1592_v22, 0.0 }
 0x126   : > { %v1140_v58 = vpop.f32.mrf.mxu0 }
 0x127   : > { %v1141_v0 = vadd.f32 %v1140_v58, %v1139_v46  ;;  %v686_v12 = vsel %vm660_vm0, %v1524_v52, 0.0  ;;  %v1185_v58 = vpop.f32.mrf.mxu1 }
 0x128   : > { %v1142_v4 = vpop.f32.mrf.mxu0  ;;  %v687_v30 = vadd.f32 %v686_v12, %v685_v17  ;;  %v1585_v17 = vadd.f32 %v1165_v1, %v1444_v19 }
 0x129   : > { %v1533_v15 = vadd.f32 %v1141_v0, %v1444_v19  ;;  %v1571_v0 = vadd.f32 %v1159_v59, %v1444_v19  ;;  %v1187_v10 = vpop.f32.mrf.mxu1 }
 0x12a   : > { %v1143_v20 = vpop.f32.mrf.mxu0 }
 0x12b   : > { %v688_v24 = vsel %vm660_vm0, %v1533_v15, 0.0  ;;  %v1144_v29 = vadd.f32 %v1143_v20, %v1142_v4  ;;  %v1578_v4 = vadd.f32 %v1162_v63, %v1444_v19  ;;  %v700_v12 = vsel %vm660_vm0, %v1571_v0, 0.0 }
 0x12c   : > { %v689_v38 = vadd.f32 %v688_v24, %v687_v30  ;;  %v1188_v24 = vpop.f32.mrf.mxu1  ;;  %v1599_v30 = vadd.f32 %v1171_v9, %v1444_v19 }
 0x12d   : > { %v1545_v51 = vadd.f32 %v1144_v29, %v1444_v19  ;;  %v702_v20 = vsel %vm660_vm0, %v1578_v4, 0.0  ;;  %v704_v29 = vsel %vm660_vm0, %v1585_v17, 0.0 }
 0x12e   : > { %v1190_v53 = vpop.f32.mrf.mxu1 }
 0x12f   : > { %v690_v55 = vsel %vm660_vm0, %v1545_v51, 0.0 }
 0x130   : > { %v691_v40 = vadd.f32 %v690_v55, %v689_v38  ;;  %v1606_v38 = vadd.f32 %v1174_v14, %v1444_v19  ;;  %v708_v55 = vsel %vm660_vm0, %v1599_v30, 0.0  ;;  %v1191_v63 = vpop.f32.mrf.mxu1 }
 0x131   : > { %v1192_v1 = vadd.f32 %v1191_v63, %v1190_v53 }
 0x132   : > { %v693_v46 = vadd.f32 %v692_v45, %v691_v40  ;;  %v1612_v40 = vadd.f32 %v1177_v23, %v1444_v19  ;;  %v1183_v45 = vadd.f32 %v1182_v32, %v1181_v8  ;;  %v710_v56 = vsel %vm660_vm0, %v1606_v38, 0.0 }
 0x133   : > { %v714_v8 = vsel %vm660_vm0, %v1617_v13, 0.0 }
 0x134   : > { %v695_v54 = vadd.f32 %v694_v50, %v693_v46  ;;  %v1186_v46 = vadd.f32 %v1185_v58, %v1184_v44  ;;  %v712_v34 = vsel %vm660_vm0, %v1612_v40, 0.0  ;;  %v1622_v47 = vadd.f32 %v1183_v45, %v1444_v19 }
 0x136   : > { %v697_v3 = vadd.f32 %v696_v62, %v695_v54  ;;  %v1189_v54 = vadd.f32 %v1188_v24, %v1187_v10  ;;  %v1627_v32 = vadd.f32 %v1186_v46, %v1444_v19  ;;  %v716_v44 = vsel %vm660_vm0, %v1622_v47, 0.0 }
 0x138   : > { %v699_v7 = vadd.f32 %v698_v2, %v697_v3  ;;  %v1632_v58 = vadd.f32 %v1189_v54, %v1444_v19  ;;  %v718_v5 = vsel %vm660_vm0, %v1627_v32, 0.0 }
 0x13a   : > { %v701_v11 = vadd.f32 %v700_v12, %v699_v7  ;;  %v1637_v7 = vadd.f32 %v1192_v1, %v1444_v19  ;;  %v720_v12 = vsel %vm660_vm0, %v1632_v58, 0.0 }
 0x13c   : > { %v703_v18 = vadd.f32 %v702_v20, %v701_v11  ;;  %v722_v11 = vsel %vm660_vm0, %v1637_v7, 0.0 }
 0x13e   : > { %v705_v28 = vadd.f32 %v704_v29, %v703_v18 }
 0x140   : > { %v707_v41 = vadd.f32 %v706_v49, %v705_v28 }
 0x142   : > { %v709_v59 = vadd.f32 %v708_v55, %v707_v41 }
 0x144   : > { %v711_v50 = vadd.f32 %v710_v56, %v709_v59 }
 0x146   : > { %v713_v62 = vadd.f32 %v712_v34, %v711_v50 }
 0x148   : > { %v715_v3 = vadd.f32 %v714_v8, %v713_v62 }
 0x14a   : > { %v717_v2 = vadd.f32 %v716_v44, %v715_v3 }
 0x14c   : > { %v719_v10 = vadd.f32 %v718_v5, %v717_v2 }
 0x14e   : > { %v721_v9 = vadd.f32 %v720_v12, %v719_v10 }
 0x150   : > { %v723_v20 = vadd.f32 %v722_v11, %v721_v9 }
 0x152   : > { %v724_v14 = vrot.slane %v723_v20, 4 }
 0x154   : > { %v725_v18 = vadd.f32 %v724_v14, %v723_v20 }
 0x156   : > { %v726_v24 = vrot.slane %v725_v18, 2 }
 0x158   : > { %v727_v29 = vadd.f32 %v726_v24, %v725_v18 }
 0x15a   : > { %v728_v23 = vrot.slane %v727_v29, 1 }
 0x15c   : > { %v729_v28 = vadd.f32 %v728_v23, %v727_v29 }
 0x15e   : > { %v1643_v49 = vmul.f32 0.00390625, %v729_v28 }
 0x160   : > { %v1647_v19 = vsub.f32 %v1452_v25, %v1643_v49  ;;  %v1651_v33 = vsub.f32 %v1447_v21, %v1643_v49  ;;  %v1655_v41 = vsub.f32 %v1455_v26, %v1643_v49  ;;  %v1659_v53 = vsub.f32 %v1462_v31, %v1643_v49 }
 0x161   : > { %v1667_v25 = vsub.f32 %v1471_v37, %v1643_v49  ;;  %v1673_v26 = vsub.f32 %v1478_v43, %v1643_v49  ;;  %v1681_v50 = vsub.f32 %v1483_v48, %v1643_v49  ;;  %v1688_v43 = vsub.f32 %v1490_v60, %v1643_v49 }
 0x162   : > { %v764_v55 = vmul.f32 %v1647_v19, %v1647_v19  ;;  %v765_v45 = vmul.f32 %v1651_v33, %v1651_v33  ;;  %v766_v21 = vmul.f32 %v1655_v41, %v1655_v41  ;;  %v767_v31 = vmul.f32 %v1659_v53, %v1659_v53 }
 0x163   : > { %v768_v37 = vmul.f32 %v1667_v25, %v1667_v25  ;;  %v769_v54 = vmul.f32 %v1673_v26, %v1673_v26  ;;  %v1695_v48 = vsub.f32 %v1495_v6, %v1643_v49  ;;  %v770_v1 = vmul.f32 %v1681_v50, %v1681_v50 }
 0x164   : > { %v796_v59 = vsel %vm660_vm0, %v764_v55, 0.0  ;;  %v797_v56 = vsel %vm660_vm0, %v765_v45, 0.0  ;;  %v799_v63 = vsel %vm660_vm0, %v766_v21, 0.0  ;;  %v801_v62 = vsel %vm660_vm0, %v767_v31, 0.0 }
 0x165   : > { %v798_v46 = vadd.f32 %v797_v56, %v796_v59  ;;  %v803_v3 = vsel %vm660_vm0, %v768_v37, 0.0  ;;  %v1702_v60 = vsub.f32 %v1502_v16, %v1643_v49  ;;  %v771_v2 = vmul.f32 %v1688_v43, %v1688_v43 }
 0x166   : > { %v805_v5 = vsel %vm660_vm0, %v769_v54, 0.0  ;;  %v1709_v6 = vsub.f32 %v1507_v27, %v1643_v49  ;;  %v772_v12 = vmul.f32 %v1695_v48, %v1695_v48  ;;  %v807_v9 = vsel %vm660_vm0, %v770_v1, 0.0 }
 0x167   : > { %v800_v34 = vadd.f32 %v799_v63, %v798_v46  ;;  %v1716_v16 = vsub.f32 %v1514_v36, %v1643_v49  ;;  %v773_v20 = vmul.f32 %v1702_v60, %v1702_v60  ;;  %v809_v14 = vsel %vm660_vm0, %v771_v2, 0.0 }
 0x168   : > { %v1723_v27 = vsub.f32 %v1519_v42, %v1643_v49  ;;  %v774_v24 = vmul.f32 %v1709_v6, %v1709_v6  ;;  %v811_v29 = vsel %vm660_vm0, %v772_v12, 0.0  ;;  %v1730_v36 = vsub.f32 %v1524_v52, %v1643_v49 }
 0x169   : > { %v802_v8 = vadd.f32 %v801_v62, %v800_v34  ;;  %v775_v28 = vmul.f32 %v1716_v16, %v1716_v16  ;;  %v813_v55 = vsel %vm660_vm0, %v773_v20, 0.0  ;;  %v1737_v42 = vsub.f32 %v1533_v15, %v1643_v49 }
 0x16a   : > { %v776_v21 = vmul.f32 %v1723_v27, %v1723_v27  ;;  %v815_v31 = vsel %vm660_vm0, %v774_v24, 0.0  ;;  %v1744_v52 = vsub.f32 %v1545_v51, %v1643_v49  ;;  %v777_v56 = vmul.f32 %v1730_v36, %v1730_v36 }
 0x16b   : > { %v804_v44 = vadd.f32 %v803_v3, %v802_v8  ;;  %v817_v46 = vsel %vm660_vm0, %v775_v28, 0.0  ;;  %v1751_v15 = vsub.f32 %v1540_v35, %v1643_v49  ;;  %v778_v63 = vmul.f32 %v1737_v42, %v1737_v42 }
 0x16c   : > { %v819_v34 = vsel %vm660_vm0, %v776_v21, 0.0  ;;  %v1758_v51 = vsub.f32 %v1548_v39, %v1643_v49  ;;  %v779_v62 = vmul.f32 %v1744_v52, %v1744_v52  ;;  %v821_v8 = vsel %vm660_vm0, %v777_v56, 0.0 }
 0x16d   : > { %v806_v10 = vadd.f32 %v805_v5, %v804_v44  ;;  %v1765_v35 = vsub.f32 %v1557_v57, %v1643_v49  ;;  %v780_v3 = vmul.f32 %v1751_v15, %v1751_v15  ;;  %v823_v44 = vsel %vm660_vm0, %v778_v63, 0.0 }
 0x16e   : > { %v1772_v39 = vsub.f32 %v1564_v61, %v1643_v49  ;;  %v781_v5 = vmul.f32 %v1758_v51, %v1758_v51  ;;  %v1779_v57 = vsub.f32 %v1571_v0, %v1643_v49  ;;  %v1786_v61 = vsub.f32 %v1578_v4, %v1643_v49 }
 0x16f   : > { %v808_v11 = vadd.f32 %v807_v9, %v806_v10  ;;  %v825_v10 = vsel %vm660_vm0, %v779_v62, 0.0  ;;  %v782_v9 = vmul.f32 %v1765_v35, %v1765_v35  ;;  %v1793_v0 = vsub.f32 %v1585_v17, %v1643_v49 }
 0x170   : > { %v1800_v4 = vsub.f32 %v1592_v22, %v1643_v49  ;;  %v1807_v17 = vsub.f32 %v1599_v30, %v1643_v49  ;;  %v1814_v22 = vsub.f32 %v1606_v38, %v1643_v49  ;;  %v1821_v30 = vsub.f32 %v1612_v40, %v1643_v49 }
 0x171   : > { %v810_v18 = vadd.f32 %v809_v14, %v808_v11  ;;  %v827_v11 = vsel %vm660_vm0, %v780_v3, 0.0  ;;  %v783_v14 = vmul.f32 %v1772_v39, %v1772_v39  ;;  %v1828_v38 = vsub.f32 %v1617_v13, %v1643_v49 }
 0x172   : > { %v1835_v40 = vsub.f32 %v1622_v47, %v1643_v49  ;;  %v761_v13 = vsub.f32 %v1627_v32, %v1643_v49 }
 0x173   : > { %v812_v23 = vadd.f32 %v811_v29, %v810_v18  ;;  %v829_v18 = vsel %vm660_vm0, %v781_v5, 0.0  ;;  %v784_v29 = vmul.f32 %v1779_v57, %v1779_v57 }
 0x174   : > { %v792_v47 = vmul.f32 %v1835_v40, %v1835_v40 }
 0x175   : > { %v814_v45 = vadd.f32 %v813_v55, %v812_v23  ;;  %v831_v23 = vsel %vm660_vm0, %v782_v9, 0.0  ;;  %v785_v55 = vmul.f32 %v1786_v61, %v1786_v61 }
 0x177   : > { %v816_v59 = vadd.f32 %v815_v31, %v814_v45  ;;  %v833_v45 = vsel %vm660_vm0, %v783_v14, 0.0  ;;  %v786_v31 = vmul.f32 %v1793_v0, %v1793_v0 }
 0x179   : > { %v818_v37 = vadd.f32 %v817_v46, %v816_v59  ;;  %v835_v59 = vsel %vm660_vm0, %v784_v29, 0.0  ;;  %v787_v46 = vmul.f32 %v1800_v4, %v1800_v4 }
 0x17b   : > { %v820_v54 = vadd.f32 %v819_v34, %v818_v37  ;;  %v837_v37 = vsel %vm660_vm0, %v785_v55, 0.0  ;;  %v788_v34 = vmul.f32 %v1807_v17, %v1807_v17 }
 0x17d   : > { %v822_v1 = vadd.f32 %v821_v8, %v820_v54  ;;  %v839_v54 = vsel %vm660_vm0, %v786_v31, 0.0  ;;  %v789_v8 = vmul.f32 %v1814_v22, %v1814_v22 }
 0x17f   : > { %v824_v2 = vadd.f32 %v823_v44, %v822_v1  ;;  %v841_v1 = vsel %vm660_vm0, %v787_v46, 0.0  ;;  %v790_v44 = vmul.f32 %v1821_v30, %v1821_v30 }
 0x181   : > { %v826_v12 = vadd.f32 %v825_v10, %v824_v2  ;;  %v843_v2 = vsel %vm660_vm0, %v788_v34, 0.0  ;;  %v791_v10 = vmul.f32 %v1828_v38, %v1828_v38 }
 0x183   : > { %v828_v20 = vadd.f32 %v827_v11, %v826_v12  ;;  %v845_v12 = vsel %vm660_vm0, %v789_v8, 0.0  ;;  %v762_v11 = vsub.f32 %v1632_v58, %v1643_v49  ;;  %v849_v32 = vsel %vm660_vm0, %v791_v10, 0.0 }
 0x185   : > { %v830_v24 = vadd.f32 %v829_v18, %v828_v20  ;;  %v847_v20 = vsel %vm660_vm0, %v790_v44, 0.0  ;;  %v763_v18 = vsub.f32 %v1637_v7, %v1643_v49 }
 0x187   : > { %v832_v28 = vadd.f32 %v831_v23, %v830_v24  ;;  %v793_v24 = vmul.f32 %v761_v13, %v761_v13  ;;  %v794_v23 = vmul.f32 %v762_v11, %v762_v11 }
 0x189   : > { %v834_v21 = vadd.f32 %v833_v45, %v832_v28  ;;  %v851_v28 = vsel %vm660_vm0, %v792_v47, 0.0  ;;  %v795_v45 = vmul.f32 %v763_v18, %v763_v18  ;;  %v853_v58 = vsel %vm660_vm0, %v793_v24, 0.0 }
 0x18a   : > { %v855_v31 = vsel %vm660_vm0, %v794_v23, 0.0 }
 0x18b   : > { %v836_v56 = vadd.f32 %v835_v59, %v834_v21 }
 0x18d   : > { %v838_v63 = vadd.f32 %v837_v37, %v836_v56  ;;  %v857_v56 = vsel %vm660_vm0, %v795_v45, 0.0 }
 0x18f   : > { %v840_v62 = vadd.f32 %v839_v54, %v838_v63 }
 0x191   : > { %v842_v3 = vadd.f32 %v841_v1, %v840_v62 }
 0x193   : > { %v844_v5 = vadd.f32 %v843_v2, %v842_v3 }
 0x195   : > { %v846_v9 = vadd.f32 %v845_v12, %v844_v5 }
 0x197   : > { %v848_v14 = vadd.f32 %v847_v20, %v846_v9 }
 0x199   : > { %v850_v29 = vadd.f32 %v849_v32, %v848_v14 }
 0x19b   : > { %v852_v55 = vadd.f32 %v851_v28, %v850_v29 }
 0x19d   : > { %v854_v21 = vadd.f32 %v853_v58, %v852_v55 }
 0x19f   : > { %v856_v59 = vadd.f32 %v855_v31, %v854_v21 }
 0x1a1   : > { %v858_v46 = vadd.f32 %v857_v56, %v856_v59 }
 0x1a3   : > { %v859_v37 = vrot.slane %v858_v46, 4 }
 0x1a5   : > { %v860_v7 = vadd.f32 %v859_v37, %v858_v46 }
 0x1a7   : > { %v861_v49 = vrot.slane %v860_v7, 2 }
 0x1a9   : > { %v862_v63 = vadd.f32 %v861_v49, %v860_v7 }
 0x1ab   : > { %v863_v34 = vrot.slane %v862_v63, 1 }
 0x1ad   : > { %v864_v54 = vadd.f32 %v863_v34, %v862_v63 }
 0x1af   : > { %v865_v62 = vmul.f32 0.00390625, %v864_v54 }
 0x1b1   : > { %v866_v8 = vadd.f32 1e-05, %v865_v62 }
 0x1b3   : > { %1281 = vrsqrt.f32 %v866_v8 }
 0x1c0   : > { %v1282_v1 = vpop.eup %1281 }
 0x1c1   : > { %v868_v3 = vmul.f32 %v1282_v1, %v1647_v19  ;;  %v869_v44 = vmul.f32 %v1282_v1, %v1651_v33  ;;  %v870_v2 = vmul.f32 %v1282_v1, %v1655_v41  ;;  %v871_v5 = vmul.f32 %v1282_v1, %v1659_v53 }
 0x1c2   : > { %v872_v10 = vmul.f32 %v1282_v1, %v1667_v25  ;;  %v873_v12 = vmul.f32 %v1282_v1, %v1673_v26  ;;  %v874_v9 = vmul.f32 %v1282_v1, %v1681_v50  ;;  %v875_v47 = vmul.f32 %v1282_v1, %v1688_v43 }
 0x1c3   : > { %v876_v20 = vmul.f32 %v1282_v1, %v1695_v48  ;;  %v877_v14 = vmul.f32 %v1282_v1, %v1702_v60  ;;  %v878_v19 = vmul.f32 %v1282_v1, %v1709_v6  ;;  %v879_v33 = vmul.f32 %v1282_v1, %v1716_v16 }
 0x1c4   : > { %v880_v41 = vmul.f32 %v1282_v1, %v1723_v27  ;;  %v881_v53 = vmul.f32 %v1282_v1, %v1730_v36  ;;  %v882_v25 = vmul.f32 %v1282_v1, %v1737_v42  ;;  %v883_v26 = vmul.f32 %v1282_v1, %v1744_v52 }
 0x1c5   : > { %v884_v50 = vmul.f32 %v1282_v1, %v1751_v15  ;;  %v885_v43 = vmul.f32 %v1282_v1, %v1758_v51  ;;  %v886_v48 = vmul.f32 %v1282_v1, %v1765_v35  ;;  %v887_v60 = vmul.f32 %v1282_v1, %v1772_v39 }
 0x1c6   : > { %v1878_v6 = vmul.f32 %v1282_v1, %v1779_v57  ;;  %v1881_v16 = vmul.f32 %v1282_v1, %v1786_v61  ;;  %v1884_v27 = vmul.f32 %v1282_v1, %v1793_v0  ;;  %v1887_v36 = vmul.f32 %v1282_v1, %v1800_v4 }
 0x1c7   : > { %v1890_v42 = vmul.f32 %v1282_v1, %v1807_v17  ;;  %v1893_v52 = vmul.f32 %v1282_v1, %v1814_v22  ;;  %v1896_v15 = vmul.f32 %v1282_v1, %v1821_v30  ;;  %v1899_v51 = vmul.f32 %v1282_v1, %v1828_v38 }
 0x1c8   : > { %v1909_v35 = vmul.f32 %v1282_v1, %v1835_v40  ;;  %v1911_v39 = vmul.f32 %v1282_v1, %v761_v13  ;;  %v1913_v57 = vmul.f32 %v1282_v1, %v762_v11  ;;  %v1915_v61 = vmul.f32 %v1282_v1, %v763_v18 }
 0x1c9   : > { %v900_v0 = vmax.f32 %v868_v3, 0.0  ;;  %v901_v4 = vmax.f32 %v869_v44, 0.0  ;;  %v902_v17 = vmax.f32 %v870_v2, 0.0  ;;  %v903_v22 = vmax.f32 %v871_v5, 0.0 }
 0x1ca   : > { %v904_v30 = vmax.f32 %v872_v10, 0.0  ;;  %v905_v38 = vmax.f32 %v873_v12, 0.0  ;;  %v906_v40 = vmax.f32 %v874_v9, 0.0  ;;  %v907_v24 = vmax.f32 %v875_v47, 0.0 }
 0x1cb   : > { %v908_v13 = vmax.f32 %v876_v20, 0.0  ;;  %v909_v32 = vmax.f32 %v877_v14, 0.0  ;;  %v910_v11 = vmax.f32 %v878_v19, 0.0  ;;  %v911_v29 = vmax.f32 %v879_v33, 0.0  ;;  %932 = vst.msk [vmem:[%s1906_s29] sm:$0xff] %vm660_vm0, %v900_v0  ;;  %933 = vst.msk [vmem:[%s1906_s29 + $0x8] sm:$0xff] %vm660_vm0, %v901_v4 }
 0x1cc   : > { %934 = vst.msk [vmem:[%s1906_s29 + $0x10] sm:$0xff] %vm660_vm0, %v902_v17  ;;  %935 = vst.msk [vmem:[%s1906_s29 + $0x18] sm:$0xff] %vm660_vm0, %v903_v22  ;;  %v912_v18 = vmax.f32 %v880_v41, 0.0  ;;  %v913_v23 = vmax.f32 %v881_v53, 0.0  ;;  %v914_v28 = vmax.f32 %v882_v25, 0.0  ;;  %v915_v55 = vmax.f32 %v883_v26, 0.0 }
 0x1cd   : > { %936 = vst.msk [vmem:[%s1906_s29 + $0x20] sm:$0xff] %vm660_vm0, %v904_v30  ;;  %937 = vst.msk [vmem:[%s1906_s29 + $0x28] sm:$0xff] %vm660_vm0, %v905_v38  ;;  %v916_v45 = vmax.f32 %v884_v50, 0.0  ;;  %v917_v58 = vmax.f32 %v885_v43, 0.0  ;;  %v918_v21 = vmax.f32 %v886_v48, 0.0  ;;  %v919_v31 = vmax.f32 %v887_v60, 0.0 }
 0x1ce   : > { %938 = vst.msk [vmem:[%s1906_s29 + $0x30] sm:$0xff] %vm660_vm0, %v906_v40  ;;  %939 = vst.msk [vmem:[%s1906_s29 + $0x38] sm:$0xff] %vm660_vm0, %v907_v24  ;;  %v920_v59 = vmax.f32 %v1878_v6, 0.0  ;;  %v921_v56 = vmax.f32 %v1881_v16, 0.0  ;;  %v922_v46 = vmax.f32 %v1884_v27, 0.0  ;;  %v923_v37 = vmax.f32 %v1887_v36, 0.0 }
 0x1cf   : > { %940 = vst.msk [vmem:[%s1906_s29 + $0x40] sm:$0xff] %vm660_vm0, %v908_v13  ;;  %941 = vst.msk [vmem:[%s1906_s29 + $0x48] sm:$0xff] %vm660_vm0, %v909_v32  ;;  %v924_v7 = vmax.f32 %v1890_v42, 0.0  ;;  %v925_v49 = vmax.f32 %v1893_v52, 0.0  ;;  %v926_v63 = vmax.f32 %v1896_v15, 0.0  ;;  %v927_v34 = vmax.f32 %v1899_v51, 0.0 }
 0x1d0   : > { %942 = vst.msk [vmem:[%s1906_s29 + $0x50] sm:$0xff] %vm660_vm0, %v910_v11  ;;  %943 = vst.msk [vmem:[%s1906_s29 + $0x58] sm:$0xff] %vm660_vm0, %v911_v29  ;;  %v928_v54 = vmax.f32 %v1909_v35, 0.0  ;;  %v929_v62 = vmax.f32 %v1911_v39, 0.0  ;;  %v930_v8 = vmax.f32 %v1913_v57, 0.0  ;;  %v931_v1 = vmax.f32 %v1915_v61, 0.0 }
 0x1d1   : > { %944 = vst.msk [vmem:[%s1906_s29 + $0x60] sm:$0xff] %vm660_vm0, %v912_v18  ;;  %945 = vst.msk [vmem:[%s1906_s29 + $0x68] sm:$0xff] %vm660_vm0, %v913_v23 }
 0x1d2   : > { %946 = vst.msk [vmem:[%s1906_s29 + $0x70] sm:$0xff] %vm660_vm0, %v914_v28  ;;  %947 = vst.msk [vmem:[%s1906_s29 + $0x78] sm:$0xff] %vm660_vm0, %v915_v55 }
 0x1d3   : > { %948 = vst.msk [vmem:[%s1906_s29 + $0x80] sm:$0xff] %vm660_vm0, %v916_v45  ;;  %949 = vst.msk [vmem:[%s1906_s29 + $0x88] sm:$0xff] %vm660_vm0, %v917_v58 }
 0x1d4   : > { %950 = vst.msk [vmem:[%s1906_s29 + $0x90] sm:$0xff] %vm660_vm0, %v918_v21  ;;  %951 = vst.msk [vmem:[%s1906_s29 + $0x98] sm:$0xff] %vm660_vm0, %v919_v31 }
 0x1d5   : > { %952 = vst.msk [vmem:[%s1906_s29 + $0xa0] sm:$0xff] %vm660_vm0, %v920_v59  ;;  %953 = vst.msk [vmem:[%s1906_s29 + $0xa8] sm:$0xff] %vm660_vm0, %v921_v56 }
 0x1d6   : > { %954 = vst.msk [vmem:[%s1906_s29 + $0xb0] sm:$0xff] %vm660_vm0, %v922_v46  ;;  %955 = vst.msk [vmem:[%s1906_s29 + $0xb8] sm:$0xff] %vm660_vm0, %v923_v37 }
 0x1d7   : > { %956 = vst.msk [vmem:[%s1906_s29 + $0xc0] sm:$0xff] %vm660_vm0, %v924_v7  ;;  %957 = vst.msk [vmem:[%s1906_s29 + $0xc8] sm:$0xff] %vm660_vm0, %v925_v49 }
 0x1d8   : > { %958 = vst.msk [vmem:[%s1906_s29 + $0xd0] sm:$0xff] %vm660_vm0, %v926_v63  ;;  %959 = vst.msk [vmem:[%s1906_s29 + $0xd8] sm:$0xff] %vm660_vm0, %v927_v34 }
 0x1d9   : > { %960 = vst.msk [vmem:[%s1906_s29 + $0xe0] sm:$0xff] %vm660_vm0, %v928_v54  ;;  %961 = vst.msk [vmem:[%s1906_s29 + $0xe8] sm:$0xff] %vm660_vm0, %v929_v62 }
 0x1da   : > { %962 = vst.msk [vmem:[%s1906_s29 + $0xf0] sm:$0xff] %vm660_vm0, %v930_v8  ;;  %963 = vst.msk [vmem:[%s1906_s29 + $0xf8] sm:$0xff] %vm660_vm0, %v931_v1 }
 0x1db PF: > { %s13_s12 = sadd.s32 1, %s1289_s12  }
 0x1dc   : > { %p10_p4 = scmp.ge.s32.totalorder %s13_s12, 4  }
 0x1de   :  { %12 = sbr.rel (!%p10_p4) target bundleno = 1 (0x1), region = 62 }

// kernel: spec_forward.11
= control target key start
LH: loop header
LB: loop body
LE: loop exit
PB: predicated region body
PF: predicated region fallthrough
CT: control target
= control target key end

     0   :  { %s611_s12 = smov 0   ;;  %s689_s0 = inlined_call_operand.vmem [shape: bf16[2,64,128], index: 0, kind: input, shape index: {}]   ;;  %s690_s1 = inlined_call_operand.vmem [shape: bf16[128,16], index: 1, kind: input, shape index: {}]   ;;  %s691_s2 = inlined_call_operand.vmem [shape: f32[1,16], index: 2, kind: input, shape index: {}]   ;;  %s692_s3 = inlined_call_operand.vmem [shape: f32[2,64,16], index: 3, kind: output, shape index: {}]  }
   0x1 LB: > { %s483_s13 = sadd.s32 4294967295, %s589_s12   ;;  %p487_p0 = scmp.ge.s32.totalorder %s589_s12, 1  ;;  %s589_s12 = sphi %s611_s12, %s13_s12  }
   0x2   : > { %p137_p1 = scmp.lt.s32.totalorder %s589_s12, 3 }
   0x4   : > { %p138_p2 = pnand %p487_p0, %p137_p1 }
   0x5   : > { %p161_p3 = scmp.lt.s32.totalorder (!%p138_p2), %s483_s13, 1 }
   0x6   : > { %141 = sbr.rel (%p138_p2) target bundleno = 331 (0x14b), region = 32 }
   0xb   : > { %v569_v0 = vld [vmem:[%s690_s1 + $0x38] sm:$0xff]   ;;  %v570_v1 = vld [vmem:[%s690_s1 + $0x30] sm:$0xff]   ;;  %s694_s13 = smov (!%p161_p3, %s483_s13), 1  ;;  %v571_v2 = vld [vmem:[%s690_s1 + $0x28] sm:$0xff]   ;;  %vm340_vm0 = vcmask 130048  }
   0xc   : > { %521 = vmatprep.subr.bf16.mxu0 %v569_v0  ;;  %545 = vmatprep.subr.bf16.mxu1 %v569_v0  ;;  %s507_s20 = sshll.u32 %s694_s13, 5  ;;  %v572_v3 = vld [vmem:[%s690_s1 + $0x20] sm:$0xff]   ;;  %v573_v6 = vld [vmem:[%s690_s1 + $0x18] sm:$0xff]   ;;  %v574_v7 = vld [vmem:[%s690_s1 + $0x10] sm:$0xff]   ;;  %s508_s9 = sshll.u32 %s694_s13, 6 }
   0xd   : > { %522 = vmatpush3.bf16.msra.mxu0 %v569_v0  ;;  %553 = vmatpush3.bf16.msra.mxu1 %v569_v0  ;;  %s634_s23 = scalar_lea.vmem %s689_s0, %s507_s20  ;;  %v575_v8 = vld [vmem:[%s690_s1 + $0x8] sm:$0xff]   ;;  %v576_v9 = vld [vmem:[%s690_s1] sm:$0xff]   ;;  %s170_s14 = scalar_lea.vmem %s692_s3, %s508_s9 }
   0xe   : > { %523 = vmatprep.subr.bf16.mxu0 %v570_v1  ;;  %546 = vmatprep.subr.bf16.mxu1 %v570_v1  ;;  %v577_v4 = vld [vmem:[%s634_s23] sm:$0xff]   ;;  %v579_v5 = vld [vmem:[%s634_s23 + $0x10] sm:$0xff]   ;;  %v578_v10 = vld [vmem:[%s634_s23 + $0x8] sm:$0xff]  }
   0xf   : > { %537 = vmatprep.mubr.bf16.mxu0 %v577_v4  ;;  %541 = vmatprep.mubr.bf16.mxu1 %v579_v5  ;;  %v580_v11 = vld [vmem:[%s634_s23 + $0x18] sm:$0xff]   ;;  %v492_v16 = vld [vmem:[%s691_s2] ss:$0 sm:$0xff] }
  0x11   : > { %524 = vmatpush3.bf16.msra.mxu0 %v570_v1  ;;  %554 = vmatpush3.bf16.msra.mxu1 %v570_v1 }
  0x12   : > { %525 = vmatprep.subr.bf16.mxu0 %v571_v2  ;;  %547 = vmatprep.subr.bf16.mxu1 %v571_v2 }
  0x15   : > { %526 = vmatpush3.bf16.msra.mxu0 %v571_v2  ;;  %555 = vmatpush3.bf16.msra.mxu1 %v571_v2 }
  0x16   : > { %527 = vmatprep.subr.bf16.mxu0 %v572_v3  ;;  %548 = vmatprep.subr.bf16.mxu1 %v572_v3 }
  0x19   : > { %528 = vmatpush3.bf16.msra.mxu0 %v572_v3  ;;  %556 = vmatpush3.bf16.msra.mxu1 %v572_v3 }
  0x1a   : > { %529 = vmatprep.subr.bf16.mxu0 %v573_v6  ;;  %549 = vmatprep.subr.bf16.mxu1 %v573_v6 }
  0x1d   : > { %530 = vmatpush3.bf16.msra.mxu0 %v573_v6  ;;  %557 = vmatpush3.bf16.msra.mxu1 %v573_v6 }
  0x1e   : > { %531 = vmatprep.subr.bf16.mxu0 %v574_v7  ;;  %550 = vmatprep.subr.bf16.mxu1 %v574_v7 }
  0x21   : > { %532 = vmatpush3.bf16.msra.mxu0 %v574_v7  ;;  %558 = vmatpush3.bf16.msra.mxu1 %v574_v7 }
  0x22   : > { %533 = vmatprep.subr.bf16.mxu0 %v575_v8  ;;  %551 = vmatprep.subr.bf16.mxu1 %v575_v8 }
  0x25   : > { %534 = vmatpush3.bf16.msra.mxu0 %v575_v8  ;;  %559 = vmatpush3.bf16.msra.mxu1 %v575_v8 }
  0x26   : > { %535 = vmatprep.subr.bf16.mxu0 %v576_v9  ;;  %552 = vmatprep.subr.bf16.mxu1 %v576_v9 }
  0x29   : > { %536 = vmatpush3.bf16.msra.mxu0 %v576_v9  ;;  %560 = vmatpush3.bf16.msra.mxu1 %v576_v9 }
  0x2c   : > { %538 = vmatmul.mubr.bf16.vlgmr.msra.gmra.mxu0 %v578_v10  ;;  %542 = vmatmul.mubr.bf16.vlgmr.msra.gmra.mxu1 %v580_v11 }
  0xec   : > { %v539_v12 = vpop.f32.mrf.mxu0  ;;  %v543_v13 = vpop.f32.mrf.mxu1 }
  0xed   : > { %v318_v21 = vadd.f32 %v539_v12, %v492_v16  ;;  %v334_v34 = vadd.f32 %v543_v13, %v492_v16 }
  0xee   : > { %v309_v14 = vpop.f32.mrf.mxu0  ;;  %v325_v15 = vpop.f32.mrf.mxu1 }
  0xef   : > { %v310_v18 = vadd.f32 %v492_v16, %v309_v14  ;;  %v344_v28 = vsel %vm340_vm0, %v318_v21, 0.0  ;;  %v326_v29 = vadd.f32 %v492_v16, %v325_v15  ;;  %v352_v40 = vsel %vm340_vm0, %v334_v34, 0.0 }
  0xf0   : > { %v540_v17 = vpop.f32.mrf.mxu0  ;;  %v544_v20 = vpop.f32.mrf.mxu1 }
  0xf1   : > { %v341_v23 = vsel %vm340_vm0, %v310_v18, 0.0  ;;  %v321_v24 = vadd.f32 %v540_v17, %v492_v16  ;;  %v348_v35 = vsel %vm340_vm0, %v326_v29, 0.0  ;;  %v337_v37 = vadd.f32 %v544_v20, %v492_v16 }
  0xf2   : > { %v312_v19 = vpop.f32.mrf.mxu0  ;;  %v328_v27 = vpop.f32.mrf.mxu1 }
  0xf3   : > { %v313_v22 = vadd.f32 %v492_v16, %v312_v19  ;;  %v346_v31 = vsel %vm340_vm0, %v321_v24, 0.0  ;;  %v329_v32 = vadd.f32 %v492_v16, %v328_v27  ;;  %v354_v42 = vsel %vm340_vm0, %v337_v37, 0.0 }
  0xf5   : > { %v342_v25 = vsel %vm340_vm0, %v313_v22, 0.0  ;;  %v350_v38 = vsel %vm340_vm0, %v329_v32, 0.0 }
  0xf6   : > { %v343_v26 = vadd.f32 %v342_v25, %v341_v23 }
  0xf8   : > { %v345_v30 = vadd.f32 %v344_v28, %v343_v26 }
  0xfa   : > { %v347_v33 = vadd.f32 %v346_v31, %v345_v30 }
  0xfc   : > { %v349_v36 = vadd.f32 %v348_v35, %v347_v33 }
  0xfe   : > { %v351_v39 = vadd.f32 %v350_v38, %v349_v36 }
 0x100   : > { %v353_v41 = vadd.f32 %v352_v40, %v351_v39 }
 0x102   : > { %v355_v43 = vadd.f32 %v354_v42, %v353_v41 }
 0x104   : > { %v356_v44 = vrot.slane %v355_v43, 4 }
 0x106   : > { %v357_v45 = vadd.f32 %v356_v44, %v355_v43 }
 0x108   : > { %v358_v46 = vrot.slane %v357_v45, 2 }
 0x10a   : > { %v359_v47 = vadd.f32 %v358_v46, %v357_v45 }
 0x10c   : > { %v360_v48 = vrot.slane %v359_v47, 1 }
 0x10e   : > { %v361_v49 = vadd.f32 %v360_v48, %v359_v47 }
 0x110   : > { %v363_v50 = vmul.f32 0.015625, %v361_v49 }
 0x112   : > { %v364_v51 = vsub.f32 %v310_v18, %v363_v50  ;;  %v365_v52 = vsub.f32 %v313_v22, %v363_v50  ;;  %v366_v53 = vsub.f32 %v318_v21, %v363_v50  ;;  %v367_v54 = vsub.f32 %v321_v24, %v363_v50 }
 0x113   : > { %v368_v55 = vsub.f32 %v326_v29, %v363_v50  ;;  %v369_v59 = vsub.f32 %v329_v32, %v363_v50  ;;  %v370_v0 = vsub.f32 %v334_v34, %v363_v50  ;;  %v371_v4 = vsub.f32 %v337_v37, %v363_v50 }
 0x114   : > { %v372_v56 = vmul.f32 %v364_v51, %v364_v51  ;;  %v373_v57 = vmul.f32 %v365_v52, %v365_v52  ;;  %v374_v58 = vmul.f32 %v366_v53, %v366_v53  ;;  %v375_v60 = vmul.f32 %v367_v54, %v367_v54 }
 0x115   : > { %v376_v1 = vmul.f32 %v368_v55, %v368_v55  ;;  %v377_v5 = vmul.f32 %v369_v59, %v369_v59  ;;  %v378_v8 = vmul.f32 %v370_v0, %v370_v0  ;;  %v379_v11 = vmul.f32 %v371_v4, %v371_v4 }
 0x116   : > { %v380_v61 = vsel %vm340_vm0, %v372_v56, 0.0  ;;  %v381_v62 = vsel %vm340_vm0, %v373_v57, 0.0  ;;  %v383_v2 = vsel %vm340_vm0, %v374_v58, 0.0  ;;  %v385_v6 = vsel %vm340_vm0, %v375_v60, 0.0 }
 0x117   : > { %v382_v63 = vadd.f32 %v381_v62, %v380_v61  ;;  %v387_v9 = vsel %vm340_vm0, %v376_v1, 0.0  ;;  %v389_v12 = vsel %vm340_vm0, %v377_v5, 0.0  ;;  %v391_v14 = vsel %vm340_vm0, %v378_v8, 0.0 }
 0x118   : > { %v393_v16 = vsel %vm340_vm0, %v379_v11, 0.0 }
 0x119   : > { %v384_v3 = vadd.f32 %v383_v2, %v382_v63 }
 0x11b   : > { %v386_v7 = vadd.f32 %v385_v6, %v384_v3 }
 0x11d   : > { %v388_v10 = vadd.f32 %v387_v9, %v386_v7 }
 0x11f   : > { %v390_v13 = vadd.f32 %v389_v12, %v388_v10 }
 0x121   : > { %v392_v15 = vadd.f32 %v391_v14, %v390_v13 }
 0x123   : > { %v394_v17 = vadd.f32 %v393_v16, %v392_v15 }
 0x125   : > { %v395_v18 = vrot.slane %v394_v17, 4 }
 0x127   : > { %v396_v19 = vadd.f32 %v395_v18, %v394_v17 }
 0x129   : > { %v397_v20 = vrot.slane %v396_v19, 2 }
 0x12b   : > { %v398_v21 = vadd.f32 %v397_v20, %v396_v19 }
 0x12d   : > { %v399_v22 = vrot.slane %v398_v21, 1 }
 0x12f   : > { %v400_v23 = vadd.f32 %v399_v22, %v398_v21 }
 0x131   : > { %v401_v24 = vmul.f32 0.015625, %v400_v23 }
 0x133   : > { %v402_v25 = vadd.f32 1e-05, %v401_v24 }
 0x135   : > { %581 = vrsqrt.f32 %v402_v25 }
 0x142   : > { %v582_v26 = vpop.eup %581 }
 0x143   : > { %v404_v27 = vmul.f32 %v582_v26, %v364_v51  ;;  %v405_v28 = vmul.f32 %v582_v26, %v365_v52  ;;  %v406_v29 = vmul.f32 %v582_v26, %v366_v53  ;;  %v407_v30 = vmul.f32 %v582_v26, %v367_v54 }
 0x144   : > { %v408_v31 = vmul.f32 %v582_v26, %v368_v55  ;;  %v409_v32 = vmul.f32 %v582_v26, %v369_v59  ;;  %v410_v33 = vmul.f32 %v582_v26, %v370_v0  ;;  %v411_v34 = vmul.f32 %v582_v26, %v371_v4 }
 0x145   : > { %v412_v35 = vmax.f32 %v404_v27, 0.0  ;;  %v413_v36 = vmax.f32 %v405_v28, 0.0  ;;  %v414_v37 = vmax.f32 %v406_v29, 0.0  ;;  %v415_v38 = vmax.f32 %v407_v30, 0.0 }
 0x146   : > { %v416_v39 = vmax.f32 %v408_v31, 0.0  ;;  %v417_v40 = vmax.f32 %v409_v32, 0.0  ;;  %v418_v41 = vmax.f32 %v410_v33, 0.0  ;;  %v419_v42 = vmax.f32 %v411_v34, 0.0 }
 0x147   : > { %420 = vst.msk [vmem:[%s170_s14] sm:$0xff] %vm340_vm0, %v412_v35  ;;  %421 = vst.msk [vmem:[%s170_s14 + $0x8] sm:$0xff] %vm340_vm0, %v413_v36 }
 0x148   : > { %422 = vst.msk [vmem:[%s170_s14 + $0x10] sm:$0xff] %vm340_vm0, %v414_v37  ;;  %423 = vst.msk [vmem:[%s170_s14 + $0x18] sm:$0xff] %vm340_vm0, %v415_v38 }
 0x149   : > { %424 = vst.msk [vmem:[%s170_s14 + $0x20] sm:$0xff] %vm340_vm0, %v416_v39  ;;  %425 = vst.msk [vmem:[%s170_s14 + $0x28] sm:$0xff] %vm340_vm0, %v417_v40 }
 0x14a   : > { %426 = vst.msk [vmem:[%s170_s14 + $0x30] sm:$0xff] %vm340_vm0, %v418_v41  ;;  %427 = vst.msk [vmem:[%s170_s14 + $0x38] sm:$0xff] %vm340_vm0, %v419_v42 }
 0x14b PF: > { %s13_s12 = sadd.s32 1, %s589_s12  }
 0x14c   : > { %p10_p4 = scmp.ge.s32.totalorder %s13_s12, 4  }
 0x14e   :  { %12 = sbr.rel (!%p10_p4) target bundleno = 1 (0x1), region = 62 }

// kernel: spec_forward.12
= control target key start
LH: loop header
LB: loop body
LE: loop exit
PB: predicated region body
PF: predicated region fallthrough
CT: control target
= control target key end

     0   :  { %s560_s12 = smov 0   ;;  %s641_s0 = inlined_call_operand.vmem [shape: bf16[2,16,256], index: 0, kind: input, shape index: {}]   ;;  %s642_s1 = inlined_call_operand.vmem [shape: bf16[256,32], index: 1, kind: input, shape index: {}]   ;;  %s643_s2 = inlined_call_operand.vmem [shape: f32[1,32], index: 2, kind: input, shape index: {}]   ;;  %s644_s3 = inlined_call_operand.vmem [shape: f32[2,16,32], index: 3, kind: output, shape index: {}]  }
   0x1 LB: > { %s449_s13 = sadd.s32 4294967295, %s538_s12   ;;  %p453_p0 = scmp.ge.s32.totalorder %s538_s12, 1  ;;  %s538_s12 = sphi %s560_s12, %s13_s12  }
   0x2   : > { %p137_p1 = scmp.lt.s32.totalorder %s538_s12, 3 }
   0x4   : > { %p138_p2 = pnand %p453_p0, %p137_p1 }
   0x5   : > { %p161_p3 = scmp.lt.s32.totalorder (!%p138_p2), %s449_s13, 1 }
   0x6   : > { %141 = sbr.rel (%p138_p2) target bundleno = 306 (0x132), region = 32 }
   0xb   : > { %v511_v0 = vld [vmem:[%s642_s1 + $0x78] sm:$0xff]   ;;  %v513_v2 = vld [vmem:[%s642_s1 + $0x70] sm:$0xff]   ;;  %v515_v4 = vld [vmem:[%s642_s1 + $0x68] sm:$0xff]   ;;  %s646_s13 = smov (!%p161_p3, %s449_s13), 1  ;;  %vm360_vm0 = vcmask 261120  }
   0xc   : > { %v512_v1 = vld [vmem:[%s642_s1 + $0x38] sm:$0xff]   ;;  %481 = vmatprep.subr.bf16.mxu0 %v511_v0  ;;  %v514_v3 = vld [vmem:[%s642_s1 + $0x30] sm:$0xff]   ;;  %v516_v5 = vld [vmem:[%s642_s1 + $0x28] sm:$0xff]   ;;  %s479_s30 = sshll.u32 %s646_s13, 4 }
   0xd   : > { %482 = vmatpush3.bf16.msra.mxu0 %v512_v1  ;;  %v517_v6 = vld [vmem:[%s642_s1 + $0x60] sm:$0xff]   ;;  %v519_v8 = vld [vmem:[%s642_s1 + $0x58] sm:$0xff]   ;;  %s165_s8 = scalar_lea.vmem %s641_s0, %s479_s30  ;;  %v521_v10 = vld [vmem:[%s642_s1 + $0x50] sm:$0xff]   ;;  %s170_s29 = scalar_lea.vmem %s644_s3, %s479_s30 }
   0xe   : > { %483 = vmatprep.subr.bf16.mxu0 %v513_v2  ;;  %v518_v7 = vld [vmem:[%s642_s1 + $0x20] sm:$0xff]   ;;  %v520_v9 = vld [vmem:[%s642_s1 + $0x18] sm:$0xff]   ;;  %v522_v12 = vld [vmem:[%s642_s1 + $0x10] sm:$0xff]  }
   0xf   : > { %v529_v11 = vld [vmem:[%s165_s8 + $0x4] ss:$8 sps:$4 sm:$0xff]   ;;  %v527_v17 = vld [vmem:[%s165_s8] ss:$8 sps:$4 sm:$0xff]  }
  0x10   : > { %351 = vmatprep.mubr.bf16.mxu0 %v529_v11  ;;  %v523_v13 = vld [vmem:[%s642_s1 + $0x48] sm:$0xff]   ;;  %v525_v15 = vld [vmem:[%s642_s1 + $0x40] sm:$0xff]  }
  0x11   : > { %484 = vmatpush3.bf16.msra.mxu0 %v514_v3  ;;  %v524_v14 = vld [vmem:[%s642_s1 + $0x8] sm:$0xff]   ;;  %v526_v16 = vld [vmem:[%s642_s1] sm:$0xff]  }
  0x12   : > { %485 = vmatprep.subr.bf16.mxu0 %v515_v4  ;;  %v458_v21 = vld [vmem:[%s643_s2] ss:$0 sm:$0xff] }
  0x15   : > { %486 = vmatpush3.bf16.msra.mxu0 %v516_v5 }
  0x16   : > { %487 = vmatprep.subr.bf16.mxu0 %v517_v6 }
  0x19   : > { %488 = vmatpush3.bf16.msra.mxu0 %v518_v7 }
  0x1a   : > { %489 = vmatprep.subr.bf16.mxu0 %v519_v8 }
  0x1d   : > { %490 = vmatpush3.bf16.msra.mxu0 %v520_v9 }
  0x1e   : > { %491 = vmatprep.subr.bf16.mxu0 %v521_v10 }
  0x21   : > { %492 = vmatpush3.bf16.msra.mxu0 %v522_v12 }
  0x22   : > { %493 = vmatprep.subr.bf16.mxu0 %v523_v13 }
  0x25   : > { %494 = vmatpush3.bf16.msra.mxu0 %v524_v14 }
  0x26   : > { %495 = vmatprep.subr.bf16.mxu0 %v525_v15 }
  0x29   : > { %496 = vmatpush3.bf16.msra.mxu0 %v526_v16 }
  0x2c   : > { %352 = vmatmul.mubr.bf16.vlgmr.msra.gmra.mxu0 %v527_v17 }
  0xec   : > { %v497_v18 = vpop.f32.mrf.mxu0 }
  0xee   : > { %v498_v19 = vpop.f32.mrf.mxu0 }
  0xef   : > { %v499_v20 = vadd.f32 %v498_v19, %v497_v18 }
  0xf0   : > { %v500_v22 = vpop.f32.mrf.mxu0 }
  0xf1   : > { %v354_v24 = vadd.f32 %v499_v20, %v458_v21 }
  0xf2   : > { %v501_v23 = vpop.f32.mrf.mxu0 }
  0xf3   : > { %v502_v25 = vadd.f32 %v501_v23, %v500_v22  ;;  %v361_v27 = vsel %vm360_vm0, %v354_v24, 0.0 }
  0xf5   : > { %v357_v26 = vadd.f32 %v502_v25, %v458_v21 }
  0xf7   : > { %v362_v28 = vsel %vm360_vm0, %v357_v26, 0.0 }
  0xf8   : > { %v363_v29 = vadd.f32 %v362_v28, %v361_v27 }
  0xfa   : > { %v364_v30 = vrot.slane %v363_v29, 4 }
  0xfc   : > { %v365_v31 = vadd.f32 %v364_v30, %v363_v29 }
  0xfe   : > { %v366_v32 = vrot.slane %v365_v31, 2 }
 0x100   : > { %v367_v33 = vadd.f32 %v366_v32, %v365_v31 }
 0x102   : > { %v368_v34 = vrot.slane %v367_v33, 1 }
 0x104   : > { %v369_v35 = vadd.f32 %v368_v34, %v367_v33 }
 0x106   : > { %v371_v36 = vmul.f32 0.0625, %v369_v35 }
 0x108   : > { %v372_v37 = vsub.f32 %v354_v24, %v371_v36  ;;  %v373_v38 = vsub.f32 %v357_v26, %v371_v36 }
 0x10a   : > { %v374_v39 = vmul.f32 %v372_v37, %v372_v37  ;;  %v375_v40 = vmul.f32 %v373_v38, %v373_v38 }
 0x10c   : > { %v376_v41 = vsel %vm360_vm0, %v374_v39, 0.0  ;;  %v377_v42 = vsel %vm360_vm0, %v375_v40, 0.0 }
 0x10d   : > { %v378_v43 = vadd.f32 %v377_v42, %v376_v41 }
 0x10f   : > { %v379_v44 = vrot.slane %v378_v43, 4 }
 0x111   : > { %v380_v45 = vadd.f32 %v379_v44, %v378_v43 }
 0x113   : > { %v381_v46 = vrot.slane %v380_v45, 2 }
 0x115   : > { %v382_v47 = vadd.f32 %v381_v46, %v380_v45 }
 0x117   : > { %v383_v48 = vrot.slane %v382_v47, 1 }
 0x119   : > { %v384_v49 = vadd.f32 %v383_v48, %v382_v47 }
 0x11b   : > { %v385_v50 = vmul.f32 0.0625, %v384_v49 }
 0x11d   : > { %v386_v51 = vadd.f32 1e-05, %v385_v50 }
 0x11f   : > { %530 = vrsqrt.f32 %v386_v51 }
 0x12c   : > { %v531_v52 = vpop.eup %530 }
 0x12d   : > { %v388_v53 = vmul.f32 %v531_v52, %v372_v37  ;;  %v389_v54 = vmul.f32 %v531_v52, %v373_v38 }
 0x12f   : > { %v390_v55 = vmax.f32 %v388_v53, 0.0  ;;  %v391_v56 = vmax.f32 %v389_v54, 0.0 }
 0x131   : > { %392 = vst.msk [vmem:[%s170_s29] sm:$0xff] %vm360_vm0, %v390_v55  ;;  %393 = vst.msk [vmem:[%s170_s29 + $0x8] sm:$0xff] %vm360_vm0, %v391_v56 }
 0x132 PF: > { %s13_s12 = sadd.s32 1, %s538_s12  }
 0x133   : > { %p10_p4 = scmp.ge.s32.totalorder %s13_s12, 4  }
 0x135   :  { %12 = sbr.rel (!%p10_p4) target bundleno = 1 (0x1), region = 62 }

// kernel: spec_forward.14
= control target key start
LH: loop header
LB: loop body
LE: loop exit
PB: predicated region body
PF: predicated region fallthrough
CT: control target
= control target key end

     0   :  { %s792_s15 = smov 0   ;;  %s901_s0 = inlined_call_operand.vmem [shape: bf16[2,16,384], index: 0, kind: input, shape index: {}]   ;;  %s902_s1 = inlined_call_operand.vmem [shape: bf16[384,32], index: 1, kind: input, shape index: {}]   ;;  %s903_s2 = inlined_call_operand.vmem [shape: f32[1,32], index: 2, kind: input, shape index: {}]   ;;  %s904_s3 = inlined_call_operand.vmem [shape: f32[2,16,32], index: 3, kind: input, shape index: {}]   ;;  %s905_s4 = inlined_call_operand.vmem [shape: f32[2,16,32], index: 4, kind: output, shape index: {}]  }
   0x1 LB: > { %s623_s16 = sadd.s32 4294967295, %s763_s15   ;;  %p627_p0 = scmp.ge.s32.totalorder %s763_s15, 1  ;;  %s763_s15 = sphi %s792_s15, %s14_s15  }
   0x2   : > { %p172_p1 = scmp.lt.s32.totalorder %s763_s15, 3 }
   0x4   : > { %p173_p2 = pnand %p627_p0, %p172_p1 }
   0x5   : > { %p203_p3 = scmp.lt.s32.totalorder (!%p173_p2), %s623_s16, 1 }
   0x6   : > { %176 = sbr.rel (%p173_p2) target bundleno = 308 (0x134), region = 36 }
   0xb   : > { %v727_v0 = vld [vmem:[%s902_s1 + $0x78] sm:$0xff]   ;;  %v765_v1 = vmov 0.0   ;;  %v730_v4 = vld [vmem:[%s902_s1 + $0x70] sm:$0xff]   ;;  %vm766_vm0 = vmmov 0   ;;  %v733_v7 = vld [vmem:[%s902_s1 + $0x68] sm:$0xff]   ;;  %s907_s16 = smov (!%p203_p3, %s623_s16), 1 }
   0xc   : > { %696 = vmatprep.subr.bf16.mxu1 %v765_v1  ;;  %v728_v2 = vld [vmem:[%s902_s1 + $0x38] sm:$0xff]   ;;  %665 = vmatprep.subr.bf16.mxu0 %v727_v0  ;;  %v731_v5 = vld [vmem:[%s902_s1 + $0x30] sm:$0xff]   ;;  %v734_v8 = vld [vmem:[%s902_s1 + $0x28] sm:$0xff]   ;;  %s716_s27 = smul.u32 24, %s907_s16  ;;  %vm520_vm1 = vcmask 261120   ;;  %s663_s23 = sshll.u32 %s907_s16, 4 }
   0xd   : > { %v729_v3 = vld [vmem:[%s902_s1 + $0xb8] sm:$0xff]   ;;  %666 = vmatpush3.bf16.msra.mxu0 %v728_v2  ;;  %712 = vmatprep.mubr.msk.bf16.mxu1 %vm766_vm0, %v765_v1  ;;  %v732_v6 = vld [vmem:[%s902_s1 + $0xb0] sm:$0xff]   ;;  %v735_v9 = vld [vmem:[%s902_s1 + $0xa8] sm:$0xff]   ;;  %s212_s26 = scalar_lea.vmem %s904_s3, %s663_s23  ;;  %s217_s29 = scalar_lea.vmem %s905_s4, %s663_s23 }
   0xe   : > { %697 = vmatpush3.bf16.msra.mxu1 %v729_v3  ;;  %667 = vmatprep.subr.bf16.mxu0 %v730_v4  ;;  %v736_v10 = vld [vmem:[%s902_s1 + $0x60] sm:$0xff]   ;;  %v739_v13 = vld [vmem:[%s902_s1 + $0x58] sm:$0xff]   ;;  %v742_v16 = vld [vmem:[%s902_s1 + $0x50] sm:$0xff]   ;;  %s207_s10 = scalar_lea.vmem %s901_s0, %s716_s27 }
   0xf   : > { %698 = vmatprep.subr.bf16.mxu1 %v765_v1  ;;  %v737_v11 = vld [vmem:[%s902_s1 + $0x20] sm:$0xff]   ;;  %v740_v14 = vld [vmem:[%s902_s1 + $0x18] sm:$0xff]   ;;  %v743_v17 = vld [vmem:[%s902_s1 + $0x10] sm:$0xff]  }
  0x10   : > { %v738_v12 = vld [vmem:[%s902_s1 + $0xa0] sm:$0xff]   ;;  %v741_v15 = vld [vmem:[%s902_s1 + $0x98] sm:$0xff]   ;;  %v744_v18 = vld [vmem:[%s902_s1 + $0x90] sm:$0xff]  }
  0x11   : > { %668 = vmatpush3.bf16.msra.mxu0 %v731_v5  ;;  %v745_v19 = vld [vmem:[%s902_s1 + $0x48] sm:$0xff]   ;;  %v748_v22 = vld [vmem:[%s902_s1 + $0x40] sm:$0xff]  }
  0x12   : > { %699 = vmatpush3.bf16.msra.mxu1 %v732_v6  ;;  %669 = vmatprep.subr.bf16.mxu0 %v733_v7  ;;  %v746_v20 = vld [vmem:[%s902_s1 + $0x8] sm:$0xff]   ;;  %v753_v23 = vld [vmem:[%s207_s10 + $0x4] ss:$12 sps:$4 sm:$0xff]   ;;  %v633_v30 = vld [vmem:[%s903_s2] ss:$0 sm:$0xff] }
  0x13   : > { %700 = vmatprep.subr.bf16.mxu1 %v765_v1  ;;  %v747_v21 = vld [vmem:[%s902_s1 + $0x88] sm:$0xff]   ;;  %v749_v24 = vld [vmem:[%s902_s1] sm:$0xff]   ;;  %470 = vmatprep.mubr.bf16.mxu0 %v753_v23 }
  0x14   : > { %v750_v25 = vld [vmem:[%s902_s1 + $0x80] sm:$0xff]   ;;  %v754_v27 = vld [vmem:[%s207_s10 + $0x8] ss:$12 sps:$4 sm:$0xff]  }
  0x15   : > { %670 = vmatpush3.bf16.msra.mxu0 %v734_v8  ;;  %v751_v26 = vld [vmem:[%s207_s10] ss:$12 sps:$4 sm:$0xff]  }
  0x16   : > { %701 = vmatpush3.bf16.msra.mxu1 %v735_v9  ;;  %671 = vmatprep.subr.bf16.mxu0 %v736_v10  ;;  %v550_v5 = vld [vmem:[%s212_s26] sm:$0xff]  ;;  %v551_v6 = vld [vmem:[%s212_s26 + $0x8] sm:$0xff] }
  0x17   : > { %702 = vmatprep.subr.bf16.mxu1 %v765_v1 }
  0x19   : > { %672 = vmatpush3.bf16.msra.mxu0 %v737_v11 }
  0x1a   : > { %703 = vmatpush3.bf16.msra.mxu1 %v738_v12  ;;  %673 = vmatprep.subr.bf16.mxu0 %v739_v13 }
  0x1b   : > { %704 = vmatprep.subr.bf16.mxu1 %v765_v1 }
  0x1d   : > { %674 = vmatpush3.bf16.msra.mxu0 %v740_v14 }
  0x1e   : > { %705 = vmatpush3.bf16.msra.mxu1 %v741_v15  ;;  %675 = vmatprep.subr.bf16.mxu0 %v742_v16 }
  0x1f   : > { %706 = vmatprep.subr.bf16.mxu1 %v765_v1 }
  0x21   : > { %676 = vmatpush3.bf16.msra.mxu0 %v743_v17 }
  0x22   : > { %707 = vmatpush3.bf16.msra.mxu1 %v744_v18  ;;  %677 = vmatprep.subr.bf16.mxu0 %v745_v19 }
  0x23   : > { %708 = vmatprep.subr.bf16.mxu1 %v765_v1 }
  0x25   : > { %678 = vmatpush3.bf16.msra.mxu0 %v746_v20 }
  0x26   : > { %709 = vmatpush3.bf16.msra.mxu1 %v747_v21  ;;  %679 = vmatprep.subr.bf16.mxu0 %v748_v22 }
  0x27   : > { %710 = vmatprep.subr.bf16.mxu1 %v765_v1 }
  0x29   : > { %680 = vmatpush3.bf16.msra.mxu0 %v749_v24 }
  0x2a   : > { %711 = vmatpush3.bf16.msra.mxu1 %v750_v25 }
  0x2c   : > { %471 = vmatmul.mubr.bf16.vlgmr.msra.gmra.mxu0 %v751_v26 }
  0x2d   : > { %713 = vmatmul.mubr.bf16.vlgmr.msra.gmra.mxu1 %v754_v27 }
  0xec   : > { %v681_v28 = vpop.f32.mrf.mxu0 }
  0xed   : > { %v513_v29 = vpop.f32.mrf.mxu1 }
  0xee   : > { %v682_v31 = vpop.f32.mrf.mxu0 }
  0xef   : > { %v683_v32 = vadd.f32 %v682_v31, %v681_v28  ;;  %v714_v33 = vpop.f32.mrf.mxu1 }
  0xf0   : > { %v684_v34 = vpop.f32.mrf.mxu0 }
  0xf1   : > { %v473_v35 = vadd.f32 %v683_v32, %v633_v30  ;;  %v516_v36 = vpop.f32.mrf.mxu1 }
  0xf2   : > { %v685_v37 = vpop.f32.mrf.mxu0 }
  0xf3   : > { %v686_v38 = vadd.f32 %v685_v37, %v684_v34  ;;  %v715_v39 = vpop.f32.mrf.mxu1  ;;  %v514_v40 = vadd.f32 %v513_v29, %v473_v35 }
  0xf5   : > { %v476_v41 = vadd.f32 %v686_v38, %v633_v30  ;;  %v521_v43 = vsel %vm520_vm1, %v514_v40, 0.0 }
  0xf7   : > { %v517_v42 = vadd.f32 %v516_v36, %v476_v41 }
  0xf9   : > { %v522_v44 = vsel %vm520_vm1, %v517_v42, 0.0 }
  0xfa   : > { %v523_v45 = vadd.f32 %v522_v44, %v521_v43 }
  0xfc   : > { %v524_v46 = vrot.slane %v523_v45, 4 }
  0xfe   : > { %v525_v47 = vadd.f32 %v524_v46, %v523_v45 }
 0x100   : > { %v526_v48 = vrot.slane %v525_v47, 2 }
 0x102   : > { %v527_v49 = vadd.f32 %v526_v48, %v525_v47 }
 0x104   : > { %v528_v50 = vrot.slane %v527_v49, 1 }
 0x106   : > { %v529_v51 = vadd.f32 %v528_v50, %v527_v49 }
 0x108   : > { %v531_v52 = vmul.f32 0.0625, %v529_v51 }
 0x10a   : > { %v532_v53 = vsub.f32 %v514_v40, %v531_v52  ;;  %v533_v54 = vsub.f32 %v517_v42, %v531_v52 }
 0x10c   : > { %v534_v55 = vmul.f32 %v532_v53, %v532_v53  ;;  %v535_v56 = vmul.f32 %v533_v54, %v533_v54 }
 0x10e   : > { %v536_v57 = vsel %vm520_vm1, %v534_v55, 0.0  ;;  %v537_v58 = vsel %vm520_vm1, %v535_v56, 0.0 }
 0x10f   : > { %v538_v59 = vadd.f32 %v537_v58, %v536_v57 }
 0x111   : > { %v539_v60 = vrot.slane %v538_v59, 4 }
 0x113   : > { %v540_v61 = vadd.f32 %v539_v60, %v538_v59 }
 0x115   : > { %v541_v62 = vrot.slane %v540_v61, 2 }
 0x117   : > { %v542_v63 = vadd.f32 %v541_v62, %v540_v61 }
 0x119   : > { %v543_v0 = vrot.slane %v542_v63, 1 }
 0x11b   : > { %v544_v1 = vadd.f32 %v543_v0, %v542_v63 }
 0x11d   : > { %v545_v2 = vmul.f32 0.0625, %v544_v1 }
 0x11f   : > { %v546_v3 = vadd.f32 1e-05, %v545_v2 }
 0x121   : > { %755 = vrsqrt.f32 %v546_v3 }
 0x12e   : > { %v756_v4 = vpop.eup %755 }
 0x12f   : > { %v548_v7 = vmul.f32 %v756_v4, %v532_v53  ;;  %v549_v8 = vmul.f32 %v756_v4, %v533_v54 }
 0x131   : > { %v552_v9 = vadd.f32 %v550_v5, %v548_v7  ;;  %v553_v10 = vadd.f32 %v551_v6, %v549_v8 }
 0x133   : > { %554 = vst.msk [vmem:[%s217_s29] sm:$0xff] %vm520_vm1, %v552_v9  ;;  %555 = vst.msk [vmem:[%s217_s29 + $0x8] sm:$0xff] %vm520_vm1, %v553_v10 }
 0x134 PF: > { %s14_s15 = sadd.s32 1, %s763_s15  }
 0x135   : > { %p11_p4 = scmp.ge.s32.totalorder %s14_s15, 4  }
 0x137   :  { %13 = sbr.rel (!%p11_p4) target bundleno = 1 (0x1), region = 69 }

// kernel: spec_forward.13
= control target key start
LH: loop header
LB: loop body
LE: loop exit
PB: predicated region body
PF: predicated region fallthrough
CT: control target
= control target key end

     0   :  { %s723_s12 = smov 0   ;;  %s829_s0 = inlined_call_operand.vmem [shape: bf16[2,16,384], index: 0, kind: input, shape index: {}]   ;;  %s830_s1 = inlined_call_operand.vmem [shape: bf16[384,32], index: 1, kind: input, shape index: {}]   ;;  %s831_s2 = inlined_call_operand.vmem [shape: f32[1,32], index: 2, kind: input, shape index: {}]   ;;  %s832_s3 = inlined_call_operand.vmem [shape: f32[2,16,32], index: 3, kind: output, shape index: {}]  }
   0x1 LB: > { %s562_s13 = sadd.s32 4294967295, %s699_s12   ;;  %p566_p0 = scmp.ge.s32.totalorder %s699_s12, 1  ;;  %s699_s12 = sphi %s723_s12, %s13_s12  }
   0x2   : > { %p137_p1 = scmp.lt.s32.totalorder %s699_s12, 3 }
   0x4   : > { %p138_p2 = pnand %p566_p0, %p137_p1 }
   0x5   : > { %p161_p3 = scmp.lt.s32.totalorder (!%p138_p2), %s562_s13, 1 }
   0x6   : > { %141 = sbr.rel (%p138_p2) target bundleno = 308 (0x134), region = 32 }
   0xb   : > { %v663_v0 = vld [vmem:[%s830_s1 + $0x78] sm:$0xff]   ;;  %v701_v1 = vmov 0.0   ;;  %v666_v4 = vld [vmem:[%s830_s1 + $0x70] sm:$0xff]   ;;  %vm702_vm0 = vmmov 0   ;;  %v669_v7 = vld [vmem:[%s830_s1 + $0x68] sm:$0xff]   ;;  %s834_s13 = smov (!%p161_p3, %s562_s13), 1 }
   0xc   : > { %632 = vmatprep.subr.bf16.mxu1 %v701_v1  ;;  %v664_v2 = vld [vmem:[%s830_s1 + $0x38] sm:$0xff]   ;;  %601 = vmatprep.subr.bf16.mxu0 %v663_v0  ;;  %v667_v5 = vld [vmem:[%s830_s1 + $0x30] sm:$0xff]   ;;  %v670_v8 = vld [vmem:[%s830_s1 + $0x28] sm:$0xff]   ;;  %s652_s23 = smul.u32 24, %s834_s13  ;;  %vm473_vm1 = vcmask 261120   ;;  %s600_s18 = sshll.u32 %s834_s13, 4 }
   0xd   : > { %v665_v3 = vld [vmem:[%s830_s1 + $0xb8] sm:$0xff]   ;;  %602 = vmatpush3.bf16.msra.mxu0 %v664_v2  ;;  %648 = vmatprep.mubr.msk.bf16.mxu1 %vm702_vm0, %v701_v1  ;;  %v668_v6 = vld [vmem:[%s830_s1 + $0xb0] sm:$0xff]   ;;  %v671_v9 = vld [vmem:[%s830_s1 + $0xa8] sm:$0xff]   ;;  %s170_s21 = scalar_lea.vmem %s832_s3, %s600_s18 }
   0xe   : > { %633 = vmatpush3.bf16.msra.mxu1 %v665_v3  ;;  %603 = vmatprep.subr.bf16.mxu0 %v666_v4  ;;  %v672_v10 = vld [vmem:[%s830_s1 + $0x60] sm:$0xff]   ;;  %v675_v13 = vld [vmem:[%s830_s1 + $0x58] sm:$0xff]   ;;  %v678_v16 = vld [vmem:[%s830_s1 + $0x50] sm:$0xff]   ;;  %s165_s5 = scalar_lea.vmem %s829_s0, %s652_s23 }
   0xf   : > { %634 = vmatprep.subr.bf16.mxu1 %v701_v1  ;;  %v673_v11 = vld [vmem:[%s830_s1 + $0x20] sm:$0xff]   ;;  %v676_v14 = vld [vmem:[%s830_s1 + $0x18] sm:$0xff]   ;;  %v679_v17 = vld [vmem:[%s830_s1 + $0x10] sm:$0xff]  }
  0x10   : > { %v674_v12 = vld [vmem:[%s830_s1 + $0xa0] sm:$0xff]   ;;  %v677_v15 = vld [vmem:[%s830_s1 + $0x98] sm:$0xff]   ;;  %v680_v18 = vld [vmem:[%s830_s1 + $0x90] sm:$0xff]  }
  0x11   : > { %604 = vmatpush3.bf16.msra.mxu0 %v667_v5  ;;  %v681_v19 = vld [vmem:[%s830_s1 + $0x48] sm:$0xff]   ;;  %v684_v22 = vld [vmem:[%s830_s1 + $0x40] sm:$0xff]  }
  0x12   : > { %635 = vmatpush3.bf16.msra.mxu1 %v668_v6  ;;  %605 = vmatprep.subr.bf16.mxu0 %v669_v7  ;;  %v682_v20 = vld [vmem:[%s830_s1 + $0x8] sm:$0xff]   ;;  %v689_v23 = vld [vmem:[%s165_s5 + $0x4] ss:$12 sps:$4 sm:$0xff]   ;;  %v570_v30 = vld [vmem:[%s831_s2] ss:$0 sm:$0xff] }
  0x13   : > { %636 = vmatprep.subr.bf16.mxu1 %v701_v1  ;;  %v683_v21 = vld [vmem:[%s830_s1 + $0x88] sm:$0xff]   ;;  %v685_v24 = vld [vmem:[%s830_s1] sm:$0xff]   ;;  %423 = vmatprep.mubr.bf16.mxu0 %v689_v23 }
  0x14   : > { %v686_v25 = vld [vmem:[%s830_s1 + $0x80] sm:$0xff]   ;;  %v690_v27 = vld [vmem:[%s165_s5 + $0x8] ss:$12 sps:$4 sm:$0xff]  }
  0x15   : > { %606 = vmatpush3.bf16.msra.mxu0 %v670_v8  ;;  %v687_v26 = vld [vmem:[%s165_s5] ss:$12 sps:$4 sm:$0xff]  }
  0x16   : > { %637 = vmatpush3.bf16.msra.mxu1 %v671_v9  ;;  %607 = vmatprep.subr.bf16.mxu0 %v672_v10 }
  0x17   : > { %638 = vmatprep.subr.bf16.mxu1 %v701_v1 }
  0x19   : > { %608 = vmatpush3.bf16.msra.mxu0 %v673_v11 }
  0x1a   : > { %639 = vmatpush3.bf16.msra.mxu1 %v674_v12  ;;  %609 = vmatprep.subr.bf16.mxu0 %v675_v13 }
  0x1b   : > { %640 = vmatprep.subr.bf16.mxu1 %v701_v1 }
  0x1d   : > { %610 = vmatpush3.bf16.msra.mxu0 %v676_v14 }
  0x1e   : > { %641 = vmatpush3.bf16.msra.mxu1 %v677_v15  ;;  %611 = vmatprep.subr.bf16.mxu0 %v678_v16 }
  0x1f   : > { %642 = vmatprep.subr.bf16.mxu1 %v701_v1 }
  0x21   : > { %612 = vmatpush3.bf16.msra.mxu0 %v679_v17 }
  0x22   : > { %643 = vmatpush3.bf16.msra.mxu1 %v680_v18  ;;  %613 = vmatprep.subr.bf16.mxu0 %v681_v19 }
  0x23   : > { %644 = vmatprep.subr.bf16.mxu1 %v701_v1 }
  0x25   : > { %614 = vmatpush3.bf16.msra.mxu0 %v682_v20 }
  0x26   : > { %645 = vmatpush3.bf16.msra.mxu1 %v683_v21  ;;  %615 = vmatprep.subr.bf16.mxu0 %v684_v22 }
  0x27   : > { %646 = vmatprep.subr.bf16.mxu1 %v701_v1 }
  0x29   : > { %616 = vmatpush3.bf16.msra.mxu0 %v685_v24 }
  0x2a   : > { %647 = vmatpush3.bf16.msra.mxu1 %v686_v25 }
  0x2c   : > { %424 = vmatmul.mubr.bf16.vlgmr.msra.gmra.mxu0 %v687_v26 }
  0x2d   : > { %649 = vmatmul.mubr.bf16.vlgmr.msra.gmra.mxu1 %v690_v27 }
  0xec   : > { %v617_v28 = vpop.f32.mrf.mxu0 }
  0xed   : > { %v466_v29 = vpop.f32.mrf.mxu1 }
  0xee   : > { %v618_v31 = vpop.f32.mrf.mxu0 }
  0xef   : > { %v619_v32 = vadd.f32 %v618_v31, %v617_v28  ;;  %v650_v33 = vpop.f32.mrf.mxu1 }
  0xf0   : > { %v620_v34 = vpop.f32.mrf.mxu0 }
  0xf1   : > { %v426_v35 = vadd.f32 %v619_v32, %v570_v30  ;;  %v469_v36 = vpop.f32.mrf.mxu1 }
  0xf2   : > { %v621_v37 = vpop.f32.mrf.mxu0 }
  0xf3   : > { %v622_v38 = vadd.f32 %v621_v37, %v620_v34  ;;  %v651_v39 = vpop.f32.mrf.mxu1  ;;  %v467_v40 = vadd.f32 %v466_v29, %v426_v35 }
  0xf5   : > { %v429_v41 = vadd.f32 %v622_v38, %v570_v30  ;;  %v474_v43 = vsel %vm473_vm1, %v467_v40, 0.0 }
  0xf7   : > { %v470_v42 = vadd.f32 %v469_v36, %v429_v41 }
  0xf9   : > { %v475_v44 = vsel %vm473_vm1, %v470_v42, 0.0 }
  0xfa   : > { %v476_v45 = vadd.f32 %v475_v44, %v474_v43 }
  0xfc   : > { %v477_v46 = vrot.slane %v476_v45, 4 }
  0xfe   : > { %v478_v47 = vadd.f32 %v477_v46, %v476_v45 }
 0x100   : > { %v479_v48 = vrot.slane %v478_v47, 2 }
 0x102   : > { %v480_v49 = vadd.f32 %v479_v48, %v478_v47 }
 0x104   : > { %v481_v50 = vrot.slane %v480_v49, 1 }
 0x106   : > { %v482_v51 = vadd.f32 %v481_v50, %v480_v49 }
 0x108   : > { %v484_v52 = vmul.f32 0.0625, %v482_v51 }
 0x10a   : > { %v485_v53 = vsub.f32 %v467_v40, %v484_v52  ;;  %v486_v54 = vsub.f32 %v470_v42, %v484_v52 }
 0x10c   : > { %v487_v55 = vmul.f32 %v485_v53, %v485_v53  ;;  %v488_v56 = vmul.f32 %v486_v54, %v486_v54 }
 0x10e   : > { %v489_v57 = vsel %vm473_vm1, %v487_v55, 0.0  ;;  %v490_v58 = vsel %vm473_vm1, %v488_v56, 0.0 }
 0x10f   : > { %v491_v59 = vadd.f32 %v490_v58, %v489_v57 }
 0x111   : > { %v492_v60 = vrot.slane %v491_v59, 4 }
 0x113   : > { %v493_v61 = vadd.f32 %v492_v60, %v491_v59 }
 0x115   : > { %v494_v62 = vrot.slane %v493_v61, 2 }
 0x117   : > { %v495_v63 = vadd.f32 %v494_v62, %v493_v61 }
 0x119   : > { %v496_v0 = vrot.slane %v495_v63, 1 }
 0x11b   : > { %v497_v1 = vadd.f32 %v496_v0, %v495_v63 }
 0x11d   : > { %v498_v2 = vmul.f32 0.0625, %v497_v1 }
 0x11f   : > { %v499_v3 = vadd.f32 1e-05, %v498_v2 }
 0x121   : > { %691 = vrsqrt.f32 %v499_v3 }
 0x12e   : > { %v692_v4 = vpop.eup %691 }
 0x12f   : > { %v501_v5 = vmul.f32 %v692_v4, %v485_v53  ;;  %v502_v6 = vmul.f32 %v692_v4, %v486_v54 }
 0x131   : > { %v503_v7 = vmax.f32 %v501_v5, 0.0  ;;  %v504_v8 = vmax.f32 %v502_v6, 0.0 }
 0x133   : > { %505 = vst.msk [vmem:[%s170_s21] sm:$0xff] %vm473_vm1, %v503_v7  ;;  %506 = vst.msk [vmem:[%s170_s21 + $0x8] sm:$0xff] %vm473_vm1, %v504_v8 }
 0x134 PF: > { %s13_s12 = sadd.s32 1, %s699_s12  }
 0x135   : > { %p10_p4 = scmp.ge.s32.totalorder %s13_s12, 4  }
 0x137   :  { %12 = sbr.rel (!%p10_p4) target bundleno = 1 (0x1), region = 62 }

// kernel: spec_forward.17
= control target key start
LH: loop header
LB: loop body
LE: loop exit
PB: predicated region body
PF: predicated region fallthrough
CT: control target
= control target key end

     0   :  { %s622_s12 = smov 0   ;;  %s735_s0 = inlined_call_operand.vmem [shape: bf16[2,16,128], index: 0, kind: input, shape index: {}]   ;;  %s736_s1 = inlined_call_operand.vmem [shape: bf16[128,64], index: 1, kind: input, shape index: {}]   ;;  %s737_s2 = inlined_call_operand.vmem [shape: f32[1,64], index: 2, kind: input, shape index: {}]   ;;  %s738_s3 = inlined_call_operand.vmem [shape: f32[2,16,64], index: 3, kind: output, shape index: {}]  }
   0x1 LB: > { %s507_s13 = sadd.s32 4294967295, %s592_s12   ;;  %p511_p0 = scmp.ge.s32.totalorder %s592_s12, 1  ;;  %s592_s12 = sphi %s622_s12, %s13_s12  }
   0x2   : > { %p137_p1 = scmp.lt.s32.totalorder %s592_s12, 3 }
   0x4   : > { %p138_p2 = pnand %p511_p0, %p137_p1 }
   0x5   : > { %p161_p3 = scmp.lt.s32.totalorder (!%p138_p2), %s507_s13, 1  ;;  %s596_s9 = smov (!%p138_p2), 80  }
   0x6   : > { %141 = sbr.rel (%p138_p2) target bundleno = 790 (0x316), region = 32  ;;  %s597_s10 = smov (!%p138_p2), 112  }
   0x7   : > { %s598_s11 = smov (!%p138_p2), 96   ;;  %s599_s14 = smov (!%p138_p2), 32  }
   0x8   : > { %s600_s15 = smov (!%p138_p2), 16   ;;  %s601_s16 = smov (!%p138_p2), 48  }
   0xb   : > { %v575_v0 = vld [vmem:[%s736_s1 + $0x38] sm:$0xff]   ;;  %v594_v1 = vmov 0.0   ;;  %v576_v2 = vld [vmem:[%s736_s1 + $0x30] sm:$0xff]   ;;  %vm595_vm0 = vmmov 0   ;;  %s740_s13 = smov (!%p161_p3, %s507_s13), 1  ;;  %v577_v3 = vld [vmem:[%s736_s1 + $0x28] sm:$0xff]   ;;  %v365_v60 = vlaneseq }
   0xc   : > { %539 = vmatprep.subr.bf16.mxu0 %v594_v1  ;;  %555 = vmatprep.mubr.msk.bf16.mxu0 %vm595_vm0, %v594_v1  ;;  %s528_s20 = sshll.u32 %s740_s13, 3  ;;  %v578_v4 = vld [vmem:[%s736_s1 + $0x20] sm:$0xff]   ;;  %v579_v5 = vld [vmem:[%s736_s1 + $0x18] sm:$0xff]   ;;  %v580_v6 = vld [vmem:[%s736_s1 + $0x10] sm:$0xff]   ;;  %vm333_vm1 = vcmask 523648   ;;  %vm303_vm2 = vcmask 261248  }
   0xd   : > { %540 = vmatpush3.bf16.msra.mxu0 %v575_v0  ;;  %s165_s23 = scalar_lea.vmem %s735_s0, %s528_s20  ;;  %v581_v7 = vld [vmem:[%s736_s1 + $0x8] sm:$0xff]   ;;  %v582_v8 = vld [vmem:[%s736_s1] sm:$0xff]   ;;  %vm318_vm3 = vcmask 392448   ;;  %vm292_vm4 = vcmask 130048   ;;  %v689_v61 = vshrl.u32 %v365_v60, 7  ;;  %vm361_vm5 = vcmask 261120  }
   0xe   : > { %541 = vmatprep.subr.bf16.mxu0 %v594_v1  ;;  %v583_v9 = vld [vmem:[%s165_s23] sm:$0xff]   ;;  %vm363_vm6 = vcmask 392192   ;;  %s529_s17 = sshll.u32 %s740_s13, 4  ;;  %vm449_vm7 = vcmask 523264  }
   0xf   : > { %v516_v10 = vld [vmem:[%s737_s2] ss:$0 sm:$0xff]  ;;  %s170_s20 = scalar_lea.vmem %s738_s3, %s529_s17 }
  0x11   : > { %542 = vmatpush3.bf16.msra.mxu0 %v576_v2 }
  0x12   : > { %543 = vmatprep.subr.bf16.mxu0 %v594_v1 }
  0x15   : > { %544 = vmatpush3.bf16.msra.mxu0 %v577_v3 }
  0x16   : > { %545 = vmatprep.subr.bf16.mxu0 %v594_v1 }
  0x19   : > { %546 = vmatpush3.bf16.msra.mxu0 %v578_v4 }
  0x1a   : > { %547 = vmatprep.subr.bf16.mxu0 %v594_v1 }
  0x1d   : > { %548 = vmatpush3.bf16.msra.mxu0 %v579_v5 }
  0x1e   : > { %549 = vmatprep.subr.bf16.mxu0 %v594_v1 }
  0x21   : > { %550 = vmatpush3.bf16.msra.mxu0 %v580_v6 }
  0x22   : > { %551 = vmatprep.subr.bf16.mxu0 %v594_v1 }
  0x25   : > { %552 = vmatpush3.bf16.msra.mxu0 %v581_v7 }
  0x26   : > { %553 = vmatprep.subr.bf16.mxu0 %v594_v1  ;;  %v367_v1 = vsub.s32 0, %v689_v61 }
  0x29   : > { %554 = vmatpush3.bf16.msra.mxu0 %v582_v8 }
  0x2c   : > { %556 = vmatmul.mubr.bf16.vlgmr.msra.gmra.mxu0 %v583_v9 }
  0xec   : > { %v285_v11 = vpop.f32.mrf.mxu0 }
  0xed   : > { %v663_v12 = vadd.f32 %v516_v10, %v285_v11 }
  0xee   : > { %v557_v13 = vpop.f32.mrf.mxu0 }
  0xef   : > { %v334_v17 = vsel %vm333_vm1, %v663_v12, 0.0  ;;  %v304_v18 = vsel %vm303_vm2, %v663_v12, 0.0  ;;  %v319_v21 = vsel %vm318_vm3, %v663_v12, 0.0  ;;  %v293_v45 = vsel %vm292_vm4, %v663_v12, 0.0 }
  0xf0   : > { %v288_v14 = vpop.f32.mrf.mxu0 }
  0xf1   : > { %v665_v15 = vadd.f32 %v516_v10, %v288_v14 }
  0xf2   : > { %v558_v16 = vpop.f32.mrf.mxu0 }
  0xf3   : > { %v335_v19 = vsel %vm333_vm1, %v665_v15, 0.0  ;;  %v305_v20 = vsel %vm303_vm2, %v665_v15, 0.0  ;;  %v320_v22 = vsel %vm318_vm3, %v665_v15, 0.0  ;;  %v294_v44 = vsel %vm292_vm4, %v665_v15, 0.0 }
  0xf4   : > { %v336_v23 = vadd.f32 %v335_v19, %v334_v17  ;;  %v306_v24 = vadd.f32 %v305_v20, %v304_v18  ;;  %v321_v25 = vadd.f32 %v320_v22, %v319_v21  ;;  %v295_v46 = vadd.f32 %v294_v44, %v293_v45 }
  0xf6   : > { %v337_v26 = vrot.slane %v336_v23, 4  ;;  %v307_v27 = vrot.slane %v306_v24, 4  ;;  %v322_v28 = vrot.slane %v321_v25, 4  ;;  %v296_v47 = vrot.slane %v295_v46, 4 }
  0xf8   : > { %v338_v29 = vadd.f32 %v337_v26, %v336_v23  ;;  %v308_v30 = vadd.f32 %v307_v27, %v306_v24  ;;  %v323_v31 = vadd.f32 %v322_v28, %v321_v25  ;;  %v297_v48 = vadd.f32 %v296_v47, %v295_v46 }
  0xfa   : > { %v339_v32 = vrot.slane %v338_v29, 2  ;;  %v309_v33 = vrot.slane %v308_v30, 2  ;;  %v324_v34 = vrot.slane %v323_v31, 2  ;;  %v298_v49 = vrot.slane %v297_v48, 2 }
  0xfc   : > { %v340_v35 = vadd.f32 %v339_v32, %v338_v29  ;;  %v310_v36 = vadd.f32 %v309_v33, %v308_v30  ;;  %v325_v37 = vadd.f32 %v324_v34, %v323_v31  ;;  %v299_v50 = vadd.f32 %v298_v49, %v297_v48 }
  0xfe   : > { %v341_v38 = vrot.slane %v340_v35, 1  ;;  %v311_v39 = vrot.slane %v310_v36, 1  ;;  %v326_v42 = vrot.slane %v325_v37, 1  ;;  %v300_v51 = vrot.slane %v299_v50, 1 }
 0x100   : > { %v342_v40 = vadd.f32 %v341_v38, %v340_v35  ;;  %v312_v41 = vadd.f32 %v311_v39, %v310_v36  ;;  %v327_v43 = vadd.f32 %v326_v42, %v325_v37  ;;  %v301_v53 = vadd.f32 %v300_v51, %v299_v50 }
 0x102   : > { %344 = vrot.lane.b32.xlu1 %v342_v40, %s596_s9  ;;  %314 = vrot.lane.b32.xlu0 %v312_v41, %s597_s10 }
 0x106   : > { %329 = vrot.lane.b32.xlu0 %v327_v43, %s598_s11 }
 0x174   : > { %v315_v52 = vpop.permute.xlu0 %314  ;;  %v345_v57 = vpop.permute.xlu1 %344 }
 0x175   : > { %v317_v54 = vadd.f32 %v315_v52, %v301_v53 }
 0x178   : > { %v330_v55 = vpop.permute.xlu0 %329 }
 0x179   : > { %v332_v56 = vadd.f32 %v330_v55, %v317_v54 }
 0x17b   : > { %v347_v58 = vadd.f32 %v345_v57, %v332_v56 }
 0x17d   : > { %v349_v59 = vmul.f32 0.015625, %v347_v58 }
 0x17f   : > { %354 = vrot.lane.b32.xlu0 %v349_v59, %s599_s14  ;;  %351 = vrot.lane.b32.xlu1 %v349_v59, %s600_s15 }
 0x183   : > { %357 = vrot.lane.b32.xlu1 %v349_v59, %s601_s16 }
 0x1f1   : > { %v352_v62 = vpop.permute.xlu1 %351  ;;  %v355_v63 = vpop.permute.xlu0 %354 }
 0x1f2   : > { %v360_v0 = vsel %vm292_vm4, %v349_v59, %v352_v62 }
 0x1f3   : > { %v362_v2 = vsel %vm361_vm5, %v360_v0, %v355_v63 }
 0x1f5   : > { %v358_v3 = vpop.permute.xlu1 %357 }
 0x1f6   : > { %v364_v4 = vsel %vm363_vm6, %v362_v2, %v358_v3 }
 0x1f7   : > { %v368_v5 = vrot.slane %v364_v4, %v367_v1 }
 0x1f9   : > { %v698_v6 = vsub.f32 %v663_v12, %v368_v5  ;;  %v701_v7 = vsub.f32 %v665_v15, %v368_v5 }
 0x1fb   : > { %v371_v8 = vmul.f32 %v698_v6, %v698_v6  ;;  %v372_v9 = vmul.f32 %v701_v7, %v701_v7 }
 0x1fd   : > { %v397_v10 = vsel %vm318_vm3, %v371_v8, 0.0  ;;  %v398_v11 = vsel %vm318_vm3, %v372_v9, 0.0  ;;  %v383_v13 = vsel %vm303_vm2, %v371_v8, 0.0  ;;  %v384_v14 = vsel %vm303_vm2, %v372_v9, 0.0 }
 0x1fe   : > { %v399_v16 = vadd.f32 %v398_v11, %v397_v10  ;;  %v385_v12 = vadd.f32 %v384_v14, %v383_v13  ;;  %v411_v17 = vsel %vm333_vm1, %v371_v8, 0.0  ;;  %v412_v15 = vsel %vm333_vm1, %v372_v9, 0.0 }
 0x1ff   : > { %v413_v18 = vadd.f32 %v412_v15, %v411_v17  ;;  %v374_v19 = vsel %vm292_vm4, %v372_v9, 0.0  ;;  %v373_v20 = vsel %vm292_vm4, %v371_v8, 0.0 }
 0x200   : > { %v400_v21 = vrot.slane %v399_v16, 4  ;;  %v386_v22 = vrot.slane %v385_v12, 4  ;;  %v375_v23 = vadd.f32 %v374_v19, %v373_v20 }
 0x201   : > { %v414_v24 = vrot.slane %v413_v18, 4 }
 0x202   : > { %v401_v25 = vadd.f32 %v400_v21, %v399_v16  ;;  %v387_v26 = vadd.f32 %v386_v22, %v385_v12  ;;  %v376_v40 = vrot.slane %v375_v23, 4 }
 0x203   : > { %v415_v27 = vadd.f32 %v414_v24, %v413_v18 }
 0x204   : > { %v402_v28 = vrot.slane %v401_v25, 2  ;;  %v388_v29 = vrot.slane %v387_v26, 2  ;;  %v377_v41 = vadd.f32 %v376_v40, %v375_v23 }
 0x205   : > { %v416_v30 = vrot.slane %v415_v27, 2 }
 0x206   : > { %v403_v31 = vadd.f32 %v402_v28, %v401_v25  ;;  %v389_v32 = vadd.f32 %v388_v29, %v387_v26  ;;  %v378_v42 = vrot.slane %v377_v41, 2 }
 0x207   : > { %v417_v33 = vadd.f32 %v416_v30, %v415_v27 }
 0x208   : > { %v404_v34 = vrot.slane %v403_v31, 1  ;;  %v390_v35 = vrot.slane %v389_v32, 1  ;;  %v379_v43 = vadd.f32 %v378_v42, %v377_v41 }
 0x209   : > { %v418_v38 = vrot.slane %v417_v33, 1 }
 0x20a   : > { %v405_v36 = vadd.f32 %v404_v34, %v403_v31  ;;  %v391_v37 = vadd.f32 %v390_v35, %v389_v32  ;;  %v380_v44 = vrot.slane %v379_v43, 1 }
 0x20b   : > { %v419_v39 = vadd.f32 %v418_v38, %v417_v33 }
 0x20c   : > { %407 = vrot.lane.b32.xlu1 %v405_v36, %s598_s11  ;;  %393 = vrot.lane.b32.xlu0 %v391_v37, %s597_s10  ;;  %v381_v45 = vadd.f32 %v380_v44, %v379_v43 }
 0x210   : > { %421 = vrot.lane.b32.xlu0 %v419_v39, %s596_s9 }
 0x27e   : > { %v394_v46 = vpop.permute.xlu0 %393  ;;  %v408_v48 = vpop.permute.xlu1 %407 }
 0x27f   : > { %v396_v47 = vadd.f32 %v394_v46, %v381_v45 }
 0x281   : > { %v410_v49 = vadd.f32 %v408_v48, %v396_v47 }
 0x282   : > { %v422_v50 = vpop.permute.xlu0 %421 }
 0x283   : > { %v424_v51 = vadd.f32 %v422_v50, %v410_v49 }
 0x285   : > { %v425_v52 = vmul.f32 0.015625, %v424_v51 }
 0x287   : > { %v426_v53 = vadd.f32 1e-05, %v425_v52 }
 0x289   : > { %584 = vrsqrt.f32 %v426_v53 }
 0x296   : > { %v585_v54 = vpop.eup %584 }
 0x297   : > { %432 = vrot.lane.b32.xlu0 %v585_v54, %s599_s14  ;;  %429 = vrot.lane.b32.xlu1 %v585_v54, %s600_s15 }
 0x29b   : > { %435 = vrot.lane.b32.xlu1 %v585_v54, %s601_s16 }
 0x309   : > { %v430_v55 = vpop.permute.xlu1 %429  ;;  %v433_v56 = vpop.permute.xlu0 %432 }
 0x30a   : > { %v438_v57 = vsel %vm292_vm4, %v585_v54, %v430_v55 }
 0x30b   : > { %v439_v58 = vsel %vm361_vm5, %v438_v57, %v433_v56 }
 0x30d   : > { %v436_v59 = vpop.permute.xlu1 %435 }
 0x30e   : > { %v440_v60 = vsel %vm363_vm6, %v439_v58, %v436_v59 }
 0x30f   : > { %v444_v62 = vrot.slane %v440_v60, %v367_v1 }
 0x311   : > { %v445_v63 = vmul.f32 %v444_v62, %v698_v6  ;;  %v446_v0 = vmul.f32 %v444_v62, %v701_v7 }
 0x313   : > { %v447_v2 = vmax.f32 %v445_v63, 0.0  ;;  %v448_v3 = vmax.f32 %v446_v0, 0.0 }
 0x315   : > { %450 = vst.msk [vmem:[%s170_s20] sm:$0xff] %vm449_vm7, %v447_v2  ;;  %451 = vst.msk [vmem:[%s170_s20 + $0x8] sm:$0xff] %vm449_vm7, %v448_v3 }
 0x316 PF: > { %s13_s12 = sadd.s32 1, %s592_s12  }
 0x317   : > { %p10_p4 = scmp.ge.s32.totalorder %s13_s12, 4  }
 0x319   :  { %12 = sbr.rel (!%p10_p4) target bundleno = 1 (0x1), region = 62 }

// kernel: spec_forward.18
= control target key start
LH: loop header
LB: loop body
LE: loop exit
PB: predicated region body
PF: predicated region fallthrough
CT: control target
= control target key end

     0   :  { %s821_s12 = smov 0   ;;  %s1068_s0 = inlined_call_operand.vmem [shape: bf16[2,64,128], index: 0, kind: input, shape index: {}]   ;;  %s1069_s1 = inlined_call_operand.vmem [shape: bf16[128,32], index: 1, kind: input, shape index: {}]   ;;  %s1070_s2 = inlined_call_operand.vmem [shape: f32[1,32], index: 2, kind: input, shape index: {}]   ;;  %s1071_s3 = inlined_call_operand.vmem [shape: f32[2,64,32], index: 3, kind: output, shape index: {}]  }
   0x1 LB: > { %s681_s13 = sadd.s32 4294967295, %s793_s12   ;;  %p685_p0 = scmp.ge.s32.totalorder %s793_s12, 1  ;;  %s793_s12 = sphi %s821_s12, %s13_s12  }
   0x2   : > { %p137_p1 = scmp.lt.s32.totalorder %s793_s12, 3 }
   0x4   : > { %p138_p2 = pnand %p685_p0, %p137_p1 }
   0x5   : > { %p161_p3 = scmp.lt.s32.totalorder (!%p138_p2), %s681_s13, 1  ;;  %s795_s9 = smov (!%p138_p2), 104  }
   0x6   : > { %141 = sbr.rel (%p138_p2) target bundleno = 820 (0x334), region = 32  ;;  %s796_s10 = smov (!%p138_p2), 120  }
   0x7   : > { %s797_s11 = smov (!%p138_p2), 112   ;;  %s798_s14 = smov (!%p138_p2), 16  }
   0x8   : > { %s799_s15 = smov (!%p138_p2), 8   ;;  %s800_s16 = smov (!%p138_p2), 24  }
   0xb   : > { %v773_v0 = vld [vmem:[%s1069_s1 + $0x38] sm:$0xff]   ;;  %v774_v1 = vld [vmem:[%s1069_s1 + $0x30] sm:$0xff]   ;;  %s1073_s13 = smov (!%p161_p3, %s681_s13), 1  ;;  %v775_v2 = vld [vmem:[%s1069_s1 + $0x28] sm:$0xff]   ;;  %vm363_vm0 = vcmask 130112   ;;  %vm390_vm1 = vcmask 195712  }
   0xc   : > { %719 = vmatprep.subr.bf16.mxu0 %v773_v0  ;;  %743 = vmatprep.subr.bf16.mxu1 %v773_v0  ;;  %s705_s20 = sshll.u32 %s1073_s13, 5  ;;  %v776_v3 = vld [vmem:[%s1069_s1 + $0x20] sm:$0xff]   ;;  %v777_v6 = vld [vmem:[%s1069_s1 + $0x18] sm:$0xff]   ;;  %v778_v7 = vld [vmem:[%s1069_s1 + $0x10] sm:$0xff]   ;;  %vm417_vm2 = vcmask 261312   ;;  %vm340_vm3 = vcmask 64512  }
   0xd   : > { %720 = vmatpush3.bf16.msra.mxu0 %v773_v0  ;;  %751 = vmatpush3.bf16.msra.mxu1 %v773_v0  ;;  %s844_s23 = scalar_lea.vmem %s1068_s0, %s705_s20  ;;  %v779_v8 = vld [vmem:[%s1069_s1 + $0x8] sm:$0xff]   ;;  %v780_v9 = vld [vmem:[%s1069_s1] sm:$0xff]   ;;  %vm457_vm4 = vcmask 130048   ;;  %vm459_vm5 = vcmask 195584   ;;  %s706_s17 = sshll.u32 %s1073_s13, 6  ;;  %vm617_vm6 = vcmask 261120  }
   0xe   : > { %721 = vmatprep.subr.bf16.mxu0 %v774_v1  ;;  %744 = vmatprep.subr.bf16.mxu1 %v774_v1  ;;  %v781_v4 = vld [vmem:[%s844_s23] sm:$0xff]   ;;  %v783_v5 = vld [vmem:[%s844_s23 + $0x10] sm:$0xff]   ;;  %v782_v10 = vld [vmem:[%s844_s23 + $0x8] sm:$0xff]   ;;  %s170_s20 = scalar_lea.vmem %s1071_s3, %s706_s17 }
   0xf   : > { %735 = vmatprep.mubr.bf16.mxu0 %v781_v4  ;;  %739 = vmatprep.mubr.bf16.mxu1 %v783_v5  ;;  %v784_v11 = vld [vmem:[%s844_s23 + $0x18] sm:$0xff]   ;;  %v690_v17 = vld [vmem:[%s1070_s2] ss:$0 sm:$0xff] }
  0x11   : > { %722 = vmatpush3.bf16.msra.mxu0 %v774_v1  ;;  %752 = vmatpush3.bf16.msra.mxu1 %v774_v1 }
  0x12   : > { %723 = vmatprep.subr.bf16.mxu0 %v775_v2  ;;  %745 = vmatprep.subr.bf16.mxu1 %v775_v2 }
  0x15   : > { %724 = vmatpush3.bf16.msra.mxu0 %v775_v2  ;;  %753 = vmatpush3.bf16.msra.mxu1 %v775_v2 }
  0x16   : > { %725 = vmatprep.subr.bf16.mxu0 %v776_v3  ;;  %746 = vmatprep.subr.bf16.mxu1 %v776_v3 }
  0x19   : > { %726 = vmatpush3.bf16.msra.mxu0 %v776_v3  ;;  %754 = vmatpush3.bf16.msra.mxu1 %v776_v3 }
  0x1a   : > { %727 = vmatprep.subr.bf16.mxu0 %v777_v6  ;;  %747 = vmatprep.subr.bf16.mxu1 %v777_v6 }
  0x1d   : > { %728 = vmatpush3.bf16.msra.mxu0 %v777_v6  ;;  %755 = vmatpush3.bf16.msra.mxu1 %v777_v6 }
  0x1e   : > { %729 = vmatprep.subr.bf16.mxu0 %v778_v7  ;;  %748 = vmatprep.subr.bf16.mxu1 %v778_v7 }
  0x21   : > { %730 = vmatpush3.bf16.msra.mxu0 %v778_v7  ;;  %756 = vmatpush3.bf16.msra.mxu1 %v778_v7 }
  0x22   : > { %731 = vmatprep.subr.bf16.mxu0 %v779_v8  ;;  %749 = vmatprep.subr.bf16.mxu1 %v779_v8 }
  0x25   : > { %732 = vmatpush3.bf16.msra.mxu0 %v779_v8  ;;  %757 = vmatpush3.bf16.msra.mxu1 %v779_v8 }
  0x26   : > { %733 = vmatprep.subr.bf16.mxu0 %v780_v9  ;;  %750 = vmatprep.subr.bf16.mxu1 %v780_v9 }
  0x29   : > { %734 = vmatpush3.bf16.msra.mxu0 %v780_v9  ;;  %758 = vmatpush3.bf16.msra.mxu1 %v780_v9 }
  0x2c   : > { %736 = vmatmul.mubr.bf16.vlgmr.msra.gmra.mxu0 %v782_v10  ;;  %740 = vmatmul.mubr.bf16.vlgmr.msra.gmra.mxu1 %v784_v11 }
  0xec   : > { %v737_v12 = vpop.f32.mrf.mxu0  ;;  %v741_v13 = vpop.f32.mrf.mxu1 }
  0xed   : > { %v870_v21 = vadd.f32 %v737_v12, %v690_v17  ;;  %v904_v48 = vadd.f32 %v741_v13, %v690_v17 }
  0xee   : > { %v309_v14 = vpop.f32.mrf.mxu0  ;;  %v325_v16 = vpop.f32.mrf.mxu1 }
  0xef   : > { %v868_v18 = vadd.f32 %v690_v17, %v309_v14  ;;  %v367_v34 = vsel %vm363_vm0, %v870_v21, 0.0  ;;  %v394_v35 = vsel %vm390_vm1, %v870_v21, 0.0  ;;  %v421_v36 = vsel %vm417_vm2, %v870_v21, 0.0 }
  0xf0   : > { %v738_v15 = vpop.f32.mrf.mxu0  ;;  %v742_v20 = vpop.f32.mrf.mxu1  ;;  %v894_v37 = vadd.f32 %v690_v17, %v325_v16  ;;  %v429_v62 = vsel %vm417_vm2, %v904_v48, 0.0  ;;  %v375_v63 = vsel %vm363_vm0, %v904_v48, 0.0  ;;  %v402_v0 = vsel %vm390_vm1, %v904_v48, 0.0 }
  0xf1   : > { %v364_v23 = vsel %vm363_vm0, %v868_v18, 0.0  ;;  %v391_v24 = vsel %vm390_vm1, %v868_v18, 0.0  ;;  %v878_v25 = vadd.f32 %v738_v15, %v690_v17  ;;  %v418_v26 = vsel %vm417_vm2, %v868_v18, 0.0 }
  0xf2   : > { %v312_v19 = vpop.f32.mrf.mxu0  ;;  %v328_v33 = vpop.f32.mrf.mxu1  ;;  %v371_v49 = vsel %vm363_vm0, %v894_v37, 0.0  ;;  %v398_v50 = vsel %vm390_vm1, %v894_v37, 0.0  ;;  %v425_v51 = vsel %vm417_vm2, %v894_v37, 0.0  ;;  %v912_v55 = vadd.f32 %v742_v20, %v690_v17 }
  0xf3   : > { %v872_v22 = vadd.f32 %v690_v17, %v312_v19  ;;  %v369_v41 = vsel %vm363_vm0, %v878_v25, 0.0  ;;  %v396_v42 = vsel %vm390_vm1, %v878_v25, 0.0  ;;  %v423_v43 = vsel %vm417_vm2, %v878_v25, 0.0 }
  0xf4   : > { %v902_v44 = vadd.f32 %v690_v17, %v328_v33  ;;  %v431_v4 = vsel %vm417_vm2, %v912_v55, 0.0  ;;  %v377_v5 = vsel %vm363_vm0, %v912_v55, 0.0  ;;  %v404_v6 = vsel %vm390_vm1, %v912_v55, 0.0 }
  0xf5   : > { %v365_v27 = vsel %vm363_vm0, %v872_v22, 0.0  ;;  %v392_v28 = vsel %vm390_vm1, %v872_v22, 0.0  ;;  %v419_v29 = vsel %vm417_vm2, %v872_v22, 0.0  ;;  %v341_v33 = vsel %vm340_vm3, %v868_v18, 0.0 }
  0xf6   : > { %v366_v30 = vadd.f32 %v365_v27, %v364_v23  ;;  %v393_v31 = vadd.f32 %v392_v28, %v391_v24  ;;  %v420_v32 = vadd.f32 %v419_v29, %v418_v26  ;;  %v400_v56 = vsel %vm390_vm1, %v902_v44, 0.0 }
  0xf7   : > { %v427_v57 = vsel %vm417_vm2, %v902_v44, 0.0  ;;  %v373_v58 = vsel %vm363_vm0, %v902_v44, 0.0 }
  0xf8   : > { %v368_v38 = vadd.f32 %v367_v34, %v366_v30  ;;  %v395_v39 = vadd.f32 %v394_v35, %v393_v31  ;;  %v422_v40 = vadd.f32 %v421_v36, %v420_v32  ;;  %v342_v32 = vsel %vm340_vm3, %v872_v22, 0.0 }
  0xf9   : > { %v343_v34 = vadd.f32 %v342_v32, %v341_v33  ;;  %v344_v35 = vsel %vm340_vm3, %v870_v21, 0.0 }
  0xfa   : > { %v424_v45 = vadd.f32 %v423_v43, %v422_v40  ;;  %v370_v46 = vadd.f32 %v369_v41, %v368_v38  ;;  %v397_v47 = vadd.f32 %v396_v42, %v395_v39  ;;  %v346_v38 = vsel %vm340_vm3, %v878_v25, 0.0 }
  0xfb   : > { %v345_v36 = vadd.f32 %v344_v35, %v343_v34  ;;  %v348_v40 = vsel %vm340_vm3, %v894_v37, 0.0  ;;  %v350_v42 = vsel %vm340_vm3, %v902_v44, 0.0 }
  0xfc   : > { %v426_v52 = vadd.f32 %v425_v51, %v424_v45  ;;  %v372_v53 = vadd.f32 %v371_v49, %v370_v46  ;;  %v399_v54 = vadd.f32 %v398_v50, %v397_v47  ;;  %v352_v45 = vsel %vm340_vm3, %v904_v48, 0.0 }
  0xfd   : > { %v347_v39 = vadd.f32 %v346_v38, %v345_v36  ;;  %v354_v47 = vsel %vm340_vm3, %v912_v55, 0.0 }
  0xfe   : > { %v428_v59 = vadd.f32 %v427_v57, %v426_v52  ;;  %v374_v60 = vadd.f32 %v373_v58, %v372_v53  ;;  %v401_v61 = vadd.f32 %v400_v56, %v399_v54 }
  0xff   : > { %v349_v41 = vadd.f32 %v348_v40, %v347_v39 }
 0x100   : > { %v430_v1 = vadd.f32 %v429_v62, %v428_v59  ;;  %v376_v2 = vadd.f32 %v375_v63, %v374_v60  ;;  %v403_v3 = vadd.f32 %v402_v0, %v401_v61  ;;  %v461_v0 = vlaneseq }
 0x101   : > { %v351_v43 = vadd.f32 %v350_v42, %v349_v41 }
 0x102   : > { %v432_v7 = vadd.f32 %v431_v4, %v430_v1  ;;  %v378_v8 = vadd.f32 %v377_v5, %v376_v2  ;;  %v405_v9 = vadd.f32 %v404_v6, %v403_v3  ;;  %v954_v1 = vshrl.u32 %v461_v0, 7 }
 0x103   : > { %v353_v46 = vadd.f32 %v352_v45, %v351_v43 }
 0x104   : > { %v433_v10 = vrot.slane %v432_v7, 4  ;;  %v379_v11 = vrot.slane %v378_v8, 4  ;;  %v406_v12 = vrot.slane %v405_v9, 4  ;;  %v463_v5 = vsub.s32 0, %v954_v1 }
 0x105   : > { %v355_v49 = vadd.f32 %v354_v47, %v353_v46 }
 0x106   : > { %v434_v13 = vadd.f32 %v433_v10, %v432_v7  ;;  %v380_v14 = vadd.f32 %v379_v11, %v378_v8  ;;  %v407_v15 = vadd.f32 %v406_v12, %v405_v9 }
 0x107   : > { %v356_v50 = vrot.slane %v355_v49, 4 }
 0x108   : > { %v435_v16 = vrot.slane %v434_v13, 2  ;;  %v381_v17 = vrot.slane %v380_v14, 2  ;;  %v408_v19 = vrot.slane %v407_v15, 2 }
 0x109   : > { %v357_v51 = vadd.f32 %v356_v50, %v355_v49 }
 0x10a   : > { %v436_v20 = vadd.f32 %v435_v16, %v434_v13  ;;  %v382_v23 = vadd.f32 %v381_v17, %v380_v14  ;;  %v409_v24 = vadd.f32 %v408_v19, %v407_v15 }
 0x10b   : > { %v358_v52 = vrot.slane %v357_v51, 2 }
 0x10c   : > { %v437_v26 = vrot.slane %v436_v20, 1  ;;  %v383_v27 = vrot.slane %v382_v23, 1  ;;  %v410_v30 = vrot.slane %v409_v24, 1 }
 0x10d   : > { %v359_v53 = vadd.f32 %v358_v52, %v357_v51 }
 0x10e   : > { %v438_v28 = vadd.f32 %v437_v26, %v436_v20  ;;  %v384_v29 = vadd.f32 %v383_v27, %v382_v23  ;;  %v411_v31 = vadd.f32 %v410_v30, %v409_v24 }
 0x10f   : > { %v360_v54 = vrot.slane %v359_v53, 1 }
 0x110   : > { %440 = vrot.lane.b32.xlu1 %v438_v28, %s795_s9  ;;  %386 = vrot.lane.b32.xlu0 %v384_v29, %s796_s10 }
 0x111   : > { %v361_v57 = vadd.f32 %v360_v54, %v359_v53 }
 0x114   : > { %413 = vrot.lane.b32.xlu0 %v411_v31, %s797_s11 }
 0x182   : > { %v387_v56 = vpop.permute.xlu0 %386  ;;  %v441_v61 = vpop.permute.xlu1 %440 }
 0x183   : > { %v389_v58 = vadd.f32 %v387_v56, %v361_v57 }
 0x186   : > { %v414_v59 = vpop.permute.xlu0 %413 }
 0x187   : > { %v416_v60 = vadd.f32 %v414_v59, %v389_v58 }
 0x189   : > { %v443_v62 = vadd.f32 %v441_v61, %v416_v60 }
 0x18b   : > { %v445_v63 = vmul.f32 0.00390625, %v443_v62 }
 0x18d   : > { %450 = vrot.lane.b32.xlu0 %v445_v63, %s798_s14  ;;  %447 = vrot.lane.b32.xlu1 %v445_v63, %s799_s15 }
 0x191   : > { %453 = vrot.lane.b32.xlu1 %v445_v63, %s800_s16 }
 0x1ff   : > { %v448_v2 = vpop.permute.xlu1 %447  ;;  %v451_v3 = vpop.permute.xlu0 %450 }
 0x200   : > { %v456_v4 = vsel %vm340_vm3, %v445_v63, %v448_v2 }
 0x201   : > { %v458_v6 = vsel %vm457_vm4, %v456_v4, %v451_v3 }
 0x203   : > { %v454_v7 = vpop.permute.xlu1 %453 }
 0x204   : > { %v460_v8 = vsel %vm459_vm5, %v458_v6, %v454_v7 }
 0x205   : > { %v464_v9 = vrot.slane %v460_v8, %v463_v5 }
 0x207   : > { %v963_v10 = vsub.f32 %v868_v18, %v464_v9  ;;  %v966_v11 = vsub.f32 %v872_v22, %v464_v9  ;;  %v969_v12 = vsub.f32 %v870_v21, %v464_v9  ;;  %v972_v13 = vsub.f32 %v878_v25, %v464_v9 }
 0x208   : > { %v975_v14 = vsub.f32 %v894_v37, %v464_v9  ;;  %v984_v22 = vsub.f32 %v902_v44, %v464_v9  ;;  %v991_v17 = vsub.f32 %v904_v48, %v464_v9  ;;  %v999_v26 = vsub.f32 %v912_v55, %v464_v9 }
 0x209   : > { %v473_v15 = vmul.f32 %v963_v10, %v963_v10  ;;  %v474_v16 = vmul.f32 %v966_v11, %v966_v11  ;;  %v475_v18 = vmul.f32 %v969_v12, %v969_v12  ;;  %v476_v21 = vmul.f32 %v972_v13, %v972_v13 }
 0x20a   : > { %v477_v20 = vmul.f32 %v975_v14, %v975_v14  ;;  %v478_v29 = vmul.f32 %v984_v22, %v984_v22  ;;  %v479_v35 = vmul.f32 %v991_v17, %v991_v17  ;;  %v480_v39 = vmul.f32 %v999_v26, %v999_v26 }
 0x20b   : > { %v529_v25 = vsel %vm390_vm1, %v473_v15, 0.0  ;;  %v530_v37 = vsel %vm390_vm1, %v474_v16, 0.0  ;;  %v532_v23 = vsel %vm390_vm1, %v475_v18, 0.0  ;;  %v503_v24 = vsel %vm363_vm0, %v473_v15, 0.0 }
 0x20c   : > { %v531_v19 = vadd.f32 %v530_v37, %v529_v25  ;;  %v504_v44 = vsel %vm363_vm0, %v474_v16, 0.0  ;;  %v534_v48 = vsel %vm390_vm1, %v476_v21, 0.0  ;;  %v506_v30 = vsel %vm363_vm0, %v475_v18, 0.0 }
 0x20d   : > { %v505_v28 = vadd.f32 %v504_v44, %v503_v24  ;;  %v555_v31 = vsel %vm417_vm2, %v473_v15, 0.0  ;;  %v556_v34 = vsel %vm417_vm2, %v474_v16, 0.0  ;;  %v536_v55 = vsel %vm390_vm1, %v477_v20, 0.0 }
 0x20e   : > { %v533_v27 = vadd.f32 %v532_v23, %v531_v19  ;;  %v508_v36 = vsel %vm363_vm0, %v476_v21, 0.0  ;;  %v557_v38 = vadd.f32 %v556_v34, %v555_v31  ;;  %v558_v42 = vsel %vm417_vm2, %v475_v18, 0.0 }
 0x20f   : > { %v507_v33 = vadd.f32 %v506_v30, %v505_v28  ;;  %v538_v43 = vsel %vm390_vm1, %v478_v29, 0.0  ;;  %v510_v45 = vsel %vm363_vm0, %v477_v20, 0.0  ;;  %v482_v47 = vsel %vm340_vm3, %v474_v16, 0.0 }
 0x210   : > { %v535_v32 = vadd.f32 %v534_v48, %v533_v27  ;;  %v559_v46 = vadd.f32 %v558_v42, %v557_v38  ;;  %v560_v51 = vsel %vm417_vm2, %v476_v21, 0.0  ;;  %v540_v52 = vsel %vm390_vm1, %v479_v35, 0.0 }
 0x211   : > { %v509_v41 = vadd.f32 %v508_v36, %v507_v33  ;;  %v512_v53 = vsel %vm363_vm0, %v478_v29, 0.0  ;;  %v481_v56 = vsel %vm340_vm3, %v473_v15, 0.0  ;;  %v562_v59 = vsel %vm417_vm2, %v477_v20, 0.0 }
 0x212   : > { %v537_v40 = vadd.f32 %v536_v55, %v535_v32  ;;  %v561_v54 = vadd.f32 %v560_v51, %v559_v46  ;;  %v483_v60 = vadd.f32 %v482_v47, %v481_v56  ;;  %v542_v61 = vsel %vm390_vm1, %v480_v39, 0.0 }
 0x213   : > { %v511_v50 = vadd.f32 %v510_v45, %v509_v41  ;;  %v514_v62 = vsel %vm363_vm0, %v479_v35, 0.0  ;;  %v484_v0 = vsel %vm340_vm3, %v475_v18, 0.0  ;;  %v564_v4 = vsel %vm417_vm2, %v478_v29, 0.0 }
 0x214   : > { %v539_v49 = vadd.f32 %v538_v43, %v537_v40  ;;  %v563_v63 = vadd.f32 %v562_v59, %v561_v54  ;;  %v485_v6 = vadd.f32 %v484_v0, %v483_v60  ;;  %v516_v7 = vsel %vm363_vm0, %v480_v39, 0.0 }
 0x215   : > { %v513_v58 = vadd.f32 %v512_v53, %v511_v50  ;;  %v486_v9 = vsel %vm340_vm3, %v476_v21, 0.0  ;;  %v566_v25 = vsel %vm417_vm2, %v479_v35, 0.0  ;;  %v488_v23 = vsel %vm340_vm3, %v477_v20, 0.0 }
 0x216   : > { %v541_v57 = vadd.f32 %v540_v52, %v539_v49  ;;  %v565_v8 = vadd.f32 %v564_v4, %v563_v63  ;;  %v487_v37 = vadd.f32 %v486_v9, %v485_v6  ;;  %v568_v44 = vsel %vm417_vm2, %v480_v39, 0.0 }
 0x217   : > { %v515_v3 = vadd.f32 %v514_v62, %v513_v58  ;;  %v490_v48 = vsel %vm340_vm3, %v478_v29, 0.0  ;;  %v492_v33 = vsel %vm340_vm3, %v479_v35, 0.0  ;;  %v494_v20 = vsel %vm340_vm3, %v480_v39, 0.0 }
 0x218   : > { %v543_v2 = vadd.f32 %v542_v61, %v541_v57  ;;  %v567_v19 = vadd.f32 %v566_v25, %v565_v8  ;;  %v489_v27 = vadd.f32 %v488_v23, %v487_v37 }
 0x219   : > { %v517_v16 = vadd.f32 %v516_v7, %v515_v3 }
 0x21a   : > { %v544_v15 = vrot.slane %v543_v2, 4  ;;  %v569_v28 = vadd.f32 %v568_v44, %v567_v19  ;;  %v491_v32 = vadd.f32 %v490_v48, %v489_v27 }
 0x21b   : > { %v518_v18 = vrot.slane %v517_v16, 4 }
 0x21c   : > { %v545_v24 = vadd.f32 %v544_v15, %v543_v2  ;;  %v570_v21 = vrot.slane %v569_v28, 4  ;;  %v493_v36 = vadd.f32 %v492_v33, %v491_v32 }
 0x21d   : > { %v519_v31 = vadd.f32 %v518_v18, %v517_v16 }
 0x21e   : > { %v546_v30 = vrot.slane %v545_v24, 2  ;;  %v571_v38 = vadd.f32 %v570_v21, %v569_v28  ;;  %v495_v42 = vadd.f32 %v494_v20, %v493_v36 }
 0x21f   : > { %v520_v55 = vrot.slane %v519_v31, 2 }
 0x220   : > { %v547_v34 = vadd.f32 %v546_v30, %v545_v24  ;;  %v572_v43 = vrot.slane %v571_v38, 2  ;;  %v496_v50 = vrot.slane %v495_v42, 4 }
 0x221   : > { %v521_v41 = vadd.f32 %v520_v55, %v519_v31 }
 0x222   : > { %v548_v40 = vrot.slane %v547_v34, 1  ;;  %v573_v47 = vadd.f32 %v572_v43, %v571_v38  ;;  %v497_v51 = vadd.f32 %v496_v50, %v495_v42 }
 0x223   : > { %v522_v46 = vrot.slane %v521_v41, 1 }
 0x224   : > { %v549_v45 = vadd.f32 %v548_v40, %v547_v34  ;;  %v574_v49 = vrot.slane %v573_v47, 1  ;;  %v498_v52 = vrot.slane %v497_v51, 2 }
 0x225   : > { %v523_v29 = vadd.f32 %v522_v46, %v521_v41 }
 0x226   : > { %551 = vrot.lane.b32.xlu1 %v549_v45, %s797_s11  ;;  %v575_v35 = vadd.f32 %v574_v49, %v573_v47  ;;  %v499_v39 = vadd.f32 %v498_v52, %v497_v51 }
 0x227   : > { %525 = vrot.lane.b32.xlu0 %v523_v29, %s796_s10 }
 0x228   : > { %v500_v53 = vrot.slane %v499_v39, 1 }
 0x22a   : > { %v501_v54 = vadd.f32 %v500_v53, %v499_v39 }
 0x22b   : > { %577 = vrot.lane.b32.xlu0 %v575_v35, %s795_s9 }
 0x298   : > { %v552_v58 = vpop.permute.xlu1 %551 }
 0x299   : > { %v526_v56 = vpop.permute.xlu0 %525 }
 0x29a   : > { %v528_v57 = vadd.f32 %v526_v56, %v501_v54 }
 0x29c   : > { %v554_v59 = vadd.f32 %v552_v58, %v528_v57 }
 0x29d   : > { %v578_v60 = vpop.permute.xlu0 %577 }
 0x29e   : > { %v580_v61 = vadd.f32 %v578_v60, %v554_v59 }
 0x2a0   : > { %v581_v62 = vmul.f32 0.00390625, %v580_v61 }
 0x2a2   : > { %v582_v63 = vadd.f32 1e-05, %v581_v62 }
 0x2a4   : > { %785 = vrsqrt.f32 %v582_v63 }
 0x2b1   : > { %v786_v0 = vpop.eup %785 }
 0x2b2   : > { %588 = vrot.lane.b32.xlu0 %v786_v0, %s798_s14  ;;  %585 = vrot.lane.b32.xlu1 %v786_v0, %s799_s15 }
 0x2b6   : > { %591 = vrot.lane.b32.xlu1 %v786_v0, %s800_s16 }
 0x324   : > { %v586_v2 = vpop.permute.xlu1 %585  ;;  %v589_v3 = vpop.permute.xlu0 %588 }
 0x325   : > { %v594_v4 = vsel %vm340_vm3, %v786_v0, %v586_v2 }
 0x326   : > { %v595_v6 = vsel %vm457_vm4, %v594_v4, %v589_v3 }
 0x328   : > { %v592_v7 = vpop.permute.xlu1 %591 }
 0x329   : > { %v596_v8 = vsel %vm459_vm5, %v595_v6, %v592_v7 }
 0x32a   : > { %v600_v9 = vrot.slane %v596_v8, %v463_v5 }
 0x32c   : > { %v601_v15 = vmul.f32 %v600_v9, %v963_v10  ;;  %v602_v16 = vmul.f32 %v600_v9, %v966_v11  ;;  %v603_v25 = vmul.f32 %v600_v9, %v969_v12  ;;  %v604_v37 = vmul.f32 %v600_v9, %v972_v13 }
 0x32d   : > { %v605_v19 = vmul.f32 %v600_v9, %v975_v14  ;;  %v606_v23 = vmul.f32 %v600_v9, %v984_v22  ;;  %v607_v1 = vmul.f32 %v600_v9, %v991_v17  ;;  %v608_v5 = vmul.f32 %v600_v9, %v999_v26 }
 0x32e   : > { %v609_v24 = vmax.f32 %v601_v15, 0.0  ;;  %v610_v10 = vmax.f32 %v602_v16, 0.0  ;;  %v611_v18 = vmax.f32 %v603_v25, 0.0  ;;  %v612_v11 = vmax.f32 %v604_v37, 0.0 }
 0x32f   : > { %v613_v44 = vmax.f32 %v605_v19, 0.0  ;;  %v614_v12 = vmax.f32 %v606_v23, 0.0  ;;  %v615_v27 = vmax.f32 %v607_v1, 0.0  ;;  %v616_v13 = vmax.f32 %v608_v5, 0.0 }
 0x330   : > { %618 = vst.msk [vmem:[%s170_s20] sm:$0xff] %vm617_vm6, %v609_v24  ;;  %619 = vst.msk [vmem:[%s170_s20 + $0x8] sm:$0xff] %vm617_vm6, %v610_v10 }
 0x331   : > { %620 = vst.msk [vmem:[%s170_s20 + $0x10] sm:$0xff] %vm617_vm6, %v611_v18  ;;  %621 = vst.msk [vmem:[%s170_s20 + $0x18] sm:$0xff] %vm617_vm6, %v612_v11 }
 0x332   : > { %622 = vst.msk [vmem:[%s170_s20 + $0x20] sm:$0xff] %vm617_vm6, %v613_v44  ;;  %623 = vst.msk [vmem:[%s170_s20 + $0x28] sm:$0xff] %vm617_vm6, %v614_v12 }
 0x333   : > { %624 = vst.msk [vmem:[%s170_s20 + $0x30] sm:$0xff] %vm617_vm6, %v615_v27  ;;  %625 = vst.msk [vmem:[%s170_s20 + $0x38] sm:$0xff] %vm617_vm6, %v616_v13 }
 0x334 PF: > { %s13_s12 = sadd.s32 1, %s793_s12  }
 0x335   : > { %p10_p4 = scmp.ge.s32.totalorder %s13_s12, 4  }
 0x337   :  { %12 = sbr.rel (!%p10_p4) target bundleno = 1 (0x1), region = 62 }

// kernel: spec_forward.19
= control target key start
LH: loop header
LB: loop body
LE: loop exit
PB: predicated region body
PF: predicated region fallthrough
CT: control target
= control target key end

     0   :  { %s1823_s12 = smov 0   ;;  %s2113_s0 = inlined_call_operand.vmem [shape: bf16[2,256,512], index: 0, kind: input, shape index: {}]   ;;  %s2114_s1 = inlined_call_operand.vmem [shape: bf16[512,3], index: 1, kind: input, shape index: {}]   ;;  %s2115_s2 = inlined_call_operand.vmem [shape: f32[1,3], index: 2, kind: input, shape index: {}]   ;;  %s2116_s3 = inlined_call_operand.vmem [shape: f32[2,256,3], index: 3, kind: output, shape index: {}]  }
   0x1 LB: > { %s1261_s13 = sadd.s32 4294967295, %s1801_s12   ;;  %p1265_p0 = scmp.ge.s32.totalorder %s1801_s12, 1  ;;  %s1801_s12 = sphi %s1823_s12, %s13_s12  }
   0x2   : > { %p137_p1 = scmp.lt.s32.totalorder %s1801_s12, 3 }
   0x4   : > { %p138_p2 = pnand %p1265_p0, %p137_p1 }
   0x5   : > { %p161_p3 = scmp.lt.s32.totalorder (!%p138_p2), %s1261_s13, 1 }
   0x6   : > { %141 = sbr.rel (%p138_p2) target bundleno = 385 (0x181), region = 32 }
   0xb   : > { %v1603_v0 = vld [vmem:[%s2114_s1 + $0x78] sm:$0xff]   ;;  %v1607_v4 = vld [vmem:[%s2114_s1 + $0x70] sm:$0xff]   ;;  %v1611_v8 = vld [vmem:[%s2114_s1 + $0x68] sm:$0xff]   ;;  %s2118_s13 = smov (!%p161_p3, %s1261_s13), 1  ;;  %vm1173_vm0 = vcmask 23552  }
   0xc   : > { %v1604_v1 = vld [vmem:[%s2114_s1 + $0xf8] sm:$0xff]   ;;  %1371 = vmatprep.subr.bf16.mxu0 %v1603_v0  ;;  %v1608_v5 = vld [vmem:[%s2114_s1 + $0xf0] sm:$0xff]   ;;  %v1612_v9 = vld [vmem:[%s2114_s1 + $0xe8] sm:$0xff]   ;;  %s1369_s18 = sshll.u32 %s2118_s13, 9  ;;  %s1370_s7 = sshll.u32 %s2118_s13, 8 }
   0xd   : > { %v1605_v2 = vld [vmem:[%s2114_s1 + $0x38] sm:$0xff]   ;;  %1483 = vmatprep.subr.bf16.mxu1 %v1604_v1  ;;  %v1609_v6 = vld [vmem:[%s2114_s1 + $0x30] sm:$0xff]   ;;  %v1613_v10 = vld [vmem:[%s2114_s1 + $0x28] sm:$0xff]   ;;  %s1931_s27 = scalar_lea.vmem %s2113_s0, %s1369_s18  ;;  %s2016_s10 = scalar_lea.vmem %s2116_s3, %s1370_s7 }
   0xe   : > { %v1606_v3 = vld [vmem:[%s2114_s1 + $0xb8] sm:$0xff]   ;;  %1372 = vmatpush3.bf16.msra.mxu0 %v1605_v2  ;;  %v1610_v7 = vld [vmem:[%s2114_s1 + $0xb0] sm:$0xff]   ;;  %v1614_v11 = vld [vmem:[%s2114_s1 + $0xa8] sm:$0xff]  }
   0xf   : > { %1484 = vmatpush3.bf16.msra.mxu1 %v1606_v3  ;;  %1373 = vmatprep.subr.bf16.mxu0 %v1607_v4  ;;  %v1615_v12 = vld [vmem:[%s2114_s1 + $0x60] sm:$0xff]   ;;  %v1619_v16 = vld [vmem:[%s2114_s1 + $0x58] sm:$0xff]   ;;  %v1623_v20 = vld [vmem:[%s2114_s1 + $0x50] sm:$0xff]  }
  0x10   : > { %1485 = vmatprep.subr.bf16.mxu1 %v1608_v5  ;;  %v1616_v13 = vld [vmem:[%s2114_s1 + $0xe0] sm:$0xff]   ;;  %v1620_v17 = vld [vmem:[%s2114_s1 + $0xd8] sm:$0xff]   ;;  %v1624_v21 = vld [vmem:[%s2114_s1 + $0xd0] sm:$0xff]  }
  0x11   : > { %v1617_v14 = vld [vmem:[%s2114_s1 + $0x20] sm:$0xff]   ;;  %v1621_v18 = vld [vmem:[%s2114_s1 + $0x18] sm:$0xff]   ;;  %v1625_v22 = vld [vmem:[%s2114_s1 + $0x10] sm:$0xff]  }
  0x12   : > { %1374 = vmatpush3.bf16.msra.mxu0 %v1609_v6  ;;  %v1618_v15 = vld [vmem:[%s2114_s1 + $0xa0] sm:$0xff]   ;;  %v1622_v19 = vld [vmem:[%s2114_s1 + $0x98] sm:$0xff]   ;;  %v1626_v23 = vld [vmem:[%s2114_s1 + $0x90] sm:$0xff]  }
  0x13   : > { %1486 = vmatpush3.bf16.msra.mxu1 %v1610_v7  ;;  %1375 = vmatprep.subr.bf16.mxu0 %v1611_v8  ;;  %v1627_v24 = vld [vmem:[%s2114_s1 + $0x48] sm:$0xff]   ;;  %v1631_v28 = vld [vmem:[%s2114_s1 + $0x40] sm:$0xff]  }
  0x14   : > { %1487 = vmatprep.subr.bf16.mxu1 %v1612_v9  ;;  %v1628_v25 = vld [vmem:[%s2114_s1 + $0xc8] sm:$0xff]   ;;  %v1632_v29 = vld [vmem:[%s2114_s1 + $0xc0] sm:$0xff]  }
  0x15   : > { %v1629_v26 = vld [vmem:[%s2114_s1 + $0x8] sm:$0xff]   ;;  %v1633_v30 = vld [vmem:[%s2114_s1] sm:$0xff]  }
  0x16   : > { %1376 = vmatpush3.bf16.msra.mxu0 %v1613_v10  ;;  %v1630_v27 = vld [vmem:[%s2114_s1 + $0x88] sm:$0xff]   ;;  %v1634_v31 = vld [vmem:[%s2114_s1 + $0x80] sm:$0xff]  }
  0x17   : > { %1488 = vmatpush3.bf16.msra.mxu1 %v1614_v11  ;;  %1377 = vmatprep.subr.bf16.mxu0 %v1615_v12  ;;  %v1635_v32 = vld [vmem:[%s1931_s27] ss:$16 sps:$4 sm:$0xff]   ;;  %v1637_v33 = vld [vmem:[%s1931_s27 + $0x4] ss:$16 sps:$4 sm:$0xff]   ;;  %v1638_v34 = vld [vmem:[%s1931_s27 + $0x8] ss:$16 sps:$4 sm:$0xff]  }
  0x18   : > { %1489 = vmatprep.subr.bf16.mxu1 %v1616_v13  ;;  %v1640_v35 = vld [vmem:[%s1931_s27 + $0xc] ss:$16 sps:$4 sm:$0xff]   ;;  %851 = vmatprep.mubr.bf16.mxu0 %v1637_v33  ;;  %v1641_v36 = vld [vmem:[%s1931_s27 + $0x24] ss:$16 sps:$4 sm:$0xff]   ;;  %v1645_v38 = vld [vmem:[%s1931_s27 + $0x20] ss:$16 sps:$4 sm:$0xff]  }
  0x19   : > { %1012 = vmatprep.mubr.bf16.mxu1 %v1640_v35  ;;  %v1643_v37 = vld [vmem:[%s1931_s27 + $0x2c] ss:$16 sps:$4 sm:$0xff]   ;;  %v1646_v39 = vld [vmem:[%s1931_s27 + $0x28] ss:$16 sps:$4 sm:$0xff]   ;;  %v1647_v40 = vld [vmem:[%s1931_s27 + $0x44] ss:$16 sps:$4 sm:$0xff]  }
  0x1a   : > { %1378 = vmatpush3.bf16.msra.mxu0 %v1617_v14  ;;  %v1649_v41 = vld [vmem:[%s1931_s27 + $0x4c] ss:$16 sps:$4 sm:$0xff]   ;;  %v1651_v42 = vld [vmem:[%s1931_s27 + $0x40] ss:$16 sps:$4 sm:$0xff]   ;;  %v1652_v43 = vld [vmem:[%s1931_s27 + $0x48] ss:$16 sps:$4 sm:$0xff]  }
  0x1b   : > { %1490 = vmatpush3.bf16.msra.mxu1 %v1618_v15  ;;  %1379 = vmatprep.subr.bf16.mxu0 %v1619_v16  ;;  %v1653_v44 = vld [vmem:[%s1931_s27 + $0x64] ss:$16 sps:$4 sm:$0xff]   ;;  %v1655_v45 = vld [vmem:[%s1931_s27 + $0x6c] ss:$16 sps:$4 sm:$0xff]   ;;  %v1657_v46 = vld [vmem:[%s1931_s27 + $0x60] ss:$16 sps:$4 sm:$0xff]  }
  0x1c   : > { %1491 = vmatprep.subr.bf16.mxu1 %v1620_v17  ;;  %v1658_v47 = vld [vmem:[%s1931_s27 + $0x68] ss:$16 sps:$4 sm:$0xff]   ;;  %v1659_v48 = vld [vmem:[%s1931_s27 + $0x84] ss:$16 sps:$4 sm:$0xff]   ;;  %v1661_v49 = vld [vmem:[%s1931_s27 + $0x8c] ss:$16 sps:$4 sm:$0xff]  }
  0x1d   : > { %v1663_v50 = vld [vmem:[%s1931_s27 + $0x80] ss:$16 sps:$4 sm:$0xff]   ;;  %v1664_v51 = vld [vmem:[%s1931_s27 + $0x88] ss:$16 sps:$4 sm:$0xff]   ;;  %v1665_v52 = vld [vmem:[%s1931_s27 + $0xa4] ss:$16 sps:$4 sm:$0xff]  }
  0x1e   : > { %1380 = vmatpush3.bf16.msra.mxu0 %v1621_v18  ;;  %v1667_v53 = vld [vmem:[%s1931_s27 + $0xac] ss:$16 sps:$4 sm:$0xff]   ;;  %v1669_v54 = vld [vmem:[%s1931_s27 + $0xa0] ss:$16 sps:$4 sm:$0xff]   ;;  %v1670_v55 = vld [vmem:[%s1931_s27 + $0xa8] ss:$16 sps:$4 sm:$0xff]  }
  0x1f   : > { %1492 = vmatpush3.bf16.msra.mxu1 %v1622_v19  ;;  %1381 = vmatprep.subr.bf16.mxu0 %v1623_v20  ;;  %v1671_v56 = vld [vmem:[%s1931_s27 + $0xc4] ss:$16 sps:$4 sm:$0xff]   ;;  %v1673_v57 = vld [vmem:[%s1931_s27 + $0xcc] ss:$16 sps:$4 sm:$0xff]   ;;  %v1675_v58 = vld [vmem:[%s1931_s27 + $0xc0] ss:$16 sps:$4 sm:$0xff]  }
  0x20   : > { %1493 = vmatprep.subr.bf16.mxu1 %v1624_v21  ;;  %v1676_v59 = vld [vmem:[%s1931_s27 + $0xc8] ss:$16 sps:$4 sm:$0xff]   ;;  %v1677_v60 = vld [vmem:[%s1931_s27 + $0xe4] ss:$16 sps:$4 sm:$0xff]   ;;  %v1679_v61 = vld [vmem:[%s1931_s27 + $0xec] ss:$16 sps:$4 sm:$0xff]  }
  0x21   : > { %v1681_v62 = vld [vmem:[%s1931_s27 + $0xe0] ss:$16 sps:$4 sm:$0xff]   ;;  %v1682_v63 = vld [vmem:[%s1931_s27 + $0xe8] ss:$16 sps:$4 sm:$0xff]   ;;  %v1683_v0 = vld [vmem:[%s1931_s27 + $0x104] ss:$16 sps:$4 sm:$0xff]  }
  0x22   : > { %1382 = vmatpush3.bf16.msra.mxu0 %v1625_v22  ;;  %v1685_v1 = vld [vmem:[%s1931_s27 + $0x10c] ss:$16 sps:$4 sm:$0xff]   ;;  %v1687_v2 = vld [vmem:[%s1931_s27 + $0x100] ss:$16 sps:$4 sm:$0xff]   ;;  %v1688_v3 = vld [vmem:[%s1931_s27 + $0x108] ss:$16 sps:$4 sm:$0xff]  }
  0x23   : > { %1494 = vmatpush3.bf16.msra.mxu1 %v1626_v23  ;;  %1383 = vmatprep.subr.bf16.mxu0 %v1627_v24  ;;  %v1689_v4 = vld [vmem:[%s1931_s27 + $0x124] ss:$16 sps:$4 sm:$0xff]   ;;  %v1691_v5 = vld [vmem:[%s1931_s27 + $0x12c] ss:$16 sps:$4 sm:$0xff]   ;;  %v1693_v6 = vld [vmem:[%s1931_s27 + $0x120] ss:$16 sps:$4 sm:$0xff]  }
  0x24   : > { %1495 = vmatprep.subr.bf16.mxu1 %v1628_v25  ;;  %v1694_v7 = vld [vmem:[%s1931_s27 + $0x128] ss:$16 sps:$4 sm:$0xff]   ;;  %v1695_v8 = vld [vmem:[%s1931_s27 + $0x144] ss:$16 sps:$4 sm:$0xff]   ;;  %v1697_v9 = vld [vmem:[%s1931_s27 + $0x14c] ss:$16 sps:$4 sm:$0xff]  }
  0x25   : > { %v1699_v10 = vld [vmem:[%s1931_s27 + $0x140] ss:$16 sps:$4 sm:$0xff]   ;;  %v1700_v11 = vld [vmem:[%s1931_s27 + $0x148] ss:$16 sps:$4 sm:$0xff]   ;;  %v1701_v12 = vld [vmem:[%s1931_s27 + $0x164] ss:$16 sps:$4 sm:$0xff]  }
  0x26   : > { %1384 = vmatpush3.bf16.msra.mxu0 %v1629_v26  ;;  %v1703_v13 = vld [vmem:[%s1931_s27 + $0x16c] ss:$16 sps:$4 sm:$0xff]   ;;  %v1705_v14 = vld [vmem:[%s1931_s27 + $0x160] ss:$16 sps:$4 sm:$0xff]   ;;  %v1706_v15 = vld [vmem:[%s1931_s27 + $0x168] ss:$16 sps:$4 sm:$0xff]  }
  0x27   : > { %1496 = vmatpush3.bf16.msra.mxu1 %v1630_v27  ;;  %1385 = vmatprep.subr.bf16.mxu0 %v1631_v28  ;;  %v1707_v16 = vld [vmem:[%s1931_s27 + $0x184] ss:$16 sps:$4 sm:$0xff]   ;;  %v1709_v17 = vld [vmem:[%s1931_s27 + $0x18c] ss:$16 sps:$4 sm:$0xff]   ;;  %v1711_v18 = vld [vmem:[%s1931_s27 + $0x180] ss:$16 sps:$4 sm:$0xff]  }
  0x28   : > { %1497 = vmatprep.subr.bf16.mxu1 %v1632_v29  ;;  %v1712_v19 = vld [vmem:[%s1931_s27 + $0x188] ss:$16 sps:$4 sm:$0xff]   ;;  %v1713_v20 = vld [vmem:[%s1931_s27 + $0x1a4] ss:$16 sps:$4 sm:$0xff]   ;;  %v1715_v21 = vld [vmem:[%s1931_s27 + $0x1ac] ss:$16 sps:$4 sm:$0xff]  }
  0x29   : > { %v1717_v22 = vld [vmem:[%s1931_s27 + $0x1a0] ss:$16 sps:$4 sm:$0xff]   ;;  %v1718_v23 = vld [vmem:[%s1931_s27 + $0x1a8] ss:$16 sps:$4 sm:$0xff]   ;;  %v1719_v24 = vld [vmem:[%s1931_s27 + $0x1c4] ss:$16 sps:$4 sm:$0xff]  }
  0x2a   : > { %1386 = vmatpush3.bf16.msra.mxu0 %v1633_v30  ;;  %v1721_v25 = vld [vmem:[%s1931_s27 + $0x1cc] ss:$16 sps:$4 sm:$0xff]   ;;  %v1723_v26 = vld [vmem:[%s1931_s27 + $0x1c0] ss:$16 sps:$4 sm:$0xff]   ;;  %v1724_v27 = vld [vmem:[%s1931_s27 + $0x1c8] ss:$16 sps:$4 sm:$0xff]  }
  0x2b   : > { %1498 = vmatpush3.bf16.msra.mxu1 %v1634_v31  ;;  %v1725_v28 = vld [vmem:[%s1931_s27 + $0x1e4] ss:$16 sps:$4 sm:$0xff]   ;;  %v1727_v29 = vld [vmem:[%s1931_s27 + $0x1ec] ss:$16 sps:$4 sm:$0xff]   ;;  %v1729_v30 = vld [vmem:[%s1931_s27 + $0x1e0] ss:$16 sps:$4 sm:$0xff]  }
  0x2c   : > { %v1730_v31 = vld [vmem:[%s1931_s27 + $0x1e8] ss:$16 sps:$4 sm:$0xff]  }
  0x2d   : > { %852 = vmatmul.mubr.bf16.vlgmr.msra.gmra.mxu0 %v1635_v32 }
  0x2e   : > { %1013 = vmatmul.mubr.bf16.vlgmr.msra.gmra.mxu1 %v1638_v34  ;;  %859 = vmatprep.mubr.bf16.mxu0 %v1641_v36  ;;  %v2006_v34 = vld [vmem:[%s2115_s2] ss:$0 sm:$0xff] }
  0x2f   : > { %1020 = vmatprep.mubr.bf16.mxu1 %v1643_v37 }
  0x35   : > { %860 = vmatmul.mubr.bf16.gmra.mxu0 %v1645_v38 }
  0x36   : > { %1021 = vmatmul.mubr.bf16.gmra.mxu1 %v1646_v39  ;;  %867 = vmatprep.mubr.bf16.mxu0 %v1647_v40 }
  0x37   : > { %1028 = vmatprep.mubr.bf16.mxu1 %v1649_v41 }
  0x3d   : > { %868 = vmatmul.mubr.bf16.gmra.mxu0 %v1651_v42 }
  0x3e   : > { %1029 = vmatmul.mubr.bf16.gmra.mxu1 %v1652_v43  ;;  %875 = vmatprep.mubr.bf16.mxu0 %v1653_v44 }
  0x3f   : > { %1036 = vmatprep.mubr.bf16.mxu1 %v1655_v45 }
  0x45   : > { %876 = vmatmul.mubr.bf16.gmra.mxu0 %v1657_v46 }
  0x46   : > { %1037 = vmatmul.mubr.bf16.gmra.mxu1 %v1658_v47  ;;  %883 = vmatprep.mubr.bf16.mxu0 %v1659_v48 }
  0x47   : > { %1044 = vmatprep.mubr.bf16.mxu1 %v1661_v49 }
  0x4d   : > { %884 = vmatmul.mubr.bf16.gmra.mxu0 %v1663_v50 }
  0x4e   : > { %1045 = vmatmul.mubr.bf16.gmra.mxu1 %v1664_v51  ;;  %891 = vmatprep.mubr.bf16.mxu0 %v1665_v52 }
  0x4f   : > { %1052 = vmatprep.mubr.bf16.mxu1 %v1667_v53 }
  0x55   : > { %892 = vmatmul.mubr.bf16.gmra.mxu0 %v1669_v54 }
  0x56   : > { %1053 = vmatmul.mubr.bf16.gmra.mxu1 %v1670_v55  ;;  %899 = vmatprep.mubr.bf16.mxu0 %v1671_v56 }
  0x57   : > { %1060 = vmatprep.mubr.bf16.mxu1 %v1673_v57 }
  0x5d   : > { %900 = vmatmul.mubr.bf16.gmra.mxu0 %v1675_v58 }
  0x5e   : > { %1061 = vmatmul.mubr.bf16.gmra.mxu1 %v1676_v59  ;;  %907 = vmatprep.mubr.bf16.mxu0 %v1677_v60 }
  0x5f   : > { %1068 = vmatprep.mubr.bf16.mxu1 %v1679_v61 }
  0x65   : > { %908 = vmatmul.mubr.bf16.gmra.mxu0 %v1681_v62 }
  0x66   : > { %1069 = vmatmul.mubr.bf16.gmra.mxu1 %v1682_v63  ;;  %915 = vmatprep.mubr.bf16.mxu0 %v1683_v0 }
  0x67   : > { %1076 = vmatprep.mubr.bf16.mxu1 %v1685_v1 }
  0x6d   : > { %916 = vmatmul.mubr.bf16.gmra.mxu0 %v1687_v2 }
  0x6e   : > { %1077 = vmatmul.mubr.bf16.gmra.mxu1 %v1688_v3  ;;  %923 = vmatprep.mubr.bf16.mxu0 %v1689_v4 }
  0x6f   : > { %1084 = vmatprep.mubr.bf16.mxu1 %v1691_v5 }
  0x75   : > { %924 = vmatmul.mubr.bf16.gmra.mxu0 %v1693_v6 }
  0x76   : > { %1085 = vmatmul.mubr.bf16.gmra.mxu1 %v1694_v7  ;;  %931 = vmatprep.mubr.bf16.mxu0 %v1695_v8 }
  0x77   : > { %1092 = vmatprep.mubr.bf16.mxu1 %v1697_v9 }
  0x7d   : > { %932 = vmatmul.mubr.bf16.gmra.mxu0 %v1699_v10 }
  0x7e   : > { %1093 = vmatmul.mubr.bf16.gmra.mxu1 %v1700_v11  ;;  %939 = vmatprep.mubr.bf16.mxu0 %v1701_v12 }
  0x7f   : > { %1100 = vmatprep.mubr.bf16.mxu1 %v1703_v13 }
  0x85   : > { %940 = vmatmul.mubr.bf16.gmra.mxu0 %v1705_v14 }
  0x86   : > { %1101 = vmatmul.mubr.bf16.gmra.mxu1 %v1706_v15  ;;  %947 = vmatprep.mubr.bf16.mxu0 %v1707_v16 }
  0x87   : > { %1108 = vmatprep.mubr.bf16.mxu1 %v1709_v17 }
  0x8d   : > { %948 = vmatmul.mubr.bf16.gmra.mxu0 %v1711_v18 }
  0x8e   : > { %1109 = vmatmul.mubr.bf16.gmra.mxu1 %v1712_v19  ;;  %955 = vmatprep.mubr.bf16.mxu0 %v1713_v20 }
  0x8f   : > { %1116 = vmatprep.mubr.bf16.mxu1 %v1715_v21 }
  0x95   : > { %956 = vmatmul.mubr.bf16.gmra.mxu0 %v1717_v22 }
  0x96   : > { %1117 = vmatmul.mubr.bf16.gmra.mxu1 %v1718_v23  ;;  %963 = vmatprep.mubr.bf16.mxu0 %v1719_v24 }
  0x97   : > { %1124 = vmatprep.mubr.bf16.mxu1 %v1721_v25 }
  0x9d   : > { %964 = vmatmul.mubr.bf16.gmra.mxu0 %v1723_v26 }
  0x9e   : > { %1125 = vmatmul.mubr.bf16.gmra.mxu1 %v1724_v27  ;;  %971 = vmatprep.mubr.bf16.mxu0 %v1725_v28 }
  0x9f   : > { %1132 = vmatprep.mubr.bf16.mxu1 %v1727_v29 }
  0xa5   : > { %972 = vmatmul.mubr.bf16.gmra.mxu0 %v1729_v30 }
  0xa6   : > { %1133 = vmatmul.mubr.bf16.gmra.mxu1 %v1730_v31 }
  0xed   : > { %v1387_v32 = vpop.f32.mrf.mxu0 }
  0xee   : > { %v1499_v33 = vpop.f32.mrf.mxu1 }
  0xef   : > { %v1388_v35 = vpop.f32.mrf.mxu0 }
  0xf0   : > { %v1389_v36 = vadd.f32 %v1388_v35, %v1387_v32  ;;  %v1500_v37 = vpop.f32.mrf.mxu1 }
  0xf1   : > { %v1390_v38 = vpop.f32.mrf.mxu0  ;;  %v1501_v40 = vadd.f32 %v1500_v37, %v1499_v33 }
  0xf2   : > { %v854_v39 = vadd.f32 %v1389_v36, %v2006_v34  ;;  %v1502_v41 = vpop.f32.mrf.mxu1 }
  0xf3   : > { %v1391_v42 = vpop.f32.mrf.mxu0 }
  0xf4   : > { %v1015_v43 = vadd.f32 %v1501_v40, %v854_v39  ;;  %v1392_v44 = vadd.f32 %v1391_v42, %v1390_v38  ;;  %v1503_v45 = vpop.f32.mrf.mxu1 }
  0xf5   : > { %v1393_v46 = vpop.f32.mrf.mxu0  ;;  %v1504_v48 = vadd.f32 %v1503_v45, %v1502_v41 }
  0xf6   : > { %1731 = vtanh.f32 %v1015_v43  ;;  %v857_v47 = vadd.f32 %v1392_v44, %v2006_v34  ;;  %v1505_v49 = vpop.f32.mrf.mxu1 }
  0xf7   : > { %v1394_v50 = vpop.f32.mrf.mxu0 }
  0xf8   : > { %v1018_v51 = vadd.f32 %v1504_v48, %v857_v47  ;;  %v1395_v52 = vadd.f32 %v1394_v50, %v1393_v46  ;;  %v1506_v53 = vpop.f32.mrf.mxu1 }
  0xf9   : > { %v1396_v54 = vpop.f32.mrf.mxu0  ;;  %v1507_v56 = vadd.f32 %v1506_v53, %v1505_v49 }
  0xfa   : > { %1733 = vtanh.f32 %v1018_v51  ;;  %v862_v55 = vadd.f32 %v1395_v52, %v2006_v34  ;;  %v1508_v57 = vpop.f32.mrf.mxu1 }
  0xfb   : > { %v1397_v58 = vpop.f32.mrf.mxu0 }
  0xfc   : > { %v1023_v59 = vadd.f32 %v1507_v56, %v862_v55  ;;  %v1398_v60 = vadd.f32 %v1397_v58, %v1396_v54  ;;  %v1509_v61 = vpop.f32.mrf.mxu1 }
  0xfd   : > { %v1399_v62 = vpop.f32.mrf.mxu0  ;;  %v1510_v0 = vadd.f32 %v1509_v61, %v1508_v57 }
  0xfe   : > { %1735 = vtanh.f32 %v1023_v59  ;;  %v865_v63 = vadd.f32 %v1398_v60, %v2006_v34  ;;  %v1511_v1 = vpop.f32.mrf.mxu1 }
  0xff   : > { %v1400_v2 = vpop.f32.mrf.mxu0 }
 0x100   : > { %v1026_v3 = vadd.f32 %v1510_v0, %v865_v63  ;;  %v1401_v4 = vadd.f32 %v1400_v2, %v1399_v62  ;;  %v1512_v5 = vpop.f32.mrf.mxu1 }
 0x101   : > { %v1402_v6 = vpop.f32.mrf.mxu0  ;;  %v1513_v8 = vadd.f32 %v1512_v5, %v1511_v1 }
 0x102   : > { %1737 = vtanh.f32 %v1026_v3  ;;  %v870_v7 = vadd.f32 %v1401_v4, %v2006_v34  ;;  %v1514_v9 = vpop.f32.mrf.mxu1 }
 0x103   : > { %v1732_v10 = vpop.eup %1731  ;;  %v1403_v11 = vpop.f32.mrf.mxu0 }
 0x104   : > { %1174 = vst.msk [vmem:[%s2016_s10] sm:$0xff] %vm1173_vm0, %v1732_v10  ;;  %v1031_v12 = vadd.f32 %v1513_v8, %v870_v7  ;;  %v1404_v13 = vadd.f32 %v1403_v11, %v1402_v6  ;;  %v1515_v14 = vpop.f32.mrf.mxu1 }
 0x105   : > { %v1405_v15 = vpop.f32.mrf.mxu0  ;;  %v1516_v17 = vadd.f32 %v1515_v14, %v1514_v9 }
 0x106   : > { %1739 = vtanh.f32 %v1031_v12  ;;  %v873_v16 = vadd.f32 %v1404_v13, %v2006_v34  ;;  %v1517_v18 = vpop.f32.mrf.mxu1 }
 0x107   : > { %v1734_v19 = vpop.eup %1733  ;;  %v1406_v20 = vpop.f32.mrf.mxu0 }
 0x108   : > { %1175 = vst.msk [vmem:[%s2016_s10 + $0x8] sm:$0xff] %vm1173_vm0, %v1734_v19  ;;  %v1034_v21 = vadd.f32 %v1516_v17, %v873_v16  ;;  %v1407_v22 = vadd.f32 %v1406_v20, %v1405_v15  ;;  %v1518_v23 = vpop.f32.mrf.mxu1 }
 0x109   : > { %v1408_v24 = vpop.f32.mrf.mxu0  ;;  %v1519_v26 = vadd.f32 %v1518_v23, %v1517_v18 }
 0x10a   : > { %1741 = vtanh.f32 %v1034_v21  ;;  %v878_v25 = vadd.f32 %v1407_v22, %v2006_v34  ;;  %v1520_v27 = vpop.f32.mrf.mxu1 }
 0x10b   : > { %v1736_v28 = vpop.eup %1735  ;;  %v1409_v29 = vpop.f32.mrf.mxu0 }
 0x10c   : > { %1176 = vst.msk [vmem:[%s2016_s10 + $0x10] sm:$0xff] %vm1173_vm0, %v1736_v28  ;;  %v1039_v30 = vadd.f32 %v1519_v26, %v878_v25  ;;  %v1410_v31 = vadd.f32 %v1409_v29, %v1408_v24  ;;  %v1521_v32 = vpop.f32.mrf.mxu1 }
 0x10d   : > { %v1411_v33 = vpop.f32.mrf.mxu0  ;;  %v1522_v36 = vadd.f32 %v1521_v32, %v1520_v27 }
 0x10e   : > { %1743 = vtanh.f32 %v1039_v30  ;;  %v881_v35 = vadd.f32 %v1410_v31, %v2006_v34  ;;  %v1523_v37 = vpop.f32.mrf.mxu1 }
 0x10f   : > { %v1738_v38 = vpop.eup %1737  ;;  %v1412_v39 = vpop.f32.mrf.mxu0 }
 0x110   : > { %1177 = vst.msk [vmem:[%s2016_s10 + $0x18] sm:$0xff] %vm1173_vm0, %v1738_v38  ;;  %v1042_v40 = vadd.f32 %v1522_v36, %v881_v35  ;;  %v1413_v41 = vadd.f32 %v1412_v39, %v1411_v33  ;;  %v1524_v42 = vpop.f32.mrf.mxu1 }
 0x111   : > { %v1414_v43 = vpop.f32.mrf.mxu0  ;;  %v1525_v45 = vadd.f32 %v1524_v42, %v1523_v37 }
 0x112   : > { %1745 = vtanh.f32 %v1042_v40  ;;  %v886_v44 = vadd.f32 %v1413_v41, %v2006_v34  ;;  %v1526_v46 = vpop.f32.mrf.mxu1 }
 0x113   : > { %v1740_v47 = vpop.eup %1739  ;;  %v1415_v48 = vpop.f32.mrf.mxu0 }
 0x114   : > { %1178 = vst.msk [vmem:[%s2016_s10 + $0x20] sm:$0xff] %vm1173_vm0, %v1740_v47  ;;  %v1047_v49 = vadd.f32 %v1525_v45, %v886_v44  ;;  %v1416_v50 = vadd.f32 %v1415_v48, %v1414_v43  ;;  %v1527_v51 = vpop.f32.mrf.mxu1 }
 0x115   : > { %v1417_v52 = vpop.f32.mrf.mxu0  ;;  %v1528_v54 = vadd.f32 %v1527_v51, %v1526_v46 }
 0x116   : > { %1747 = vtanh.f32 %v1047_v49  ;;  %v889_v53 = vadd.f32 %v1416_v50, %v2006_v34  ;;  %v1529_v55 = vpop.f32.mrf.mxu1 }
 0x117   : > { %v1742_v56 = vpop.eup %1741  ;;  %v1418_v57 = vpop.f32.mrf.mxu0 }
 0x118   : > { %1179 = vst.msk [vmem:[%s2016_s10 + $0x28] sm:$0xff] %vm1173_vm0, %v1742_v56  ;;  %v1050_v58 = vadd.f32 %v1528_v54, %v889_v53  ;;  %v1419_v59 = vadd.f32 %v1418_v57, %v1417_v52  ;;  %v1530_v60 = vpop.f32.mrf.mxu1 }
 0x119   : > { %v1420_v61 = vpop.f32.mrf.mxu0  ;;  %v1531_v63 = vadd.f32 %v1530_v60, %v1529_v55 }
 0x11a   : > { %1749 = vtanh.f32 %v1050_v58  ;;  %v894_v62 = vadd.f32 %v1419_v59, %v2006_v34  ;;  %v1532_v0 = vpop.f32.mrf.mxu1 }
 0x11b   : > { %v1744_v1 = vpop.eup %1743  ;;  %v1421_v2 = vpop.f32.mrf.mxu0 }
 0x11c   : > { %1180 = vst.msk [vmem:[%s2016_s10 + $0x30] sm:$0xff] %vm1173_vm0, %v1744_v1  ;;  %v1055_v3 = vadd.f32 %v1531_v63, %v894_v62  ;;  %v1422_v4 = vadd.f32 %v1421_v2, %v1420_v61  ;;  %v1533_v5 = vpop.f32.mrf.mxu1 }
 0x11d   : > { %v1423_v6 = vpop.f32.mrf.mxu0  ;;  %v1534_v8 = vadd.f32 %v1533_v5, %v1532_v0 }
 0x11e   : > { %1751 = vtanh.f32 %v1055_v3  ;;  %v897_v7 = vadd.f32 %v1422_v4, %v2006_v34  ;;  %v1535_v9 = vpop.f32.mrf.mxu1 }
 0x11f   : > { %v1746_v10 = vpop.eup %1745  ;;  %v1424_v11 = vpop.f32.mrf.mxu0 }
 0x120   : > { %1181 = vst.msk [vmem:[%s2016_s10 + $0x38] sm:$0xff] %vm1173_vm0, %v1746_v10  ;;  %v1058_v12 = vadd.f32 %v1534_v8, %v897_v7  ;;  %v1425_v13 = vadd.f32 %v1424_v11, %v1423_v6  ;;  %v1536_v14 = vpop.f32.mrf.mxu1 }
 0x121   : > { %v1426_v15 = vpop.f32.mrf.mxu0  ;;  %v1537_v17 = vadd.f32 %v1536_v14, %v1535_v9 }
 0x122   : > { %1753 = vtanh.f32 %v1058_v12  ;;  %v902_v16 = vadd.f32 %v1425_v13, %v2006_v34  ;;  %v1538_v18 = vpop.f32.mrf.mxu1 }
 0x123   : > { %v1748_v19 = vpop.eup %1747  ;;  %v1427_v20 = vpop.f32.mrf.mxu0 }
 0x124   : > { %1182 = vst.msk [vmem:[%s2016_s10 + $0x40] sm:$0xff] %vm1173_vm0, %v1748_v19  ;;  %v1063_v21 = vadd.f32 %v1537_v17, %v902_v16  ;;  %v1428_v22 = vadd.f32 %v1427_v20, %v1426_v15  ;;  %v1539_v23 = vpop.f32.mrf.mxu1 }
 0x125   : > { %v1429_v24 = vpop.f32.mrf.mxu0  ;;  %v1540_v26 = vadd.f32 %v1539_v23, %v1538_v18 }
 0x126   : > { %1755 = vtanh.f32 %v1063_v21  ;;  %v905_v25 = vadd.f32 %v1428_v22, %v2006_v34  ;;  %v1541_v27 = vpop.f32.mrf.mxu1 }
 0x127   : > { %v1750_v28 = vpop.eup %1749  ;;  %v1430_v29 = vpop.f32.mrf.mxu0 }
 0x128   : > { %1183 = vst.msk [vmem:[%s2016_s10 + $0x48] sm:$0xff] %vm1173_vm0, %v1750_v28  ;;  %v1066_v30 = vadd.f32 %v1540_v26, %v905_v25  ;;  %v1431_v31 = vadd.f32 %v1430_v29, %v1429_v24  ;;  %v1542_v32 = vpop.f32.mrf.mxu1 }
 0x129   : > { %v1432_v33 = vpop.f32.mrf.mxu0  ;;  %v1543_v36 = vadd.f32 %v1542_v32, %v1541_v27 }
 0x12a   : > { %1757 = vtanh.f32 %v1066_v30  ;;  %v910_v35 = vadd.f32 %v1431_v31, %v2006_v34  ;;  %v1544_v37 = vpop.f32.mrf.mxu1 }
 0x12b   : > { %v1752_v38 = vpop.eup %1751  ;;  %v1433_v39 = vpop.f32.mrf.mxu0 }
 0x12c   : > { %1184 = vst.msk [vmem:[%s2016_s10 + $0x50] sm:$0xff] %vm1173_vm0, %v1752_v38  ;;  %v1071_v40 = vadd.f32 %v1543_v36, %v910_v35  ;;  %v1434_v41 = vadd.f32 %v1433_v39, %v1432_v33  ;;  %v1545_v42 = vpop.f32.mrf.mxu1 }
 0x12d   : > { %v1435_v43 = vpop.f32.mrf.mxu0  ;;  %v1546_v45 = vadd.f32 %v1545_v42, %v1544_v37 }
 0x12e   : > { %1759 = vtanh.f32 %v1071_v40  ;;  %v913_v44 = vadd.f32 %v1434_v41, %v2006_v34  ;;  %v1547_v46 = vpop.f32.mrf.mxu1 }
 0x12f   : > { %v1754_v47 = vpop.eup %1753  ;;  %v1436_v48 = vpop.f32.mrf.mxu0 }
 0x130   : > { %1185 = vst.msk [vmem:[%s2016_s10 + $0x58] sm:$0xff] %vm1173_vm0, %v1754_v47  ;;  %v1074_v49 = vadd.f32 %v1546_v45, %v913_v44  ;;  %v1437_v50 = vadd.f32 %v1436_v48, %v1435_v43  ;;  %v1548_v51 = vpop.f32.mrf.mxu1 }
 0x131   : > { %v1438_v52 = vpop.f32.mrf.mxu0  ;;  %v1549_v54 = vadd.f32 %v1548_v51, %v1547_v46 }
 0x132   : > { %1761 = vtanh.f32 %v1074_v49  ;;  %v918_v53 = vadd.f32 %v1437_v50, %v2006_v34  ;;  %v1550_v55 = vpop.f32.mrf.mxu1 }
 0x133   : > { %v1756_v56 = vpop.eup %1755  ;;  %v1439_v57 = vpop.f32.mrf.mxu0 }
 0x134   : > { %1186 = vst.msk [vmem:[%s2016_s10 + $0x60] sm:$0xff] %vm1173_vm0, %v1756_v56  ;;  %v1079_v58 = vadd.f32 %v1549_v54, %v918_v53  ;;  %v1440_v59 = vadd.f32 %v1439_v57, %v1438_v52  ;;  %v1551_v60 = vpop.f32.mrf.mxu1 }
 0x135   : > { %v1441_v61 = vpop.f32.mrf.mxu0  ;;  %v1552_v63 = vadd.f32 %v1551_v60, %v1550_v55 }
 0x136   : > { %1763 = vtanh.f32 %v1079_v58  ;;  %v921_v62 = vadd.f32 %v1440_v59, %v2006_v34  ;;  %v1553_v0 = vpop.f32.mrf.mxu1 }
 0x137   : > { %v1758_v1 = vpop.eup %1757  ;;  %v1442_v2 = vpop.f32.mrf.mxu0 }
 0x138   : > { %1187 = vst.msk [vmem:[%s2016_s10 + $0x68] sm:$0xff] %vm1173_vm0, %v1758_v1  ;;  %v1082_v3 = vadd.f32 %v1552_v63, %v921_v62  ;;  %v1443_v4 = vadd.f32 %v1442_v2, %v1441_v61  ;;  %v1554_v5 = vpop.f32.mrf.mxu1 }
 0x139   : > { %v1444_v6 = vpop.f32.mrf.mxu0  ;;  %v1555_v8 = vadd.f32 %v1554_v5, %v1553_v0 }
 0x13a   : > { %1765 = vtanh.f32 %v1082_v3  ;;  %v926_v7 = vadd.f32 %v1443_v4, %v2006_v34  ;;  %v1556_v9 = vpop.f32.mrf.mxu1 }
 0x13b   : > { %v1760_v10 = vpop.eup %1759  ;;  %v1445_v11 = vpop.f32.mrf.mxu0 }
 0x13c   : > { %1188 = vst.msk [vmem:[%s2016_s10 + $0x70] sm:$0xff] %vm1173_vm0, %v1760_v10  ;;  %v1087_v12 = vadd.f32 %v1555_v8, %v926_v7  ;;  %v1446_v13 = vadd.f32 %v1445_v11, %v1444_v6  ;;  %v1557_v14 = vpop.f32.mrf.mxu1 }
 0x13d   : > { %v1447_v15 = vpop.f32.mrf.mxu0  ;;  %v1558_v17 = vadd.f32 %v1557_v14, %v1556_v9 }
 0x13e   : > { %1767 = vtanh.f32 %v1087_v12  ;;  %v929_v16 = vadd.f32 %v1446_v13, %v2006_v34  ;;  %v1559_v18 = vpop.f32.mrf.mxu1 }
 0x13f   : > { %v1762_v19 = vpop.eup %1761  ;;  %v1448_v20 = vpop.f32.mrf.mxu0 }
 0x140   : > { %1189 = vst.msk [vmem:[%s2016_s10 + $0x78] sm:$0xff] %vm1173_vm0, %v1762_v19  ;;  %v1090_v21 = vadd.f32 %v1558_v17, %v929_v16  ;;  %v1449_v22 = vadd.f32 %v1448_v20, %v1447_v15  ;;  %v1560_v23 = vpop.f32.mrf.mxu1 }
 0x141   : > { %v1450_v24 = vpop.f32.mrf.mxu0  ;;  %v1561_v26 = vadd.f32 %v1560_v23, %v1559_v18 }
 0x142   : > { %1769 = vtanh.f32 %v1090_v21  ;;  %v934_v25 = vadd.f32 %v1449_v22, %v2006_v34  ;;  %v1562_v27 = vpop.f32.mrf.mxu1 }
 0x143   : > { %v1764_v28 = vpop.eup %1763  ;;  %v1451_v29 = vpop.f32.mrf.mxu0 }
 0x144   : > { %1190 = vst.msk [vmem:[%s2016_s10 + $0x80] sm:$0xff] %vm1173_vm0, %v1764_v28  ;;  %v1095_v30 = vadd.f32 %v1561_v26, %v934_v25  ;;  %v1452_v31 = vadd.f32 %v1451_v29, %v1450_v24  ;;  %v1563_v32 = vpop.f32.mrf.mxu1 }
 0x145   : > { %v1453_v33 = vpop.f32.mrf.mxu0  ;;  %v1564_v36 = vadd.f32 %v1563_v32, %v1562_v27 }
 0x146   : > { %1771 = vtanh.f32 %v1095_v30  ;;  %v937_v35 = vadd.f32 %v1452_v31, %v2006_v34  ;;  %v1565_v37 = vpop.f32.mrf.mxu1 }
 0x147   : > { %v1766_v38 = vpop.eup %1765  ;;  %v1454_v39 = vpop.f32.mrf.mxu0 }
 0x148   : > { %1191 = vst.msk [vmem:[%s2016_s10 + $0x88] sm:$0xff] %vm1173_vm0, %v1766_v38  ;;  %v1098_v40 = vadd.f32 %v1564_v36, %v937_v35  ;;  %v1455_v41 = vadd.f32 %v1454_v39, %v1453_v33  ;;  %v1566_v42 = vpop.f32.mrf.mxu1 }
 0x149   : > { %v1456_v43 = vpop.f32.mrf.mxu0  ;;  %v1567_v45 = vadd.f32 %v1566_v42, %v1565_v37 }
 0x14a   : > { %1773 = vtanh.f32 %v1098_v40  ;;  %v942_v44 = vadd.f32 %v1455_v41, %v2006_v34  ;;  %v1568_v46 = vpop.f32.mrf.mxu1 }
 0x14b   : > { %v1768_v47 = vpop.eup %1767  ;;  %v1457_v48 = vpop.f32.mrf.mxu0 }
 0x14c   : > { %1192 = vst.msk [vmem:[%s2016_s10 + $0x90] sm:$0xff] %vm1173_vm0, %v1768_v47  ;;  %v1103_v49 = vadd.f32 %v1567_v45, %v942_v44  ;;  %v1458_v50 = vadd.f32 %v1457_v48, %v1456_v43  ;;  %v1569_v51 = vpop.f32.mrf.mxu1 }
 0x14d   : > { %v1459_v52 = vpop.f32.mrf.mxu0  ;;  %v1570_v54 = vadd.f32 %v1569_v51, %v1568_v46 }
 0x14e   : > { %1775 = vtanh.f32 %v1103_v49  ;;  %v945_v53 = vadd.f32 %v1458_v50, %v2006_v34  ;;  %v1571_v55 = vpop.f32.mrf.mxu1 }
 0x14f   : > { %v1770_v56 = vpop.eup %1769  ;;  %v1460_v57 = vpop.f32.mrf.mxu0 }
 0x150   : > { %1193 = vst.msk [vmem:[%s2016_s10 + $0x98] sm:$0xff] %vm1173_vm0, %v1770_v56  ;;  %v1106_v58 = vadd.f32 %v1570_v54, %v945_v53  ;;  %v1461_v59 = vadd.f32 %v1460_v57, %v1459_v52  ;;  %v1572_v60 = vpop.f32.mrf.mxu1 }
 0x151   : > { %v1462_v61 = vpop.f32.mrf.mxu0  ;;  %v1573_v63 = vadd.f32 %v1572_v60, %v1571_v55 }
 0x152   : > { %1777 = vtanh.f32 %v1106_v58  ;;  %v950_v62 = vadd.f32 %v1461_v59, %v2006_v34  ;;  %v1574_v0 = vpop.f32.mrf.mxu1 }
 0x153   : > { %v1772_v1 = vpop.eup %1771  ;;  %v1463_v2 = vpop.f32.mrf.mxu0 }
 0x154   : > { %1194 = vst.msk [vmem:[%s2016_s10 + $0xa0] sm:$0xff] %vm1173_vm0, %v1772_v1  ;;  %v1111_v3 = vadd.f32 %v1573_v63, %v950_v62  ;;  %v1464_v4 = vadd.f32 %v1463_v2, %v1462_v61  ;;  %v1575_v5 = vpop.f32.mrf.mxu1 }
 0x155   : > { %v1465_v6 = vpop.f32.mrf.mxu0  ;;  %v1576_v8 = vadd.f32 %v1575_v5, %v1574_v0 }
 0x156   : > { %1779 = vtanh.f32 %v1111_v3  ;;  %v953_v7 = vadd.f32 %v1464_v4, %v2006_v34  ;;  %v1577_v9 = vpop.f32.mrf.mxu1 }
 0x157   : > { %v1774_v10 = vpop.eup %1773  ;;  %v1466_v11 = vpop.f32.mrf.mxu0 }
 0x158   : > { %1195 = vst.msk [vmem:[%s2016_s10 + $0xa8] sm:$0xff] %vm1173_vm0, %v1774_v10  ;;  %v1114_v12 = vadd.f32 %v1576_v8, %v953_v7  ;;  %v1467_v13 = vadd.f32 %v1466_v11, %v1465_v6  ;;  %v1578_v14 = vpop.f32.mrf.mxu1 }
 0x159   : > { %v1468_v15 = vpop.f32.mrf.mxu0  ;;  %v1579_v17 = vadd.f32 %v1578_v14, %v1577_v9 }
 0x15a   : > { %1781 = vtanh.f32 %v1114_v12  ;;  %v958_v16 = vadd.f32 %v1467_v13, %v2006_v34  ;;  %v1580_v18 = vpop.f32.mrf.mxu1 }
 0x15b   : > { %v1776_v19 = vpop.eup %1775  ;;  %v1469_v20 = vpop.f32.mrf.mxu0 }
 0x15c   : > { %1196 = vst.msk [vmem:[%s2016_s10 + $0xb0] sm:$0xff] %vm1173_vm0, %v1776_v19  ;;  %v1119_v21 = vadd.f32 %v1579_v17, %v958_v16  ;;  %v1470_v22 = vadd.f32 %v1469_v20, %v1468_v15  ;;  %v1581_v23 = vpop.f32.mrf.mxu1 }
 0x15d   : > { %v1471_v24 = vpop.f32.mrf.mxu0  ;;  %v1582_v26 = vadd.f32 %v1581_v23, %v1580_v18 }
 0x15e   : > { %1783 = vtanh.f32 %v1119_v21  ;;  %v961_v25 = vadd.f32 %v1470_v22, %v2006_v34  ;;  %v1583_v27 = vpop.f32.mrf.mxu1 }
 0x15f   : > { %v1778_v28 = vpop.eup %1777  ;;  %v1472_v29 = vpop.f32.mrf.mxu0 }
 0x160   : > { %1197 = vst.msk [vmem:[%s2016_s10 + $0xb8] sm:$0xff] %vm1173_vm0, %v1778_v28  ;;  %v1122_v30 = vadd.f32 %v1582_v26, %v961_v25  ;;  %v1473_v31 = vadd.f32 %v1472_v29, %v1471_v24  ;;  %v1584_v32 = vpop.f32.mrf.mxu1 }
 0x161   : > { %v1474_v33 = vpop.f32.mrf.mxu0  ;;  %v1585_v36 = vadd.f32 %v1584_v32, %v1583_v27 }
 0x162   : > { %1785 = vtanh.f32 %v1122_v30  ;;  %v966_v35 = vadd.f32 %v1473_v31, %v2006_v34  ;;  %v1586_v37 = vpop.f32.mrf.mxu1 }
 0x163   : > { %v1780_v38 = vpop.eup %1779  ;;  %v1475_v39 = vpop.f32.mrf.mxu0 }
 0x164   : > { %1198 = vst.msk [vmem:[%s2016_s10 + $0xc0] sm:$0xff] %vm1173_vm0, %v1780_v38  ;;  %v1127_v40 = vadd.f32 %v1585_v36, %v966_v35  ;;  %v1476_v41 = vadd.f32 %v1475_v39, %v1474_v33  ;;  %v1587_v42 = vpop.f32.mrf.mxu1 }
 0x165   : > { %v1477_v43 = vpop.f32.mrf.mxu0  ;;  %v1588_v45 = vadd.f32 %v1587_v42, %v1586_v37 }
 0x166   : > { %1787 = vtanh.f32 %v1127_v40  ;;  %v969_v44 = vadd.f32 %v1476_v41, %v2006_v34  ;;  %v1589_v46 = vpop.f32.mrf.mxu1 }
 0x167   : > { %v1782_v47 = vpop.eup %1781  ;;  %v1478_v48 = vpop.f32.mrf.mxu0 }
 0x168   : > { %1199 = vst.msk [vmem:[%s2016_s10 + $0xc8] sm:$0xff] %vm1173_vm0, %v1782_v47  ;;  %v1130_v49 = vadd.f32 %v1588_v45, %v969_v44  ;;  %v1479_v50 = vadd.f32 %v1478_v48, %v1477_v43  ;;  %v1590_v51 = vpop.f32.mrf.mxu1 }
 0x169   : > { %v1480_v52 = vpop.f32.mrf.mxu0  ;;  %v1591_v54 = vadd.f32 %v1590_v51, %v1589_v46 }
 0x16a   : > { %1789 = vtanh.f32 %v1130_v49  ;;  %v974_v53 = vadd.f32 %v1479_v50, %v2006_v34  ;;  %v1592_v55 = vpop.f32.mrf.mxu1 }
 0x16b   : > { %v1784_v56 = vpop.eup %1783  ;;  %v1481_v57 = vpop.f32.mrf.mxu0 }
 0x16c   : > { %1200 = vst.msk [vmem:[%s2016_s10 + $0xd0] sm:$0xff] %vm1173_vm0, %v1784_v56  ;;  %v1135_v58 = vadd.f32 %v1591_v54, %v974_v53  ;;  %v1482_v59 = vadd.f32 %v1481_v57, %v1480_v52  ;;  %v1593_v60 = vpop.f32.mrf.mxu1 }
 0x16d   : > { %v1594_v62 = vadd.f32 %v1593_v60, %v1592_v55 }
 0x16e   : > { %1791 = vtanh.f32 %v1135_v58  ;;  %v977_v61 = vadd.f32 %v1482_v59, %v2006_v34 }
 0x16f   : > { %v1786_v63 = vpop.eup %1785 }
 0x170   : > { %1201 = vst.msk [vmem:[%s2016_s10 + $0xd8] sm:$0xff] %vm1173_vm0, %v1786_v63  ;;  %v1138_v0 = vadd.f32 %v1594_v62, %v977_v61 }
 0x172   : > { %1793 = vtanh.f32 %v1138_v0 }
 0x173   : > { %v1788_v1 = vpop.eup %1787 }
 0x174   : > { %1202 = vst.msk [vmem:[%s2016_s10 + $0xe0] sm:$0xff] %vm1173_vm0, %v1788_v1 }
 0x177   : > { %v1790_v2 = vpop.eup %1789 }
 0x178   : > { %1203 = vst.msk [vmem:[%s2016_s10 + $0xe8] sm:$0xff] %vm1173_vm0, %v1790_v2 }
 0x17b   : > { %v1792_v3 = vpop.eup %1791 }
 0x17c   : > { %1204 = vst.msk [vmem:[%s2016_s10 + $0xf0] sm:$0xff] %vm1173_vm0, %v1792_v3 }
 0x17f   : > { %v1794_v4 = vpop.eup %1793 }
 0x180   : > { %1205 = vst.msk [vmem:[%s2016_s10 + $0xf8] sm:$0xff] %vm1173_vm0, %v1794_v4 }
 0x181 PF: > { %s13_s12 = sadd.s32 1, %s1801_s12  }
 0x182   : > { %p10_p4 = scmp.ge.s32.totalorder %s13_s12, 4  }
 0x184   :  { %12 = sbr.rel (!%p10_p4) target bundleno = 1 (0x1), region = 62 }

</bundles_post_ra>
